<compile_context>
chip_gen: v5e
topology: v5e:2x2
jax: 0.10.0
libtpu: 0.0.40
codegen_flags: <defaults>
</compile_context>

<pallas_src>
import functools

import jax
import jax.numpy as jnp
from jax.experimental import pallas as pl
from jax.experimental.pallas import tpu as pltpu


def _dwconv3x3_kernel(x_ref, top_ref, bot_ref, w_ref, b_ref, o_ref, pad_ref, *, subh):
    # x_ref  : (TH, W, TC)     input row-tile (no halo), stored dtype
    # top_ref: (1,  W, TC)     input row just above the tile (zeros at image top)
    # bot_ref: (1,  W, TC)     input row just below the tile (zeros at image bottom)
    # w_ref  : (9,  TC) f32    depthwise taps, row-major (kh*3 + kw, c)
    # b_ref  : (1,  TC) f32    bias
    # o_ref  : (TH, W, TC)     output row-tile
    # pad_ref: (TH+2, W+2, TC) f32 VMEM scratch: zero-padded, upcast copy of the tile
    TH, W, TC = o_ref.shape
    f32 = jnp.float32

    # ---- Fill the padded scratch: exactly ONE upcast pass over the tile. ----
    # Border columns (j == 0 and j == W+1) must be zero.  The scratch is persistent and
    # uninitialized, so re-zero just those two columns every grid step (negligible).
    zcol = jnp.zeros((TH + 2, 1, TC), f32)
    pad_ref[pl.ds(0, TH + 2), pl.ds(0, 1), :] = zcol
    pad_ref[pl.ds(0, TH + 2), pl.ds(W + 1, 1), :] = zcol
    pad_ref[pl.ds(0, 1), pl.ds(1, W), :] = top_ref[...].astype(f32)
    pad_ref[pl.ds(TH + 1, 1), pl.ds(1, W), :] = bot_ref[...].astype(f32)
    pad_ref[pl.ds(1, TH), pl.ds(1, W), :] = x_ref[...].astype(f32)

    # ---- Hoist per-channel taps / bias out of the strip loop (tiny, stay in vregs). ----
    taps = [w_ref[i, :].astype(f32) for i in range(9)]
    bias_v = b_ref[0, :].astype(f32)

    # ---- Strip loop: SUBH rows at a time bounds live ranges (no full-tile f32 temps). ----
    n_strips = TH // subh

    @pl.loop(0, n_strips)
    def _(s):
        r0 = s * subh
        if subh % 8 == 0:
            r0 = pl.multiple_of(r0, 8)
        # out[i, j, c] = bias[c] + sum_{kh,kw} pad[i + kh, j + kw, c] * w[kh, kw, c]
        acc = pad_ref[pl.ds(r0, subh), pl.ds(0, W), :] * taps[0] + bias_v
        for kh in range(3):
            for kw in range(3):
                if kh == 0 and kw == 0:
                    continue
                acc = acc + (pad_ref[pl.ds(r0 + kh, subh), pl.ds(kw, W), :]
                             * taps[kh * 3 + kw])
        o_ref[pl.ds(r0, subh), :, :] = acc.astype(o_ref.dtype)


def dwconv(x, H, W, weight, bias, *, row_tile=None, block_budget_bytes=2 * 1024 * 1024):
    """Matches DWConv.forward: x is (B, N, C) with N == H * W.

    weight: (3, 3, C)  -- tap (kh, kw) of channel c  (== torch weight[c, 0, kh, kw])
    bias:   (C,)
    """
    B, N, C = x.shape
    assert N == H * W, "N must equal H*W"

    # Channel tile: lane-dense multiple of 128 when possible (unmasked stores, resident
    # weights); grow TC before TH.  Fall back to the full C otherwise (full-extent last
    # dim is always a legal block; stores are lane-masked -> perf only, not correctness).
    TC = next((c for c in (512, 384, 256, 128) if C % c == 0), C)

    itemsize = jnp.dtype(x.dtype).itemsize

    if row_tile is None:
        TH = 1
        for cand in range(1, H + 1):
            if H % cand == 0 and cand * W * TC * itemsize <= block_budget_bytes:
                TH = cand
    else:
        TH = int(row_tile)
        assert H % TH == 0, "row_tile must divide H"
    R = H // TH

    # v7x has 2 TensorCores per chip: avoid a degenerate 1-step grid.
    if row_tile is None and (C // TC) * B * R < 2 and H > 1:
        TH = max(d for d in range(1, H) if H % d == 0)   # largest proper divisor
        R = H // TH

    # Strip height: largest divisor of TH that is <= 8 (sublane granule).
    SUBH = max(d for d in range(1, min(TH, 8) + 1) if TH % d == 0)

    x_nhwc = x.reshape(B, H, W, C)   # free reshape, no HBM pass

    # One-row halos per row-tile (instead of a full jnp.pad pass over the activation):
    #   top halo of row-tile r = input row r*TH - 1   (zeros for r == 0)
    #   bot halo of row-tile r = input row (r+1)*TH   (zeros for r == R-1)
    zero_row = jnp.zeros((B, 1, W, C), x.dtype)
    x_top = jnp.concatenate([zero_row, x_nhwc[:, TH - 1:H - 1:TH]], axis=1)  # (B, R, W, C)
    x_bot = jnp.concatenate([x_nhwc[:, TH::TH], zero_row], axis=1)           # (B, R, W, C)
    # TODO(synk): the halo rows could be DMA'd in-kernel from an ANY-space ref to drop
    # these two small host-side gathers entirely (few-% end-to-end per the review).

    w_flat = weight.reshape(9, C).astype(jnp.float32)
    b_row = bias.reshape(1, C).astype(jnp.float32)

    grid = (C // TC, B, R)

    flops = (2 * 9 + 1) * B * H * W * C
    bytes_accessed = (2 * B * H * W * C + 2 * B * R * W * C) * itemsize + 10 * C * 4
    cost = pl.CostEstimate(flops=flops, transcendentals=0, bytes_accessed=bytes_accessed)

    kernel = functools.partial(_dwconv3x3_kernel, subh=SUBH)

    out = pl.pallas_call(
        kernel,
        out_shape=jax.ShapeDtypeStruct((B, H, W, C), x.dtype),
        grid_spec=pltpu.PrefetchScalarGridSpec(
            num_scalar_prefetch=0,
            grid=grid,
            in_specs=[
                pl.BlockSpec((None, TH, W, TC), lambda c, b, r: (b, r, 0, c)),
                pl.BlockSpec((None, 1, W, TC), lambda c, b, r: (b, r, 0, c)),
                pl.BlockSpec((None, 1, W, TC), lambda c, b, r: (b, r, 0, c)),
                pl.BlockSpec((9, TC), lambda c, b, r: (0, c)),
                pl.BlockSpec((1, TC), lambda c, b, r: (0, c)),
            ],
            out_specs=pl.BlockSpec((None, TH, W, TC), lambda c, b, r: (b, r, 0, c)),
            scratch_shapes=[pltpu.VMEM((TH + 2, W + 2, TC), jnp.float32)],
        ),
        compiler_params=pltpu.CompilerParams(
            dimension_semantics=("parallel", "parallel", "parallel"),
            vmem_limit_bytes=32 * 1024 * 1024,
        ),
        cost_estimate=cost,
    )(x_nhwc, x_top, x_bot, w_flat, b_row)

    return out.reshape(B, N, C)


if __name__ == "__main__":
    key = jax.random.PRNGKey(0)

    def reference(x, H, W, weight, bias):
        B, N, C = x.shape
        x_nhwc = x.reshape(B, H, W, C)
        w_hwio = weight.reshape(3, 3, 1, C)
        ref = jax.lax.conv_general_dilated(
            x_nhwc, w_hwio, window_strides=(1, 1), padding="SAME",
            dimension_numbers=("NHWC", "HWIO", "NHWC"), feature_group_count=C,
        ) + bias
        return ref.reshape(B, N, C)

    def run_case(k, B, C, H, W, **kw):
        k1, k2, k3 = jax.random.split(k, 3)
        x = jax.random.normal(k1, (B, H * W, C), jnp.float32)
        # shapes from nn.Conv2d(dim, dim, 3, 1, 1, groups=dim): torch (C,1,3,3) -> (3,3,C)
        weight = 0.1 * jax.random.normal(k2, (3, 3, C), jnp.float32)
        bias = 0.1 * jax.random.normal(k3, (C,), jnp.float32)
        out = jax.block_until_ready(dwconv(x, H, W, weight, bias, **kw))
        ref = reference(x, H, W, weight, bias)
        assert jnp.allclose(out, ref, atol=1e-5, rtol=1e-5), (
            f"mismatch vs reference: B={B} C={C} H={H} W={W} kw={kw}")

    k1, k2, k3 = jax.random.split(key, 3)
    # Forced multi-row-tile path: halo rows + strip loop + TC=256, grid (1, 2, 2).
    run_case(k1, B=2, C=256, H=16, W=16, row_tile=8)
    # Auto tile-size path: single row tile (zero-halo boundary case), 2 strips of 8.
    run_case(k2, B=2, C=256, H=16, W=16)
    # Small-spatial / non-128-multiple channel fallback (TC=C=64, SUBH=7, one strip).
    run_case(k3, B=2, C=64, H=7, W=7)

    print("KERNEL_OK")
</pallas_src>

<mosaic_0001>
module attributes {stable_mosaic.version = 11 : i64} {
  func.func @_dwconv3x3_kernel(%arg0: i32, %arg1: i32, %arg2: i32, %arg3: memref<1x8x16x256xf32, #tpu.memory_space<vmem>>, %arg4: memref<1x1x16x256xf32, #tpu.memory_space<vmem>>, %arg5: memref<1x1x16x256xf32, #tpu.memory_space<vmem>>, %arg6: memref<9x256xf32, #tpu.memory_space<vmem>>, %arg7: memref<1x256xf32, #tpu.memory_space<vmem>>, %arg8: memref<1x8x16x256xf32, #tpu.memory_space<vmem>>, %arg9: memref<10x18x256xf32, #tpu.memory_space<vmem>>) attributes {dimension_semantics = [#tpu.dimension_semantics<parallel>, #tpu.dimension_semantics<parallel>, #tpu.dimension_semantics<parallel>], iteration_bounds = array<i64: 1, 2, 2>, scalar_prefetch = 0 : i64, scratch_operands = 1 : i64, tpu.core_type = #tpu.core_type<tc>, window_params = [{transform_indices = @transform_0, window_bounds = array<i64: 1, 8, 16, 256>}, {transform_indices = @transform_1, window_bounds = array<i64: 1, 1, 16, 256>}, {transform_indices = @transform_2, window_bounds = array<i64: 1, 1, 16, 256>}, {transform_indices = @transform_3, window_bounds = array<i64: 9, 256>}, {transform_indices = @transform_4, window_bounds = array<i64: 1, 256>}, {transform_indices = @transform_5, window_bounds = array<i64: 1, 8, 16, 256>}]} {
    %cst = arith.constant 0.000000e+00 : f32
    %0 = vector.broadcast %cst : f32 to vector<10x1x256xf32>
    %c0 = arith.constant 0 : index
    %c0_0 = arith.constant 0 : index
    %c0_1 = arith.constant 0 : index
    %1 = vector.load %arg9[%c0, %c0_0, %c0_1] : memref<10x18x256xf32, #tpu.memory_space<vmem>>, vector<10x1x256xf32>
    tpu.vector_store %arg9[%c0, %c0_0, %c0_1], %0 {strides = array<i32>} : memref<10x18x256xf32, #tpu.memory_space<vmem>>, vector<10x1x256xf32>,
    %c0_2 = arith.constant 0 : index
    %c17 = arith.constant 17 : index
    %c0_3 = arith.constant 0 : index
    %2 = vector.load %arg9[%c0_2, %c17, %c0_3] : memref<10x18x256xf32, #tpu.memory_space<vmem>>, vector<10x1x256xf32>
    tpu.vector_store %arg9[%c0_2, %c17, %c0_3], %0 {strides = array<i32>} : memref<10x18x256xf32, #tpu.memory_space<vmem>>, vector<10x1x256xf32>,
    %c0_4 = arith.constant 0 : index
    %c0_5 = arith.constant 0 : index
    %c0_6 = arith.constant 0 : index
    %c0_7 = arith.constant 0 : index
    %3 = vector.load %arg4[%c0_4, %c0_5, %c0_6, %c0_7] : memref<1x1x16x256xf32, #tpu.memory_space<vmem>>, vector<1x1x16x256xf32>
    %4 = vector.shape_cast %3 : vector<1x1x16x256xf32> to vector<1x16x256xf32>
    %c0_8 = arith.constant 0 : index
    %c1 = arith.constant 1 : index
    %c0_9 = arith.constant 0 : index
    %5 = vector.load %arg9[%c0_8, %c1, %c0_9] : memref<10x18x256xf32, #tpu.memory_space<vmem>>, vector<1x16x256xf32>
    tpu.vector_store %arg9[%c0_8, %c1, %c0_9], %4 {strides = array<i32>} : memref<10x18x256xf32, #tpu.memory_space<vmem>>, vector<1x16x256xf32>,
    %c0_10 = arith.constant 0 : index
    %c0_11 = arith.constant 0 : index
    %c0_12 = arith.constant 0 : index
    %c0_13 = arith.constant 0 : index
    %6 = vector.load %arg5[%c0_10, %c0_11, %c0_12, %c0_13] : memref<1x1x16x256xf32, #tpu.memory_space<vmem>>, vector<1x1x16x256xf32>
    %7 = vector.shape_cast %6 : vector<1x1x16x256xf32> to vector<1x16x256xf32>
    %c9 = arith.constant 9 : index
    %c1_14 = arith.constant 1 : index
    %c0_15 = arith.constant 0 : index
    %8 = vector.load %arg9[%c9, %c1_14, %c0_15] : memref<10x18x256xf32, #tpu.memory_space<vmem>>, vector<1x16x256xf32>
    tpu.vector_store %arg9[%c9, %c1_14, %c0_15], %7 {strides = array<i32>} : memref<10x18x256xf32, #tpu.memory_space<vmem>>, vector<1x16x256xf32>,
    %c0_16 = arith.constant 0 : index
    %c0_17 = arith.constant 0 : index
    %c0_18 = arith.constant 0 : index
    %c0_19 = arith.constant 0 : index
    %9 = vector.load %arg3[%c0_16, %c0_17, %c0_18, %c0_19] : memref<1x8x16x256xf32, #tpu.memory_space<vmem>>, vector<1x8x16x256xf32>
    %10 = vector.shape_cast %9 : vector<1x8x16x256xf32> to vector<8x16x256xf32>
    %c1_20 = arith.constant 1 : index
    %c1_21 = arith.constant 1 : index
    %c0_22 = arith.constant 0 : index
    %11 = vector.load %arg9[%c1_20, %c1_21, %c0_22] : memref<10x18x256xf32, #tpu.memory_space<vmem>>, vector<8x16x256xf32>
    tpu.vector_store %arg9[%c1_20, %c1_21, %c0_22], %10 {strides = array<i32>} : memref<10x18x256xf32, #tpu.memory_space<vmem>>, vector<8x16x256xf32>,
    %c0_23 = arith.constant 0 : index
    %c0_24 = arith.constant 0 : index
    %12 = vector.load %arg6[%c0_23, %c0_24] : memref<9x256xf32, #tpu.memory_space<vmem>>, vector<1x256xf32>
    %13 = vector.shape_cast %12 : vector<1x256xf32> to vector<256xf32>
    %c1_25 = arith.constant 1 : index
    %c0_26 = arith.constant 0 : index
    %14 = vector.load %arg6[%c1_25, %c0_26] : memref<9x256xf32, #tpu.memory_space<vmem>>, vector<1x256xf32>
    %15 = vector.shape_cast %14 : vector<1x256xf32> to vector<256xf32>
    %c2 = arith.constant 2 : index
    %c0_27 = arith.constant 0 : index
    %16 = vector.load %arg6[%c2, %c0_27] : memref<9x256xf32, #tpu.memory_space<vmem>>, vector<1x256xf32>
    %17 = vector.shape_cast %16 : vector<1x256xf32> to vector<256xf32>
    %c3 = arith.constant 3 : index
    %c0_28 = arith.constant 0 : index
    %18 = vector.load %arg6[%c3, %c0_28] : memref<9x256xf32, #tpu.memory_space<vmem>>, vector<1x256xf32>
    %19 = vector.shape_cast %18 : vector<1x256xf32> to vector<256xf32>
    %c4 = arith.constant 4 : index
    %c0_29 = arith.constant 0 : index
    %20 = vector.load %arg6[%c4, %c0_29] : memref<9x256xf32, #tpu.memory_space<vmem>>, vector<1x256xf32>
    %21 = vector.shape_cast %20 : vector<1x256xf32> to vector<256xf32>
    %c5 = arith.constant 5 : index
    %c0_30 = arith.constant 0 : index
    %22 = vector.load %arg6[%c5, %c0_30] : memref<9x256xf32, #tpu.memory_space<vmem>>, vector<1x256xf32>
    %23 = vector.shape_cast %22 : vector<1x256xf32> to vector<256xf32>
    %c6 = arith.constant 6 : index
    %c0_31 = arith.constant 0 : index
    %24 = vector.load %arg6[%c6, %c0_31] : memref<9x256xf32, #tpu.memory_space<vmem>>, vector<1x256xf32>
    %25 = vector.shape_cast %24 : vector<1x256xf32> to vector<256xf32>
    %c7 = arith.constant 7 : index
    %c0_32 = arith.constant 0 : index
    %26 = vector.load %arg6[%c7, %c0_32] : memref<9x256xf32, #tpu.memory_space<vmem>>, vector<1x256xf32>
    %27 = vector.shape_cast %26 : vector<1x256xf32> to vector<256xf32>
    %c8 = arith.constant 8 : index
    %c0_33 = arith.constant 0 : index
    %28 = vector.load %arg6[%c8, %c0_33] : memref<9x256xf32, #tpu.memory_space<vmem>>, vector<1x256xf32>
    %29 = vector.shape_cast %28 : vector<1x256xf32> to vector<256xf32>
    %c0_34 = arith.constant 0 : index
    %c0_35 = arith.constant 0 : index
    %30 = vector.load %arg7[%c0_34, %c0_35] : memref<1x256xf32, #tpu.memory_space<vmem>>, vector<1x256xf32>
    %31 = vector.shape_cast %30 : vector<1x256xf32> to vector<256xf32>
    %c0_i32 = arith.constant 0 : i32
    %c1_i32 = arith.constant 1 : i32
    %32 = arith.muli %c0_i32, %c1_i32 : i32
    %c0_i32_36 = arith.constant 0 : i32
    %33 = arith.addi %c0_i32_36, %32 : i32
    %c8_i32 = arith.constant 8 : i32
    %34 = arith.muli %33, %c8_i32 : i32
    %35 = tpu.assume_multiple %34, 8 : i32
    %36 = arith.index_cast %35 : i32 to index
    %c0_37 = arith.constant 0 : index
    %c0_38 = arith.constant 0 : index
    %37 = vector.load %arg9[%36, %c0_37, %c0_38] : memref<10x18x256xf32, #tpu.memory_space<vmem>>, vector<8x16x256xf32>
    %38 = vector.shape_cast %13 : vector<256xf32> to vector<1x1x256xf32>
    %39 = vector.broadcast %38 : vector<1x1x256xf32> to vector<8x16x256xf32>
    %40 = arith.mulf %37, %39 : vector<8x16x256xf32>
    %41 = vector.shape_cast %31 : vector<256xf32> to vector<1x1x256xf32>
    %42 = vector.broadcast %41 : vector<1x1x256xf32> to vector<8x16x256xf32>
    %43 = arith.addf %40, %42 : vector<8x16x256xf32>
    %c0_i32_39 = arith.constant 0 : i32
    %44 = arith.addi %35, %c0_i32_39 : i32
    %45 = arith.index_cast %44 : i32 to index
    %c1_40 = arith.constant 1 : index
    %c0_41 = arith.constant 0 : index
    %46 = vector.load %arg9[%45, %c1_40, %c0_41] : memref<10x18x256xf32, #tpu.memory_space<vmem>>, vector<8x16x256xf32>
    %47 = vector.shape_cast %15 : vector<256xf32> to vector<1x1x256xf32>
    %48 = vector.broadcast %47 : vector<1x1x256xf32> to vector<8x16x256xf32>
    %49 = arith.mulf %46, %48 : vector<8x16x256xf32>
    %50 = arith.addf %43, %49 : vector<8x16x256xf32>
    %c0_i32_42 = arith.constant 0 : i32
    %51 = arith.addi %35, %c0_i32_42 : i32
    %52 = arith.index_cast %51 : i32 to index
    %c2_43 = arith.constant 2 : index
    %c0_44 = arith.constant 0 : index
    %53 = vector.load %arg9[%52, %c2_43, %c0_44] : memref<10x18x256xf32, #tpu.memory_space<vmem>>, vector<8x16x256xf32>
    %54 = vector.shape_cast %17 : vector<256xf32> to vector<1x1x256xf32>
    %55 = vector.broadcast %54 : vector<1x1x256xf32> to vector<8x16x256xf32>
    %56 = arith.mulf %53, %55 : vector<8x16x256xf32>
    %57 = arith.addf %50, %56 : vector<8x16x256xf32>
    %c1_i32_45 = arith.constant 1 : i32
    %58 = arith.addi %35, %c1_i32_45 : i32
    %59 = arith.index_cast %58 : i32 to index
    %c0_46 = arith.constant 0 : index
    %c0_47 = arith.constant 0 : index
    %60 = vector.load %arg9[%59, %c0_46, %c0_47] : memref<10x18x256xf32, #tpu.memory_space<vmem>>, vector<8x16x256xf32>
    %61 = vector.shape_cast %19 : vector<256xf32> to vector<1x1x256xf32>
    %62 = vector.broadcast %61 : vector<1x1x256xf32> to vector<8x16x256xf32>
    %63 = arith.mulf %60, %62 : vector<8x16x256xf32>
    %64 = arith.addf %57, %63 : vector<8x16x256xf32>
    %c1_i32_48 = arith.constant 1 : i32
    %65 = arith.addi %35, %c1_i32_48 : i32
    %66 = arith.index_cast %65 : i32 to index
    %c1_49 = arith.constant 1 : index
    %c0_50 = arith.constant 0 : index
    %67 = vector.load %arg9[%66, %c1_49, %c0_50] : memref<10x18x256xf32, #tpu.memory_space<vmem>>, vector<8x16x256xf32>
    %68 = vector.shape_cast %21 : vector<256xf32> to vector<1x1x256xf32>
    %69 = vector.broadcast %68 : vector<1x1x256xf32> to vector<8x16x256xf32>
    %70 = arith.mulf %67, %69 : vector<8x16x256xf32>
    %71 = arith.addf %64, %70 : vector<8x16x256xf32>
    %c1_i32_51 = arith.constant 1 : i32
    %72 = arith.addi %35, %c1_i32_51 : i32
    %73 = arith.index_cast %72 : i32 to index
    %c2_52 = arith.constant 2 : index
    %c0_53 = arith.constant 0 : index
    %74 = vector.load %arg9[%73, %c2_52, %c0_53] : memref<10x18x256xf32, #tpu.memory_space<vmem>>, vector<8x16x256xf32>
    %75 = vector.shape_cast %23 : vector<256xf32> to vector<1x1x256xf32>
    %76 = vector.broadcast %75 : vector<1x1x256xf32> to vector<8x16x256xf32>
    %77 = arith.mulf %74, %76 : vector<8x16x256xf32>
    %78 = arith.addf %71, %77 : vector<8x16x256xf32>
    %c2_i32 = arith.constant 2 : i32
    %79 = arith.addi %35, %c2_i32 : i32
    %80 = arith.index_cast %79 : i32 to index
    %c0_54 = arith.constant 0 : index
    %c0_55 = arith.constant 0 : index
    %81 = vector.load %arg9[%80, %c0_54, %c0_55] : memref<10x18x256xf32, #tpu.memory_space<vmem>>, vector<8x16x256xf32>
    %82 = vector.shape_cast %25 : vector<256xf32> to vector<1x1x256xf32>
    %83 = vector.broadcast %82 : vector<1x1x256xf32> to vector<8x16x256xf32>
    %84 = arith.mulf %81, %83 : vector<8x16x256xf32>
    %85 = arith.addf %78, %84 : vector<8x16x256xf32>
    %c2_i32_56 = arith.constant 2 : i32
    %86 = arith.addi %35, %c2_i32_56 : i32
    %87 = arith.index_cast %86 : i32 to index
    %c1_57 = arith.constant 1 : index
    %c0_58 = arith.constant 0 : index
    %88 = vector.load %arg9[%87, %c1_57, %c0_58] : memref<10x18x256xf32, #tpu.memory_space<vmem>>, vector<8x16x256xf32>
    %89 = vector.shape_cast %27 : vector<256xf32> to vector<1x1x256xf32>
    %90 = vector.broadcast %89 : vector<1x1x256xf32> to vector<8x16x256xf32>
    %91 = arith.mulf %88, %90 : vector<8x16x256xf32>
    %92 = arith.addf %85, %91 : vector<8x16x256xf32>
    %c2_i32_59 = arith.constant 2 : i32
    %93 = arith.addi %35, %c2_i32_59 : i32
    %94 = arith.index_cast %93 : i32 to index
    %c2_60 = arith.constant 2 : index
    %c0_61 = arith.constant 0 : index
    %95 = vector.load %arg9[%94, %c2_60, %c0_61] : memref<10x18x256xf32, #tpu.memory_space<vmem>>, vector<8x16x256xf32>
    %96 = vector.shape_cast %29 : vector<256xf32> to vector<1x1x256xf32>
    %97 = vector.broadcast %96 : vector<1x1x256xf32> to vector<8x16x256xf32>
    %98 = arith.mulf %95, %97 : vector<8x16x256xf32>
    %99 = arith.addf %92, %98 : vector<8x16x256xf32>
    %c0_62 = arith.constant 0 : index
    %100 = arith.index_cast %35 : i32 to index
    %c0_63 = arith.constant 0 : index
    %c0_64 = arith.constant 0 : index
    %101 = vector.load %arg8[%c0_62, %100, %c0_63, %c0_64] : memref<1x8x16x256xf32, #tpu.memory_space<vmem>>, vector<1x8x16x256xf32>
    %102 = vector.shape_cast %101 : vector<1x8x16x256xf32> to vector<8x16x256xf32>
    %103 = vector.shape_cast %99 : vector<8x16x256xf32> to vector<1x8x16x256xf32>
    tpu.vector_store %arg8[%c0_62, %100, %c0_63, %c0_64], %103 {strides = array<i32>} : memref<1x8x16x256xf32, #tpu.memory_space<vmem>>, vector<1x8x16x256xf32>,
    %c1_i32_65 = arith.constant 1 : i32
    return
  }
  func.func @transform_0(%arg0: i32, %arg1: i32, %arg2: i32) -> (i32, i32, i32, i32) {
    %c0_i32 = arith.constant 0 : i32
    %c0_i32_0 = arith.constant 0 : i32
    return %arg1, %arg2, %c0_i32, %arg0 : i32, i32, i32, i32
  }
  func.func @transform_1(%arg0: i32, %arg1: i32, %arg2: i32) -> (i32, i32, i32, i32) {
    %c0_i32 = arith.constant 0 : i32
    %c0_i32_0 = arith.constant 0 : i32
    return %arg1, %arg2, %c0_i32, %arg0 : i32, i32, i32, i32
  }
  func.func @transform_2(%arg0: i32, %arg1: i32, %arg2: i32) -> (i32, i32, i32, i32) {
    %c0_i32 = arith.constant 0 : i32
    %c0_i32_0 = arith.constant 0 : i32
    return %arg1, %arg2, %c0_i32, %arg0 : i32, i32, i32, i32
  }
  func.func @transform_3(%arg0: i32, %arg1: i32, %arg2: i32) -> (i32, i32) {
    %c0_i32 = arith.constant 0 : i32
    %c0_i32_0 = arith.constant 0 : i32
    return %c0_i32, %arg0 : i32, i32
  }
  func.func @transform_4(%arg0: i32, %arg1: i32, %arg2: i32) -> (i32, i32) {
    %c0_i32 = arith.constant 0 : i32
    %c0_i32_0 = arith.constant 0 : i32
    return %c0_i32, %arg0 : i32, i32
  }
  func.func @transform_5(%arg0: i32, %arg1: i32, %arg2: i32) -> (i32, i32, i32, i32) {
    %c0_i32 = arith.constant 0 : i32
    %c0_i32_0 = arith.constant 0 : i32
    return %arg1, %arg2, %c0_i32, %arg0 : i32, i32, i32, i32
  }
}

</mosaic_0001>

<bundles_post_ra>
// kernel: tpu_custom_call.1
= control target key start
LH: loop header
LB: loop body
LE: loop exit
PB: predicated region body
PF: predicated region fallthrough
CT: control target
= control target key end

     0   :  { %s5574_s0 = inlined_call_operand.hbm [shape: f32[2,16,16,256], index: 0, kind: input, shape index: {}]   ;;  %s5575_s1 = inlined_call_operand.hbm [shape: f32[2,2,16,256], index: 1, kind: input, shape index: {}]   ;;  %s5576_s2 = inlined_call_operand.hbm [shape: f32[2,2,16,256], index: 2, kind: input, shape index: {}]   ;;  %s5577_s3 = inlined_call_operand.hbm [shape: f32[9,256], index: 3, kind: input, shape index: {}]   ;;  %s5578_s4 = inlined_call_operand.vmem [shape: f32[1,256], index: 4, kind: input, shape index: {}]   ;;  %s5579_s5 = inlined_call_operand.hbm [shape: f32[2,16,16,256], index: 5, kind: output, shape index: {}]  }
   0x1   :  { %5725 = sst [smem:[#allocation36_spill]] %s5575_s1 }
   0x2   :  { %5726 = sst [smem:[#allocation37_spill]] %s5576_s2 }
   0x3   :  { %5727 = sst [smem:[#allocation38_spill]] %s5577_s3 }
   0x4   :  { %10 = vsyncpa [#allocation4], 0 }
   0x5   :  { %12 = vsyncpa [#allocation4 + $0x1], 0 }
   0x6   :  { %13 = vsyncpa [#allocation7], 0 }
   0x7   :  { %15 = vsyncpa [#allocation7 + $0x1], 0 }
   0x8   :  { %16 = vsyncpa [#allocation10], 0 }
   0x9   :  { %17 = vsyncpa [#allocation5], 0 }
   0xa   :  { %19 = vsyncpa [#allocation5 + $0x1], 0  ;;  %s3386_s18 = smov 0   ;;  %s3388_s19 = smov 0  }
   0xb   :  { %s3390_s20 = smov 0   ;;  %s3392_s21 = smov 0  }
   0xc   :  { %s3394_s22 = smov 0   ;;  %s3396_s23 = smov 0  }
   0xd   :  { %s3398_s24 = smov 0   ;;  %s3400_s25 = smov 0  }
   0xe LB: > { %5728 = sst [smem:[#allocation16_spill]] %s3320_s18  ;;  %s37_s26 = sadd.s32 1, %s3340_s23  ;;  %s3348_s25 = sphi %s3400_s25, %s25_s25   ;;  %s3344_s24 = sphi %s3398_s24, %s5924_s24   ;;  %s3340_s23 = sphi %s3396_s23, %s5919_s23   ;;  %s3336_s22 = sphi %s3394_s22, %s5923_s22   ;;  %s3332_s21 = sphi %s3392_s21, %s5918_s21   ;;  %s3328_s20 = sphi %s3390_s20, %s5917_s20   ;;  %s3324_s19 = sphi %s3388_s19, %s5922_s19   ;;  %s3320_s18 = sphi %s3386_s18, %s5921_s18  }
   0xf   : > { %5729 = sst [smem:[#allocation17_spill]] %s3328_s20  ;;  %p38_p0 = scmp.ge.s32.totalorder %s37_s26, 2 }
  0x10   : > { %5730 = sst [smem:[#allocation18_spill]] %s3340_s23  ;;  %s40_s27 = sadd.s32 1, %s3344_s24 }
  0x11   : > { %5731 = sst [smem:[#allocation19_spill]] %s3348_s25  ;;  %p62_p1 = scmp.ne.s32.totalorder %s3328_s20, %s3324_s19 }
  0x12   : > { %p63_p2 = scmp.eq.s32.totalorder %s3348_s25, 0  ;;  %s5926_s26 = smov (%p38_p0, %s37_s26), 0 }
  0x13   : > { %5732 = sst [smem:[#allocation20_spill]] %s5926_s26  ;;  %s5928_s27 = smov (!%p38_p0, %s40_s27), %s3344_s24 }
  0x14   : > { %s49_s28 = ssub.s32 %s3340_s23, %s5926_s26  ;;  %s55_s29 = sadd.s32 1, %s3328_s20 }
  0x15   : > { %p42_p3 = scmp.ge.s32.totalorder %s5928_s27, 2  ;;  %p64_p4 = por %p63_p2, %p62_p1 }
  0x16   : > { %p3049_p5 = scmp.lt.s32.totalorder %s3348_s25, 4  ;;  %s3446_s6 = sand.u32 1, %s3328_s20  }
  0x17   : > { %s5930_s27 = smov (%p42_p3, %s5928_s27), 0  ;;  %s286_s9 = sand.u32 1, %s3348_s25  }
  0x18   : > { %5733 = sst [smem:[#allocation21_spill]] %s5930_s27  ;;  %s48_s30 = ssub.s32 %s3344_s24, %s5930_s27 }
  0x19   : > { %s50_s7 = sor.u32 %s49_s28, %s48_s30  ;;  %p3448_p6 = pnand %p3049_p5, %p64_p4 }
  0x1a   : > { %p53_p7 = scmp.eq.s32.totalorder %s50_s7, 0  ;;  %s5582_s10 = sshll.u32 %s3446_s6, 5 }
  0x1b   : > { %s2996_s12 = sshll.u32 %s3340_s23, 2  ;;  %s2997_s13 = sshll.u32 %s3344_s24, 3 }
  0x1c   : > { %s3455_s11 = scalar_select %p53_p7, %s3328_s20, %s55_s29  }
  0x1d   : > { %s290_s14 = scalar_lea.vmem [#allocation6], %s5582_s10  ;;  %s297_s16 = sadd.s32 %s2997_s13, %s2996_s12 }
  0x1e   : > { %5735 = sst [smem:[#allocation22_spill]] %s3455_s11  ;;  %s302_s15 = sshll.u32 %s290_s14, 4  ;;  %s303_s15 = int_to_ptr.vmem [resolvable:$true] %s302_s15 }
  0x1f   : > { %s2998_s17 = sshll.u32 %s297_s16, 3  ;;  %s5736_s1 = sld [smem:[#allocation36_spill]] }
  0x20   : > { %s5737_s2 = sld [smem:[#allocation37_spill]]  ;;  %s3467_s14 = scalar_lea.sflag [#allocation7], %s286_s9 }
  0x21   : > { %s5583_s12 = smov 256   ;;  %s5585_s13 = smov 16  }
  0x22   : > { %s3478_s27 = sadd.s32 4294967295, %s3348_s25   ;;  %p68_p8 = scmp.ne.s32.totalorder %s3324_s19, %s3320_s18 }
  0x23   : > { %p69_p9 = scmp.eq.s32.totalorder %s3478_s27, 0  ;;  %p208_p10 = scmp.eq.s32.totalorder %s3478_s27, 3 }
  0x24   : > { %p2986_p13 = scmp.ge.s32.totalorder %s3348_s25, 1  ;;  %p221_p3 = scmp.lt.s32.totalorder %s3348_s25, 5 }
  0x25   : > { %s299_s7 = scalar_lea.hbm %s5736_s1, %s2998_s17  ;;  %p3487_p12 = por %p69_p9, %p68_p8 }
  0x26   : > { %s325_s26 = scalar_lea.hbm %s5737_s2, %s2998_s17  ;;  %s300_s11 = sshll.u32 %s299_s7, 4  ;;  %s301_s11 = int_to_ptr.hbm [resolvable:$true] %s300_s11 }
  0x27   : > { %s326_s10 = sshll.u32 %s325_s26, 4  ;;  %s2985_s26 = sadd.s32 4294967294, %s3348_s25   ;;  %s3475_s10 = int_to_ptr.hbm [resolvable:$true] %s326_s10 }
  0x28   : > { %3040 = dma.hbm_to_vmem [thread:$0]  (!%p3448_p6), %s301_s11, 512, %s303_s15, %s3467_s14, %s5583_s12, %s5583_s12, %s5585_s13  }
  0x29   : > { %p214_p11 = scmp.eq.s32.totalorder %s2985_s26, 3  ;;  %p3495_p0 = por %p208_p10, %p62_p1 }
  0x2a   : > { %s5743_s3 = sld [smem:[#allocation38_spill]]  ;;  %s5744_s30 = sshll.u32 %s3446_s6, 5 }
  0x2b   : > { %s5739_s11 = scalar_select %p3495_p0, 1, 0 }
  0x2c   : > { %p3499_p2 = por %p214_p11, %p68_p8  ;;  %s316_s7 = scalar_lea.vmem [#allocation8], %s5744_s30 }
  0x2d   : > { %5740 = sst [smem:[#allocation23_spill]] %s5739_s11  ;;  %s328_s29 = sshll.u32 %s316_s7, 4  ;;  %s329_s29 = int_to_ptr.vmem [resolvable:$true] %s328_s29 }
  0x2e   : > { %s5741_s15 = scalar_select %p3499_p2, 1, 0 }
  0x2f   : > { %p3509_p4 = pnand %p2986_p13, %p221_p3  ;;  %s3352_s12 = smov [#allocation9]  }
  0x30   : > { %5742 = sst [smem:[#allocation24_spill]] %s5741_s15  ;;  %s235_s28 = sshll.u32 %s5743_s3, 4  ;;  %s236_s28 = int_to_ptr.hbm [resolvable:$true] %s235_s28 }
  0x31   : > { %s237_s13 = sshll.u32 %s3352_s12, 4  ;;  %p3030_p1 = pneg %p3509_p4  ;;  %s238_s13 = int_to_ptr.vmem [resolvable:$true] %s237_s13 }
  0x32   : > { %s2990_s1 = sshll.u32 %s3446_s6, 8  ;;  %s3016_s16 = sshll.u32 %s3340_s23, 5 }
  0x33   : > { %p3031_p5 = pnand %p3030_p1, %p69_p9  ;;  %s2993_s17 = sshll.u32 %s3344_s24, 6 }
  0x34   : > { %s263_s30 = scalar_lea.vmem [#allocation3], %s2990_s1  ;;  %s271_s2 = sadd.s32 %s3016_s16, %s2993_s17 }
  0x35   : > { %s276_s7 = sshll.u32 %s263_s30, 4  ;;  %s5746_s3 = smov 16   ;;  %s277_s7 = int_to_ptr.vmem [resolvable:$true] %s276_s7 }
  0x36   : > { %s5747_s20 = smov 256   ;;  %s2994_s12 = sshll.u32 %s271_s2, 3 }
  0x37   : > { %3033 = dma.hbm_to_vmem [thread:$0]  (!%p3031_p5), %s236_s28, 512, %s238_s13, [#allocation10], %s5747_s20, %s5747_s20, %s5746_s3  }
  0x38   : > { %s273_s25 = scalar_lea.hbm %s5574_s0, %s2994_s12  ;;  %s260_s23 = scalar_lea.sflag [#allocation4], %s3446_s6 }
  0x39   : > { %s274_s11 = sshll.u32 %s273_s25, 4  ;;  %340 = sbr.rel (%p3509_p4) target bundleno = 457 (0x1c9), region = 40  ;;  %s275_s11 = int_to_ptr.hbm [resolvable:$true] %s274_s11 }
  0x3a   : > { %3037 = dma.hbm_to_vmem [thread:$0]  (!%p3448_p6), %s275_s11, 4096, %s277_s7, %s260_s23, %s5747_s20, %s5747_s20, %s5746_s3  }
  0x3b   : > { %3043 = dma.hbm_to_vmem [thread:$0]  (!%p3448_p6), %s3475_s10, 512, %s329_s29, %s3467_s14, %s5747_s20, %s5747_s20, %s5746_s3  }
  0x3e   : > { %s3542_s1 = sand.u32 1, %s3324_s19  }
  0x3f   : > { %s3004_s2 = sshll.u32 %s3542_s1, 8  ;;  %s343_s18 = scalar_lea.sflag [#allocation4], %s3542_s1 }
  0x40   : > { %s3548_s25 = scalar_lea.vmem [#allocation3], %s3004_s2 }
  0x41   : > { %3303 = dma.done.wait (%p3487_p12), %s343_s18, 4096  }
  0x42   : > { %3305 = vsyncadd (%p3487_p12), %s343_s18, 4294963200  ;;  %s352_s3 = sand.u32 1, %s3478_s27   ;;  %s3005_s20 = sshll.u32 %s3542_s1, 5 }
  0x43   : > { %s353_s23 = scalar_lea.sflag [#allocation7], %s352_s3  ;;  %s3556_s6 = scalar_lea.vmem [#allocation6], %s3005_s20 }
  0x44   : > { %3307 = dma.done.wait (%p3487_p12), %s353_s23, 1024  }
  0x45   : > { %3309 = vsyncadd (%p3487_p12), %s353_s23, 4294966272  ;;  %s3562_s8 = scalar_lea.vmem [#allocation8], %s3005_s20 }
  0x46   : > { %3311 = dma.done.wait (%p69_p9), [#allocation10], 512  }
  0x47   : > { %3313 = vsyncadd (%p69_p9), [#allocation10], 4294966784  ;;  %v425_v0 = vlaneseq  ;;  %v3353_v2 = vmov 0.0   ;;  %v488_v3 = vld [vmem:[%s3556_s6] sm:$0xff]  ;;  %v489_v4 = vld [vmem:[%s3556_s6 + $0x8] sm:$0xff]  ;;  %vm496_vm1 = vcmask 1040384  }
  0x48   : > { %v497_v5 = vrot.slane %v488_v3, 7  ;;  %v490_v6 = vld [vmem:[%s3556_s6 + $0x10] sm:$0xff]  ;;  %v498_v7 = vrot.slane %v489_v4, 7  ;;  %v491_v8 = vld [vmem:[%s3556_s6 + $0x18] sm:$0xff]  ;;  %v542_v10 = vld [vmem:[%s3548_s25] sm:$0xff]  ;;  %vm1011_vm2 = vcmask 1046528  }
  0x49   : > { %vm3568_vm0 = vcmp.lt.s32.totalorder %v425_v0, 256  ;;  %v499_v9 = vrot.slane %v490_v6, 7  ;;  %v543_v11 = vld [vmem:[%s3548_s25 + $0x8] sm:$0xff]  ;;  %v501_v13 = vrot.slane %v491_v8, 7  ;;  %v606_v14 = vrot.slane %v542_v10, 7  ;;  %v544_v15 = vld [vmem:[%s3548_s25 + $0x10] sm:$0xff] }
  0x4a   : > { %429 = vst.msk [vmem:[#allocation2] ss:$8 sm:$0x3] %vm3568_vm0, %v3353_v2  ;;  %v607_v17 = vrot.slane %v543_v11, 7  ;;  %v545_v18 = vld [vmem:[%s3548_s25 + $0x18] sm:$0xff]  ;;  %v546_v19 = vld [vmem:[%s3548_s25 + $0x20] sm:$0xff] }
  0x4b   : > { %432 = vst.msk [vmem:[#allocation2 + $0x30] ss:$8 sm:$0x3] %vm3568_vm0, %v3353_v2  ;;  %v3619_v12 = vsel %vm496_vm1, %v497_v5, %v499_v9  ;;  %v3623_v16 = vsel %vm496_vm1, %v498_v7, %v501_v13  ;;  %v548_v20 = vld [vmem:[%s3548_s25 + $0x30] sm:$0xff]  ;;  %v608_v21 = vrot.slane %v544_v15, 7  ;;  %v547_v22 = vld [vmem:[%s3548_s25 + $0x28] sm:$0xff] }
  0x4c   : > { %435 = vst.msk [vmem:[#allocation2 + $0x60] ss:$8 sm:$0x3] %vm3568_vm0, %v3353_v2  ;;  %v549_v23 = vld [vmem:[%s3548_s25 + $0x38] sm:$0xff]  ;;  %v610_v25 = vrot.slane %v545_v18, 7  ;;  %v612_v26 = vrot.slane %v546_v19, 7 }
  0x4d   : > { %438 = vst.msk [vmem:[#allocation2 + $0x90] ss:$8 sm:$0x3] %vm3568_vm0, %v3353_v2  ;;  %v3631_v24 = vsel %vm496_vm1, %v606_v14, %v608_v21  ;;  %v614_v27 = vrot.slane %v548_v20, 7  ;;  %v550_v28 = vld [vmem:[%s3548_s25 + $0x40] sm:$0xff]  ;;  %v613_v30 = vrot.slane %v547_v22, 7 }
  0x4e   : > { %441 = vst.msk [vmem:[#allocation2 + $0xc0] ss:$8 sm:$0x3] %vm3568_vm0, %v3353_v2  ;;  %v3635_v29 = vsel %vm496_vm1, %v607_v17, %v610_v25  ;;  %v616_v31 = vrot.slane %v549_v23, 7  ;;  %v551_v32 = vld [vmem:[%s3548_s25 + $0x48] sm:$0xff]  ;;  %v552_v33 = vld [vmem:[%s3548_s25 + $0x50] sm:$0xff] }
  0x4f   : > { %444 = vst.msk [vmem:[#allocation2 + $0xf0] ss:$8 sm:$0x3] %vm3568_vm0, %v3353_v2  ;;  %v3640_v34 = vld [vmem:[%s3548_s25 + $0x58] sm:$0xff]  ;;  %v3643_v35 = vsel %vm496_vm1, %v612_v26, %v614_v27  ;;  %v618_v36 = vrot.slane %v550_v28, 7  ;;  %v3646_v37 = vld [vmem:[%s3548_s25 + $0x60] sm:$0xff] }
  0x50   : > { %447 = vst.msk [vmem:[#allocation2 + $0x120] ss:$8 sm:$0x3] %vm3568_vm0, %v3353_v2  ;;  %v3649_v38 = vld [vmem:[%s3548_s25 + $0x68] sm:$0xff]  ;;  %v3652_v39 = vld [vmem:[%s3548_s25 + $0x70] sm:$0xff]  ;;  %v619_v40 = vrot.slane %v551_v32, 7  ;;  %v3664_v44 = vsel %vm496_vm1, %v613_v30, %v616_v31 }
  0x51   : > { %450 = vst.msk [vmem:[#allocation2 + $0x150] ss:$8 sm:$0x3] %vm3568_vm0, %v3353_v2  ;;  %v3655_v41 = vld [vmem:[%s3548_s25 + $0x78] sm:$0xff]  ;;  %v3658_v42 = vld [vmem:[%s3548_s25 + $0x80] sm:$0xff]  ;;  %v3661_v43 = vld [vmem:[%s3548_s25 + $0x88] sm:$0xff] }
  0x52   : > { %453 = vst.msk [vmem:[#allocation2 + $0x180] ss:$8 sm:$0x3] %vm3568_vm0, %v3353_v2  ;;  %v620_v45 = vrot.slane %v552_v33, 7  ;;  %v3667_v46 = vld [vmem:[%s3548_s25 + $0x90] sm:$0xff]  ;;  %v3670_v47 = vld [vmem:[%s3548_s25 + $0x98] sm:$0xff] }
  0x53   : > { %456 = vst.msk [vmem:[#allocation2 + $0x1b0] ss:$8 sm:$0x3] %vm3568_vm0, %v3353_v2  ;;  %v3673_v48 = vld [vmem:[%s3548_s25 + $0xa0] sm:$0xff]  ;;  %v622_v49 = vrot.slane %v3640_v34, 7  ;;  %v624_v50 = vrot.slane %v3646_v37, 7 }
  0x54   : > { %459 = vst.msk [vmem:[#allocation2 + $0x21] ss:$8 sm:$0x3] %vm3568_vm0, %v3353_v2  ;;  %v625_v51 = vrot.slane %v3649_v38, 7  ;;  %v626_v52 = vrot.slane %v3652_v39, 7  ;;  %v3681_v53 = vld [vmem:[%s3548_s25 + $0xa8] sm:$0xff]  ;;  %v3700_v63 = vsel %vm496_vm1, %v618_v36, %v620_v45 }
  0x55   : > { %462 = vst.msk [vmem:[#allocation2 + $0x51] ss:$8 sm:$0x3] %vm3568_vm0, %v3353_v2  ;;  %v628_v54 = vrot.slane %v3655_v41, 7  ;;  %v630_v55 = vrot.slane %v3658_v42, 7  ;;  %v631_v56 = vrot.slane %v3661_v43, 7  ;;  %v3723_v8 = vsel %vm496_vm1, %v619_v40, %v622_v49 }
  0x56   : > { %465 = vst.msk [vmem:[#allocation2 + $0x81] ss:$8 sm:$0x3] %vm3568_vm0, %v3353_v2  ;;  %v3687_v57 = vld [vmem:[%s3548_s25 + $0xb0] sm:$0xff]  ;;  %v5596_v58 = vrot.slane %v3667_v46, 7  ;;  %v5595_v59 = vrot.slane %v3670_v47, 7 }
  0x57   : > { %468 = vst.msk [vmem:[#allocation2 + $0xb1] ss:$8 sm:$0x3] %vm3568_vm0, %v3353_v2  ;;  %v5610_v60 = vrot.slane %v3673_v48, 7  ;;  %v3694_v61 = vld [vmem:[%s3548_s25 + $0xb8] sm:$0xff]  ;;  %v3697_v62 = vld [vmem:[%s3548_s25 + $0xc0] sm:$0xff] }
  0x58   : > { %471 = vst.msk [vmem:[#allocation2 + $0xe1] ss:$8 sm:$0x3] %vm3568_vm0, %v3353_v2  ;;  %v5607_v0 = vrot.slane %v3681_v53, 7  ;;  %v3704_v1 = vld [vmem:[%s3548_s25 + $0xc8] sm:$0xff]  ;;  %v3710_v3 = vld [vmem:[%s3548_s25 + $0xd8] sm:$0xff]  ;;  %v635_v37 = vsel %vm496_vm1, %v631_v56, %v5595_v59 }
  0x59   : > { %474 = vst.msk [vmem:[#allocation2 + $0x111] ss:$8 sm:$0x3] %vm3568_vm0, %v3353_v2  ;;  %v5597_v4 = vrot.slane %v3687_v57, 7  ;;  %v3717_v6 = vld [vmem:[%s3548_s25 + $0xe8] sm:$0xff]  ;;  %v5598_v11 = vrot.slane %v3694_v61, 7 }
  0x5a   : > { %477 = vst.msk [vmem:[#allocation2 + $0x141] ss:$8 sm:$0x3] %vm3568_vm0, %v3353_v2  ;;  %v753_v10 = vld [vmem:[#allocation9 + $0x1] ss:$8 sm:$0x3] }
  0x5b   : > { %480 = vst.msk [vmem:[#allocation2 + $0x171] ss:$8 sm:$0x3] %vm3568_vm0, %v3353_v2  ;;  %v5606_v19 = vrot.slane %v3717_v6, 7  ;;  %v3736_v20 = vperm.slane %v753_v10, 0  ;;  %v3753_v28 = vld [vmem:[%s3562_s8 + $0x10] sm:$0xff]  ;;  %v3800_v59 = vsel %vm496_vm1, %v5610_v60, %v5597_v4 }
  0x5c   : > { %483 = vst.msk [vmem:[#allocation2 + $0x1a1] ss:$8 sm:$0x3] %vm3568_vm0, %v3353_v2  ;;  %v3741_v23 = vld [vmem:[#allocation9] ss:$8 sm:$0x3] }
  0x5d   : > { %486 = vst.msk [vmem:[#allocation2 + $0x1d1] ss:$8 sm:$0x3] %vm3568_vm0, %v3353_v2  ;;  %v3707_v2 = vld [vmem:[%s3548_s25 + $0xd0] sm:$0xff]  ;;  %v3761_v32 = vld [vmem:[%s3562_s8 + $0x18] sm:$0xff]  ;;  %vm1289_vm3 = vcmask 1045504  }
  0x5e   : > { %509 = vst [vmem:[#allocation2] sm:$0xfe] %v497_v5  ;;  %v3714_v5 = vld [vmem:[%s3548_s25 + $0xe0] sm:$0xff]  ;;  %v5599_v15 = vrot.slane %v3707_v2, 7  ;;  %s4113_s13 = scalar_lea.vmem [#allocation11], %s3004_s2  ;;  %s3017_s27 = sshll.u32 %s3332_s21, 5 }
  0x5f   : > { %510 = vst [vmem:[#allocation2 + $0x8] sm:$0xfe] %v498_v7  ;;  %v3720_v7 = vld [vmem:[%s3548_s25 + $0xf0] sm:$0xff]  ;;  %v5604_v18 = vrot.slane %v3714_v5, 7  ;;  %v3766_v33 = vld [vmem:[%s5578_s4] sm:$0x3] }
  0x60   : > { %513 = vst [vmem:[#allocation2 + $0x20] sm:$0x1] %v499_v9  ;;  %v3726_v9 = vld [vmem:[%s3548_s25 + $0xf8] sm:$0xff]  ;;  %v3778_v38 = vld [vmem:[#allocation9 + $0x2] ss:$8 sm:$0x3] }
  0x61   : > { %514 = vst [vmem:[#allocation2 + $0x28] sm:$0x1] %v501_v13  ;;  %v5600_v13 = vrot.slane %v3697_v62, 7  ;;  %v5605_v22 = vrot.slane %v3726_v9, 7  ;;  %s3012_s9 = sshll.u32 %s3336_s22, 6  ;;  %s2805_s26 = sshll.u32 %s4113_s13, 4  ;;  %s2806_s26 = int_to_ptr.vmem [resolvable:$true] %s2805_s26 }
  0x62   : > { %703 = vst [vmem:[#allocation2 + $0x30] sm:$0xfe] %v606_v14  ;;  %v5602_v14 = vrot.slane %v3704_v1, 7  ;;  %v3812_v39 = vld [vmem:[#allocation9 + $0x4] ss:$8 sm:$0x3]  ;;  %s2802_s21 = sadd.s32 %s3017_s27, %s3012_s9 }
  0x63   : > { %704 = vst [vmem:[#allocation2 + $0x38] sm:$0xfe] %v607_v17  ;;  %v5601_v17 = vrot.slane %v3710_v3, 7  ;;  %v3820_v4 = vsel %vm496_vm1, %v5600_v13, %v5599_v15  ;;  %v3843_v15 = vld [vmem:[#allocation9 + $0x5] ss:$8 sm:$0x3] }
  0x64   : > { %707 = vst [vmem:[#allocation2 + $0x50] sm:$0x1] %v608_v21  ;;  %v5603_v21 = vrot.slane %v3720_v7, 7  ;;  %s3013_s22 = sshll.u32 %s2802_s21, 3  ;;  %s2788_s17 = scalar_lea.sflag [#allocation5], %s3542_s1 }
  0x65   : > { %708 = vst [vmem:[#allocation2 + $0x58] sm:$0x1] %v610_v25  ;;  %v627_v25 = vsel %vm496_vm1, %v624_v50, %v626_v52  ;;  %v772_v34 = vld [vmem:[#allocation2] sm:$0xff]  ;;  %s2804_s28 = scalar_lea.hbm %s5579_s5, %s3013_s22  ;;  %s3262_s18 = scalar_lea.hbm %s5579_s5, 1024 }
  0x66   : > { %709 = vst [vmem:[#allocation2 + $0x60] sm:$0xfe] %v612_v26  ;;  %v3747_v26 = vld [vmem:[%s3562_s8] sm:$0xff]  ;;  %s2807_s16 = sshll.u32 %s2804_s28, 4  ;;  %s2808_s16 = int_to_ptr.hbm [resolvable:$true] %s2807_s16 }
  0x67   : > { %710 = vst [vmem:[#allocation2 + $0x68] sm:$0xfe] %v613_v30  ;;  %v3755_v30 = vperm.slane %v753_v10, 1  ;;  %v3791_v10 = vperm.slane %v3766_v33, 0  ;;  %v878_v13 = vld [vmem:[#allocation2] sm:$0xfe] }
  0x68   : > { %711 = vst [vmem:[#allocation2 + $0x70] sm:$0xff] %v3643_v35  ;;  %s3256_s30 = sshra.s32 %s2808_s16, 4  ;;  %s3257_s30 = int_to_ptr.hbm [resolvable:$true] %s3256_s30 }
  0x69   : > { %713 = vst [vmem:[#allocation2 + $0x80] sm:$0x1] %v614_v27  ;;  %v3750_v27 = vld [vmem:[%s3562_s8 + $0x8] sm:$0xff]  ;;  %s3258_s7 = scalar_lea.hbm %s3257_s30, 256  ;;  %p3263_p9 = scmp.lt.s32.totalorder %s3257_s30, %s5579_s5 }
  0x6a   : > { %712 = vst [vmem:[#allocation2 + $0x78] sm:$0xff] %v3664_v44  ;;  %p3259_p6 = scmp.ne.s32.totalorder %s3257_s30, %s3258_s7  ;;  %p3264_p10 = scmp.lt.s32.totalorder %s3262_s18, %s3258_s7 }
  0x6b   : > { %714 = vst [vmem:[#allocation2 + $0x88] sm:$0x1] %v616_v31  ;;  %v629_v31 = vsel %vm496_vm1, %v625_v51, %v628_v54 }
  0x6c   : > { %5750 = vst [vmem:[#allocation25_spill] sm:$0xff] %v3700_v63  ;;  %p3260_p7 = pnand %p3259_p6, %p3495_p0  ;;  %p3265_p11 = por %p3264_p10, %p3263_p9 }
  0x6d   : > { %715 = vst [vmem:[#allocation2 + $0x90] sm:$0xfe] %v618_v36  ;;  %v633_v36 = vsel %vm496_vm1, %v630_v55, %v5596_v58  ;;  %v5613_v58 = vrot.slane %v3761_v32, 7 }
  0x6e   : > { %716 = vst [vmem:[#allocation2 + $0x98] sm:$0xfe] %v619_v40  ;;  %v3781_v40 = vperm.slane %v3741_v23, 0  ;;  %p3261_p8 = pneg %p3260_p7 }
  0x6f   : > { %5751 = vst [vmem:[#allocation26_spill] sm:$0xff] %v3723_v8 }
  0x70   : > { %717 = vst [vmem:[#allocation2 + $0xa0] sm:$0xff] %v3700_v63  ;;  %p3266_p12 = pnand %p3265_p11, %p3261_p8 }
  0x71   : > { %719 = vst [vmem:[#allocation2 + $0xb0] sm:$0x1] %v620_v45  ;;  %v3785_v45 = vmul.f32 %v3736_v20, %v3619_v12 }
  0x72   : > { %718 = vst [vmem:[#allocation2 + $0xa8] sm:$0xff] %v3723_v8 }
  0x73   : > { %720 = vst [vmem:[#allocation2 + $0xb8] sm:$0x1] %v622_v49  ;;  %v5609_v49 = vrot.slane %v3747_v26, 7 }
  0x74   : > { %5752 = vst [vmem:[#allocation27_spill] sm:$0xff] %v3753_v28 }
  0x75   : > { %721 = vst [vmem:[#allocation2 + $0xc0] sm:$0xfe] %v624_v50  ;;  %v3810_v50 = vld [vmem:[#allocation9 + $0x3] ss:$8 sm:$0x3] }
  0x76   : > { %5753 = vst [vmem:[#allocation28_spill] sm:$0xff] %v3761_v32  ;;  %v3887_v43 = vperm.slane %v3810_v50, 0 }
  0x77   : > { %722 = vst [vmem:[#allocation2 + $0xc8] sm:$0xfe] %v625_v51  ;;  %v5608_v51 = vrot.slane %v3753_v28, 7 }
  0x78   : > { %5754 = vst [vmem:[#allocation29_spill] sm:$0xff] %v3781_v40 }
  0x79   : > { %723 = vst [vmem:[#allocation2 + $0xd0] sm:$0xff] %v627_v25  ;;  %v3807_v25 = vsel %vm496_vm1, %v5607_v0, %v5598_v11  ;;  %v3827_v11 = vsel %vm496_vm1, %v5602_v14, %v5601_v17  ;;  %v915_v17 = vmul.f32 %v3736_v20, %v878_v13  ;;  %v5620_v14 = vrot.slane %v3785_v45, 1  ;;  %v3865_v13 = vld [vmem:[#allocation9 + $0x7] ss:$8 sm:$0x3] }
  0x7a   : > { %5755 = vst [vmem:[#allocation30_spill] sm:$0xff] %v3791_v10  ;;  %v3861_v41 = vsel %vm496_vm1, %v5609_v49, %v5608_v51  ;;  %v3870_v0 = vmul.f32 %v3755_v30, %v3623_v16  ;;  %v1539_v49 = vld [vmem:[#allocation2 + $0x30] sm:$0xfe] }
  0x7b   : > { %725 = vst [vmem:[#allocation2 + $0xe0] sm:$0x1] %v626_v52  ;;  %v809_v52 = vmul.f32 %v3781_v40, %v772_v34  ;;  %v3841_v34 = vsel %vm496_vm1, %v5606_v19, %v5605_v22  ;;  %v1156_v19 = vld [vmem:[#allocation2] sm:$0xfc]  ;;  %v1012_v42 = vrot.slane %v915_v17, 1 }
  0x7c   : > { %724 = vst [vmem:[#allocation2 + $0xd8] sm:$0xff] %v629_v31  ;;  %v3834_v31 = vsel %vm496_vm1, %v5604_v18, %v5603_v21  ;;  %v3850_v21 = vperm.slane %v3778_v38, 0  ;;  %v811_v18 = vmul.f32 %v3781_v40, %v3619_v12  ;;  %v1816_v17 = vld [vmem:[#allocation2 + $0x30] sm:$0xfc] }
  0x7d   : > { %726 = vst [vmem:[#allocation2 + $0xe8] sm:$0x1] %v628_v54  ;;  %v3863_v54 = vld [vmem:[#allocation9 + $0x6] ss:$8 sm:$0x3]  ;;  %v846_v22 = vadd.f32 %v3791_v10, %v809_v52  ;;  %v5757_v52 = vrot.slane %v3750_v27, 7 }
  0x7e   : > { %727 = vst [vmem:[#allocation2 + $0xf0] sm:$0xfe] %v630_v55  ;;  %v1193_v55 = vmul.f32 %v3850_v21, %v1156_v19  ;;  %v3877_v51 = vmul.f32 %v3850_v21, %v3619_v12  ;;  %v3893_v12 = vperm.slane %v3843_v15, 0  ;;  %v5760_v19 = vrot.slane %v3667_v46, 7 }
  0x7f   : > { %5756 = vst [vmem:[#allocation31_spill] sm:$0xff] %v3861_v41  ;;  %v3884_v60 = vsel %vm496_vm1, %v5757_v52, %v5613_v58  ;;  %v3901_v58 = vld [vmem:[#allocation2 + $0x30] sm:$0xff]  ;;  %v3904_v63 = vadd.f32 %v3791_v10, %v811_v18  ;;  %v5764_v10 = vrot.slane %v3681_v53, 7  ;;  %v3951_v53 = vperm.slane %v3741_v23, 1 }
  0x80   : > { %728 = vst [vmem:[#allocation2 + $0xf8] sm:$0xfe] %v631_v56  ;;  %v3890_v56 = vperm.slane %v3812_v39, 0  ;;  %v1290_v8 = vrot.slane %v1193_v55, 2  ;;  %v5619_v52 = vrot.slane %v3877_v51, 2 }
  0x81   : > { %729 = vst [vmem:[#allocation2 + $0x100] sm:$0xff] %v633_v36  ;;  %v1014_v36 = vsel %vm1011_vm2, %v1012_v42, %v5620_v14  ;;  %v3906_v40 = vld [vmem:[#allocation9 + $0x10] ss:$8 sm:$0x3]  ;;  %v1853_v42 = vmul.f32 %v3893_v12, %v1816_v17  ;;  %v2198_v55 = vld [vmem:[#allocation2 + $0x60] sm:$0xfe] }
  0x82   : > { %5758 = vst [vmem:[#allocation32_spill] sm:$0xff] %v3884_v60  ;;  %v1124_v32 = vadd.f32 %v1014_v36, %v846_v22  ;;  %v1576_v60 = vmul.f32 %v3890_v56, %v1539_v49  ;;  %v3911_v46 = vmul.f32 %v3890_v56, %v3631_v24  ;;  %v1292_v18 = vsel %vm1289_vm3, %v1290_v8, %v5619_v52  ;;  %v3923_v22 = vld [vmem:[#allocation2 + $0x60] sm:$0xff] }
  0x83   : > { %5759 = vst [vmem:[#allocation33_spill] sm:$0xff] %v3893_v12  ;;  %v3926_v49 = vperm.slane %v3863_v54, 0  ;;  %v3929_v36 = vperm.slane %v3865_v13, 0  ;;  %v5763_v17 = vrot.slane %v3673_v48, 7  ;;  %v2475_v14 = vld [vmem:[#allocation2 + $0x60] sm:$0xfc] }
  0x84   : > { %731 = vst [vmem:[#allocation2 + $0x110] sm:$0x1] %v5760_v19  ;;  %v5761_v19 = vrot.slane %v3670_v47, 7  ;;  %v1402_v47 = vadd.f32 %v1292_v18, %v1124_v32  ;;  %v1672_v8 = vrot.slane %v1576_v60, 1  ;;  %v5628_v52 = vrot.slane %v3911_v46, 1  ;;  %v773_v32 = vld [vmem:[#allocation2 + $0x8] sm:$0xff] }
  0x85   : > { %730 = vst [vmem:[#allocation2 + $0x108] sm:$0xff] %v635_v37  ;;  %v3921_v37 = vmul.f32 %v3893_v12, %v3631_v24  ;;  %v1949_v28 = vrot.slane %v1853_v42, 2  ;;  %v2235_v41 = vmul.f32 %v3929_v36, %v2198_v55  ;;  %v3942_v48 = vmul.f32 %v3929_v36, %v3643_v35 }
  0x86   : > { %732 = vst [vmem:[#allocation2 + $0x118] sm:$0x1] %v5761_v19  ;;  %v1475_v19 = vmul.f32 %v3887_v43, %v3901_v58  ;;  %v2134_v60 = vmul.f32 %v3926_v49, %v3923_v22  ;;  %v5765_v42 = vrot.slane %v3687_v57, 7  ;;  %v1674_v55 = vsel %vm1011_vm2, %v1672_v8, %v5628_v52 }
  0x87   : > { %5762 = vst [vmem:[#allocation34_spill] sm:$0xff] %v3923_v22  ;;  %v2331_v12 = vrot.slane %v2235_v41, 1  ;;  %v810_v57 = vmul.f32 %v3951_v53, %v773_v32  ;;  %v5766_v8 = vrot.slane %v3694_v61, 7  ;;  %v5767_v41 = vrot.slane %v3921_v37, 2 }
  0x88   : > { %733 = vst [vmem:[#allocation2 + $0x120] sm:$0xfe] %v5763_v17  ;;  %v1507_v18 = vadd.f32 %v1475_v19, %v1402_v47  ;;  %v3948_v17 = vperm.slane %v3906_v40, 0  ;;  %v3960_v47 = vperm.slane %v3766_v33, 1 }
  0x89   : > { %734 = vst [vmem:[#allocation2 + $0x128] sm:$0xfe] %v5764_v10  ;;  %v879_v10 = vld [vmem:[#allocation2 + $0x8] sm:$0xfe]  ;;  %v1951_v33 = vsel %vm1289_vm3, %v1949_v28, %v5767_v41  ;;  %v5770_v28 = vrot.slane %v3942_v48, 1 }
  0x8a   : > { %735 = vst [vmem:[#allocation2 + $0x130] sm:$0xff] %v3800_v59  ;;  %v1784_v19 = vadd.f32 %v1674_v55, %v1507_v18  ;;  %v2512_v23 = vmul.f32 %v3948_v17, %v2475_v14  ;;  %v3966_v22 = vmul.f32 %v3948_v17, %v3643_v35  ;;  %v916_v52 = vmul.f32 %v3755_v30, %v879_v10 }
  0x8b   : > { %737 = vst [vmem:[#allocation2 + $0x140] sm:$0x1] %v5765_v42  ;;  %v1157_v42 = vld [vmem:[#allocation2 + $0x8] sm:$0xfc]  ;;  %v3977_v14 = vperm.slane %v3778_v38, 1  ;;  %v5768_v18 = vrot.slane %v3697_v62, 7  ;;  %v847_v61 = vadd.f32 %v3960_v47, %v810_v57  ;;  %v2333_v10 = vsel %vm1011_vm2, %v2331_v12, %v5770_v28 }
  0x8c   : > { %736 = vst [vmem:[#allocation2 + $0x138] sm:$0xff] %v3807_v25  ;;  %v5630_v25 = vrot.slane %v3870_v0, 1  ;;  %v2061_v55 = vadd.f32 %v1951_v33, %v1784_v19  ;;  %v2608_v32 = vrot.slane %v2512_v23, 2  ;;  %v5631_v59 = vrot.slane %v3966_v22, 2  ;;  %v1540_v19 = vld [vmem:[#allocation2 + $0x38] sm:$0xfe] }
  0x8d   : > { %738 = vst [vmem:[#allocation2 + $0x148] sm:$0x1] %v5766_v8  ;;  %v5769_v8 = vrot.slane %v3704_v1, 7  ;;  %v1015_v41 = vrot.slane %v916_v52, 1  ;;  %v1194_v38 = vmul.f32 %v3977_v14, %v1157_v42  ;;  %v3991_v62 = vmul.f32 %v3977_v14, %v3623_v16  ;;  %v1817_v33 = vld [vmem:[#allocation2 + $0x38] sm:$0xfc] }
  0x8e   : > { %739 = vst [vmem:[#allocation2 + $0x150] sm:$0xfe] %v5768_v18  ;;  %v2166_v23 = vadd.f32 %v2134_v60, %v2061_v55  ;;  %v3995_v57 = vperm.slane %v3810_v50, 1  ;;  %v3998_v1 = vperm.slane %v3812_v39, 1  ;;  %v4001_v12 = vperm.slane %v3843_v15, 1  ;;  %v4012_v39 = vld [vmem:[#allocation2 + $0x38] sm:$0xff] }
  0x8f   : > { %740 = vst [vmem:[#allocation2 + $0x158] sm:$0xfe] %v5769_v8  ;;  %v5771_v52 = vrot.slane %v3707_v2, 7  ;;  %v2610_v42 = vsel %vm1289_vm3, %v2608_v32, %v5631_v59  ;;  %v1293_v50 = vrot.slane %v1194_v38, 2  ;;  %v5629_v60 = vrot.slane %v3991_v62, 2 }
  0x90   : > { %741 = vst [vmem:[#allocation2 + $0x160] sm:$0xff] %v3820_v4  ;;  %v1017_v4 = vsel %vm1011_vm2, %v1015_v41, %v5630_v25  ;;  %v2443_v15 = vadd.f32 %v2333_v10, %v2166_v23  ;;  %v1577_v2 = vmul.f32 %v3998_v1, %v1540_v19  ;;  %v4018_v55 = vmul.f32 %v3998_v1, %v3635_v29  ;;  %v2199_v32 = vld [vmem:[#allocation2 + $0x68] sm:$0xfe]  ;;  %v880_v19 = vld [vmem:[#allocation2 + $0x20] sm:$0x1] }
  0x91   : > { %743 = vst [vmem:[#allocation2 + $0x170] sm:$0x1] %v5771_v52  ;;  %v1125_v18 = vadd.f32 %v1017_v4, %v847_v61  ;;  %v5772_v8 = vrot.slane %v3710_v3, 7  ;;  %v1295_v28 = vsel %vm1289_vm3, %v1293_v50, %v5629_v60  ;;  %v1854_v41 = vmul.f32 %v4001_v12, %v1817_v33  ;;  %v4030_v61 = vld [vmem:[#allocation2 + $0x68] sm:$0xff]  ;;  %v1158_v50 = vld [vmem:[#allocation2 + $0x20] sm:$0x3] }
  0x92   : > { %742 = vst [vmem:[#allocation2 + $0x168] sm:$0xff] %v3827_v11  ;;  %v4028_v11 = vmul.f32 %v4001_v12, %v3635_v29  ;;  %v4033_v10 = vperm.slane %v3863_v54, 1  ;;  %v2476_v38 = vld [vmem:[#allocation2 + $0x68] sm:$0xfc]  ;;  %v5774_v3 = vrot.slane %v3714_v5, 7  ;;  %v1476_v52 = vmul.f32 %v3995_v57, %v4012_v39 }
  0x93   : > { %744 = vst [vmem:[#allocation2 + $0x178] sm:$0x1] %v5772_v8  ;;  %v1403_v23 = vadd.f32 %v1295_v28, %v1125_v18  ;;  %v1675_v4 = vrot.slane %v1577_v2, 1  ;;  %v5632_v33 = vrot.slane %v4018_v55, 1  ;;  %v5775_v8 = vrot.slane %v3717_v6, 7 }
  0x94   : > { %5773 = vst [vmem:[#allocation35_spill] sm:$0xff] %v4030_v61  ;;  %v2720_v60 = vadd.f32 %v2610_v42, %v2443_v15  ;;  %v1952_v25 = vrot.slane %v1854_v41, 2  ;;  %v1953_v54 = vrot.slane %v4028_v11, 2  ;;  %v4044_v59 = vperm.slane %v3865_v13, 1  ;;  %v1541_v41 = vld [vmem:[#allocation2 + $0x50] sm:$0x1] }
  0x95   : > { %745 = vst [vmem:[#allocation2 + $0x180] sm:$0xfe] %v5774_v3  ;;  %v1508_v5 = vadd.f32 %v1476_v52, %v1403_v23  ;;  %v2135_v18 = vmul.f32 %v4033_v10, %v4030_v61  ;;  %v4050_v2 = vperm.slane %v3906_v40, 1  ;;  %v919_v28 = vmul.f32 %v3736_v20, %v880_v19  ;;  %v1818_v23 = vld [vmem:[#allocation2 + $0x50] sm:$0x3] }
  0x96   : > { %746 = vst [vmem:[#allocation2 + $0x188] sm:$0xfe] %v5775_v8  ;;  %v5776_v6 = vrot.slane %v3720_v7, 7  ;;  %v1677_v42 = vsel %vm1011_vm2, %v1675_v4, %v5632_v33  ;;  %v2236_v13 = vmul.f32 %v4044_v59, %v2199_v32  ;;  %v1197_v15 = vmul.f32 %v3850_v21, %v1158_v50  ;;  %v2200_v52 = vld [vmem:[#allocation2 + $0x80] sm:$0x1] }
  0x97   : > { %747 = vst [vmem:[#allocation2 + $0x190] sm:$0xff] %v3834_v31  ;;  %v4061_v31 = vmul.f32 %v4044_v59, %v3664_v44  ;;  %v1785_v40 = vadd.f32 %v1677_v42, %v1508_v5  ;;  %v2513_v19 = vmul.f32 %v4050_v2, %v2476_v38  ;;  %v4068_v7 = vmul.f32 %v4050_v2, %v3664_v44 }
  0x98   : > { %749 = vst [vmem:[#allocation2 + $0x1a0] sm:$0x1] %v5776_v6  ;;  %v1018_v3 = vrot.slane %v919_v28, 1  ;;  %v5777_v32 = vrot.slane %v3726_v9, 7  ;;  %v1954_v4 = vsel %vm1289_vm3, %v1952_v25, %v1953_v54  ;;  %v2334_v50 = vrot.slane %v2236_v13, 1 }
  0x99   : > { %748 = vst [vmem:[#allocation2 + $0x198] sm:$0xff] %v3841_v34  ;;  %v2335_v34 = vrot.slane %v4061_v31, 1  ;;  %v1296_v8 = vrot.slane %v1197_v15, 2  ;;  %v5778_v38 = vrot.slane %v3747_v26, 7  ;;  %v2062_v5 = vadd.f32 %v1954_v4, %v1785_v40  ;;  %v5782_v4 = vld [vmem:[#allocation31_spill] sm:$0xff] }
  0x9a   : > { %750 = vst [vmem:[#allocation2 + $0x1a8] sm:$0x1] %v5777_v32  ;;  %v2611_v6 = vrot.slane %v2513_v19, 2  ;;  %v2612_v28 = vrot.slane %v4068_v7, 2  ;;  %v5779_v42 = vrot.slane %v3785_v45, 1  ;;  %v5780_v33 = vrot.slane %v3750_v27, 7 }
  0x9b   : > { %536 = vst [vmem:[#allocation2 + $0x1b0] sm:$0xfe] %v5778_v38  ;;  %v2477_v32 = vld [vmem:[#allocation2 + $0x80] sm:$0x3]  ;;  %v5781_v13 = vrot.slane %v3877_v51, 2  ;;  %v1477_v26 = vmul.f32 %v3887_v43, %v3631_v24  ;;  %v1580_v40 = vmul.f32 %v3890_v56, %v1541_v41  ;;  %v2167_v45 = vadd.f32 %v2135_v18, %v2062_v5  ;;  %v5786_v5 = vld [vmem:[#allocation32_spill] sm:$0xff] }
  0x9c   : > { %v1019_v9 = vsel %vm1011_vm2, %v5779_v42, %v1018_v3  ;;  %537 = vst [vmem:[#allocation2 + $0x1b8] sm:$0xfe] %v5780_v33  ;;  %v881_v19 = vld [vmem:[#allocation2 + $0x28] sm:$0x1]  ;;  %v2336_v27 = vsel %vm1011_vm2, %v2334_v50, %v2335_v34  ;;  %v5783_v51 = vld [vmem:[#allocation33_spill] sm:$0xff]  ;;  %v5784_v3 = vld [vmem:[#allocation27_spill] sm:$0xff]  ;;  %v2239_v41 = vmul.f32 %v3929_v36, %v2200_v52  ;;  %v2516_v18 = vmul.f32 %v3948_v17, %v2477_v32 }
  0x9d   : > { %v1126_v25 = vadd.f32 %v1019_v9, %v3904_v63  ;;  %v1297_v15 = vsel %vm1289_vm3, %v5781_v13, %v1296_v8  ;;  %538 = vst [vmem:[#allocation2 + $0x1c0] sm:$0xff] %v5782_v4  ;;  %v2613_v63 = vsel %vm1289_vm3, %v2611_v6, %v2612_v28  ;;  %v1857_v33 = vmul.f32 %v5783_v51, %v1818_v23  ;;  %v1159_v23 = vld [vmem:[#allocation2 + $0x28] sm:$0x3]  ;;  %v1542_v4 = vld [vmem:[#allocation2 + $0x58] sm:$0x1] }
  0x9e   : > { %v5785_v8 = vrot.slane %v5784_v3, 7  ;;  %v1678_v42 = vrot.slane %v1580_v40, 1  ;;  %539 = vst [vmem:[#allocation2 + $0x1c8] sm:$0xff] %v5786_v5  ;;  %v2444_v9 = vadd.f32 %v2336_v27, %v2167_v45  ;;  %v812_v13 = vmul.f32 %v3951_v53, %v3623_v16  ;;  %v5787_v3 = vld [vmem:[#allocation28_spill] sm:$0xff]  ;;  %v2202_v7 = vld [vmem:[#allocation2 + $0x90] sm:$0xfe] }
  0x9f   : > { %v1404_v38 = vadd.f32 %v1297_v15, %v1126_v25  ;;  %v1955_v50 = vrot.slane %v1857_v33, 2  ;;  %v920_v6 = vmul.f32 %v3755_v30, %v881_v19  ;;  %v2136_v52 = vmul.f32 %v3926_v49, %v3643_v35  ;;  %v1819_v40 = vld [vmem:[#allocation2 + $0x58] sm:$0x3]  ;;  %2755 = vst [vmem:[%s4113_s13] sm:$0xff] %v2720_v60  ;;  %v2201_v60 = vld [vmem:[#allocation2 + $0x88] sm:$0x1] }
  0xa0   : > { %540 = vst [vmem:[#allocation2 + $0x1d0] sm:$0x1] %v5785_v8  ;;  %v5788_v8 = vrot.slane %v5787_v3, 7  ;;  %v2337_v15 = vrot.slane %v2239_v41, 1  ;;  %v2614_v32 = vrot.slane %v2516_v18, 2  ;;  %v2721_v16 = vadd.f32 %v2613_v63, %v2444_v9 }
  0xa1   : > { %v1509_v25 = vadd.f32 %v1477_v26, %v1404_v38  ;;  %v5789_v19 = vrot.slane %v3911_v46, 1  ;;  %v849_v27 = vadd.f32 %v3960_v47, %v812_v13  ;;  %v1020_v26 = vrot.slane %v920_v6, 1  ;;  %v2478_v63 = vld [vmem:[#allocation2 + $0x88] sm:$0x3] }
  0xa2   : > { %541 = vst [vmem:[#allocation2 + $0x1d8] sm:$0x1] %v5788_v8  ;;  %v5790_v38 = vrot.slane %v3921_v37, 2  ;;  %v5791_v18 = vrot.slane %v3942_v48, 1  ;;  %v1198_v3 = vmul.f32 %v3977_v14, %v1159_v23  ;;  %v5792_v46 = vrot.slane %v3966_v22, 2 }
  0xa3   : > { %v1679_v45 = vsel %vm1011_vm2, %v5789_v19, %v1678_v42  ;;  %2756 = vst [vmem:[%s4113_s13 + $0x8] sm:$0xff] %v2721_v16  ;;  %v5793_v9 = vrot.slane %v3870_v0, 1  ;;  %v1581_v37 = vmul.f32 %v3998_v1, %v1542_v4  ;;  %v882_v48 = vld [vmem:[#allocation2 + $0x30] sm:$0xfe]  ;;  %v1478_v23 = vmul.f32 %v3995_v57, %v3635_v29 }
  0xa4   : > { %v1786_v33 = vadd.f32 %v1679_v45, %v1509_v25  ;;  %v1956_v41 = vsel %vm1289_vm3, %v5790_v38, %v1955_v50  ;;  %v2338_v5 = vsel %vm1011_vm2, %v5791_v18, %v2337_v15  ;;  %v2615_v42 = vsel %vm1289_vm3, %v5792_v46, %v2614_v32  ;;  %v5795_v45 = vld [vmem:[#allocation29_spill] sm:$0xff] }
  0xa5   : > { %v1021_v13 = vsel %vm1011_vm2, %v5793_v9, %v1020_v26  ;;  %v1858_v50 = vmul.f32 %v4001_v12, %v1819_v40  ;;  %v1298_v25 = vrot.slane %v1198_v3, 2  ;;  %v1680_v15 = vrot.slane %v1581_v37, 1  ;;  %v1160_v26 = vld [vmem:[#allocation2 + $0x30] sm:$0xfc] }
  0xa6   : > { %v2063_v6 = vadd.f32 %v1956_v41, %v1786_v33  ;;  %v1127_v8 = vadd.f32 %v1021_v13, %v849_v27  ;;  %v2240_v22 = vmul.f32 %v4044_v59, %v2201_v60  ;;  %v2517_v32 = vmul.f32 %v4050_v2, %v2478_v63  ;;  %v1543_v63 = vld [vmem:[#allocation2 + $0x60] sm:$0xfe] }
  0xa7   : > { %v1957_v16 = vrot.slane %v1858_v50, 2  ;;  %v5794_v19 = vrot.slane %v3991_v62, 2  ;;  %v813_v40 = vmul.f32 %v3901_v58, %v5795_v45  ;;  %v921_v27 = vmul.f32 %v3736_v20, %v882_v48  ;;  %v1820_v50 = vld [vmem:[#allocation2 + $0x60] sm:$0xfc] }
  0xa8   : > { %v2168_v0 = vadd.f32 %v2136_v52, %v2063_v6  ;;  %v5796_v38 = vrot.slane %v4018_v55, 1  ;;  %v2137_v18 = vmul.f32 %v4033_v10, %v3664_v44  ;;  %v2339_v3 = vrot.slane %v2240_v22, 1  ;;  %v5797_v55 = vld [vmem:[#allocation30_spill] sm:$0xff] }
  0xa9   : > { %v1299_v4 = vsel %vm1289_vm3, %v5794_v19, %v1298_v25  ;;  %v1958_v62 = vsel %vm1289_vm3, %v1953_v54, %v1957_v16  ;;  %v2616_v60 = vrot.slane %v2517_v32, 2  ;;  %v4156_v58 = vmul.f32 %v3736_v20, %v3631_v24  ;;  %v4182_v16 = vld [vmem:[#allocation2 + $0x90] sm:$0xff] }
  0xaa   : > { %v1405_v33 = vadd.f32 %v1299_v4, %v1127_v8  ;;  %v1681_v41 = vsel %vm1011_vm2, %v5796_v38, %v1680_v15  ;;  %v2445_v52 = vadd.f32 %v2338_v5, %v2168_v0  ;;  %v850_v9 = vadd.f32 %v5797_v55, %v813_v40  ;;  %v2479_v19 = vld [vmem:[#allocation2 + $0x90] sm:$0xfc]  ;;  %v5798_v40 = vld [vmem:[#allocation34_spill] sm:$0xff] }
  0xab   : > { %v1022_v13 = vrot.slane %v921_v27, 1  ;;  %v1199_v37 = vmul.f32 %v3850_v21, %v1160_v26  ;;  %v2340_v11 = vsel %vm1011_vm2, %v2335_v34, %v2339_v3  ;;  %v5640_v54 = vrot.slane %v4156_v58, 1 }
  0xac   : > { %v1510_v46 = vadd.f32 %v1478_v23, %v1405_v33  ;;  %v2722_v48 = vadd.f32 %v2615_v42, %v2445_v52  ;;  %v4166_v5 = vmul.f32 %v3850_v21, %v3631_v24  ;;  %v2617_v8 = vsel %vm1289_vm3, %v2612_v28, %v2616_v60  ;;  %v5799_v60 = vld [vmem:[#allocation25_spill] sm:$0xff] }
  0xad   : > { %v1300_v25 = vrot.slane %v1199_v37, 2  ;;  %v1582_v23 = vmul.f32 %v3890_v56, %v1543_v63  ;;  %v1024_v31 = vsel %vm1011_vm2, %v1022_v13, %v5640_v54  ;;  %v4179_v42 = vmul.f32 %v3890_v56, %v3643_v35  ;;  %v883_v13 = vld [vmem:[#allocation2 + $0x38] sm:$0xfe]  ;;  %v1822_v54 = vld [vmem:[#allocation2 + $0x80] sm:$0x3] }
  0xae   : > { %v1787_v6 = vadd.f32 %v1681_v41, %v1510_v46  ;;  %2757 = vst [vmem:[%s4113_s13 + $0x10] sm:$0xff] %v2722_v48  ;;  %v5639_v34 = vrot.slane %v4166_v5, 2  ;;  %v1859_v15 = vmul.f32 %v5783_v51, %v1820_v50  ;;  %v1128_v22 = vadd.f32 %v1024_v31, %v850_v9 }
  0xaf   : > { %v1682_v32 = vrot.slane %v1582_v23, 1  ;;  %v4186_v0 = vmul.f32 %v5783_v51, %v3643_v35  ;;  %v1479_v27 = vmul.f32 %v5798_v40, %v3887_v43  ;;  %v5638_v26 = vrot.slane %v4179_v42, 1 }
  0xb0   : > { %v2064_v28 = vadd.f32 %v1958_v62, %v1787_v6  ;;  %v1302_v4 = vsel %vm1289_vm3, %v1300_v25, %v5639_v34  ;;  %v1959_v33 = vrot.slane %v1859_v15, 2  ;;  %v2138_v3 = vmul.f32 %v3926_v49, %v4182_v16  ;;  %v1161_v6 = vld [vmem:[#allocation2 + $0x38] sm:$0xfc] }
  0xb1   : > { %v1406_v41 = vadd.f32 %v1302_v4, %v1128_v22  ;;  %v2241_v52 = vmul.f32 %v3929_v36, %v2202_v7  ;;  %v5637_v62 = vrot.slane %v4186_v0, 2  ;;  %v4200_v63 = vmul.f32 %v3929_v36, %v5799_v60 }
  0xb2   : > { %v2169_v38 = vadd.f32 %v2137_v18, %v2064_v28  ;;  %v2518_v46 = vmul.f32 %v3948_v17, %v2479_v19  ;;  %v4205_v9 = vmul.f32 %v3948_v17, %v5799_v60  ;;  %v1684_v50 = vsel %vm1011_vm2, %v1682_v32, %v5638_v26  ;;  %v1544_v32 = vld [vmem:[#allocation2 + $0x68] sm:$0xfe] }
  0xb3   : > { %v1511_v37 = vadd.f32 %v1479_v27, %v1406_v41  ;;  %v2341_v48 = vrot.slane %v2241_v52, 1  ;;  %v5635_v25 = vrot.slane %v4200_v63, 1  ;;  %v814_v15 = vmul.f32 %v4012_v39, %v3951_v53 }
  0xb4   : > { %v2446_v18 = vadd.f32 %v2340_v11, %v2169_v38  ;;  %v2618_v23 = vrot.slane %v2518_v46, 2  ;;  %v5634_v31 = vrot.slane %v4205_v9, 2  ;;  %v922_v11 = vmul.f32 %v3755_v30, %v883_v13 }
  0xb5   : > { %v1788_v28 = vadd.f32 %v1684_v50, %v1511_v37  ;;  %v4217_v22 = vmul.f32 %v3755_v30, %v3635_v29  ;;  %v1961_v19 = vsel %vm1289_vm3, %v1959_v33, %v5637_v62  ;;  %v2343_v4 = vsel %vm1011_vm2, %v2341_v48, %v5635_v25 }
  0xb6   : > { %v2723_v7 = vadd.f32 %v2617_v8, %v2446_v18  ;;  %v851_v27 = vadd.f32 %v3960_v47, %v814_v15  ;;  %v1200_v39 = vmul.f32 %v3977_v14, %v1161_v6  ;;  %v1821_v8 = vld [vmem:[#allocation2 + $0x68] sm:$0xfc]  ;;  %v1025_v41 = vrot.slane %v922_v11, 1 }
  0xb7   : > { %v2065_v38 = vadd.f32 %v1961_v19, %v1788_v28  ;;  %v5633_v52 = vrot.slane %v4217_v22, 1  ;;  %v4231_v46 = vmul.f32 %v3977_v14, %v3635_v29  ;;  %v2620_v33 = vsel %vm1289_vm3, %v2618_v23, %v5634_v31  ;;  %v2203_v28 = vld [vmem:[#allocation2 + $0x98] sm:$0xfe]  ;;  %v884_v31 = vld [vmem:[#allocation2 + $0x50] sm:$0x1] }
  0xb8   : > { %2758 = vst [vmem:[%s4113_s13 + $0x18] sm:$0xff] %v2723_v7  ;;  %v1303_v13 = vrot.slane %v1200_v39, 2  ;;  %v1583_v18 = vmul.f32 %v3998_v1, %v1544_v32  ;;  %v4239_v37 = vmul.f32 %v3998_v1, %v3664_v44  ;;  %v1860_v15 = vmul.f32 %v4001_v12, %v1821_v8  ;;  %v4246_v7 = vld [vmem:[#allocation2 + $0x98] sm:$0xff] }
  0xb9   : > { %v2170_v50 = vadd.f32 %v2138_v3, %v2065_v38  ;;  %v1027_v48 = vsel %vm1011_vm2, %v1025_v41, %v5633_v52  ;;  %v5636_v6 = vrot.slane %v4231_v46, 2  ;;  %5800 = vst [vmem:[#allocation31_spill] sm:$0xff] %v4246_v7  ;;  %v4251_v19 = vmul.f32 %v4001_v12, %v3664_v44  ;;  %v2480_v3 = vld [vmem:[#allocation2 + $0x98] sm:$0xfc] }
  0xba   : > { %v1129_v23 = vadd.f32 %v1027_v48, %v851_v27  ;;  %v1685_v11 = vrot.slane %v1583_v18, 1  ;;  %v5641_v32 = vrot.slane %v4239_v37, 1  ;;  %v1480_v8 = vmul.f32 %v4030_v61, %v3995_v57 }
  0xbb   : > { %v2447_v39 = vadd.f32 %v2343_v4, %v2170_v50  ;;  %v1305_v38 = vsel %vm1289_vm3, %v1303_v13, %v5636_v6  ;;  %v1962_v41 = vrot.slane %v1860_v15, 2  ;;  %v2139_v18 = vmul.f32 %v4033_v10, %v4246_v7  ;;  %v5801_v4 = vld [vmem:[#allocation26_spill] sm:$0xff] }
  0xbc   : > { %v1407_v52 = vadd.f32 %v1305_v38, %v1129_v23  ;;  %v2242_v48 = vmul.f32 %v4044_v59, %v2203_v28  ;;  %v4264_v50 = vmul.f32 %v4044_v59, %v5801_v4  ;;  %v2519_v13 = vmul.f32 %v4050_v2, %v2480_v3  ;;  %v1162_v23 = vld [vmem:[#allocation2 + $0x50] sm:$0x3]  ;;  %v1545_v28 = vld [vmem:[#allocation2 + $0x80] sm:$0x1] }
  0xbd   : > { %v2724_v25 = vadd.f32 %v2620_v33, %v2447_v39  ;;  %v4269_v15 = vmul.f32 %v4050_v2, %v5801_v4  ;;  %v1687_v6 = vsel %vm1011_vm2, %v1685_v11, %v5641_v32  ;;  %v815_v33 = vmul.f32 %v5795_v45, %v3631_v24  ;;  %v2204_v24 = vld [vmem:[#allocation2 + $0xb0] sm:$0x1] }
  0xbe   : > { %v1512_v38 = vadd.f32 %v1480_v8, %v1407_v52  ;;  %v2344_v62 = vrot.slane %v2242_v48, 1  ;;  %v5645_v39 = vrot.slane %v4264_v50, 1  ;;  %v2621_v26 = vrot.slane %v2519_v13, 2  ;;  %v2481_v32 = vld [vmem:[#allocation2 + $0xb0] sm:$0x3] }
  0xbf   : > { %2759 = vst [vmem:[%s4113_s13 + $0x20] sm:$0xff] %v2724_v25  ;;  %v5646_v3 = vrot.slane %v4269_v15, 2  ;;  %v925_v34 = vmul.f32 %v3736_v20, %v884_v31  ;;  %v5802_v52 = vrot.slane %v4251_v19, 2  ;;  %v852_v11 = vadd.f32 %v5797_v55, %v815_v33 }
  0xc0   : > { %v1789_v27 = vadd.f32 %v1687_v6, %v1512_v38  ;;  %v1203_v48 = vmul.f32 %v3850_v21, %v1162_v23  ;;  %v2346_v25 = vsel %vm1011_vm2, %v2344_v62, %v5645_v39  ;;  %v1481_v31 = vmul.f32 %v3887_v43, %v3643_v35  ;;  %v885_v35 = vld [vmem:[#allocation2 + $0x58] sm:$0x1] }
  0xc1   : > { %v1964_v8 = vsel %vm1289_vm3, %v1962_v41, %v5802_v52  ;;  %v1028_v13 = vrot.slane %v925_v34, 1  ;;  %v1586_v6 = vmul.f32 %v3890_v56, %v1545_v28  ;;  %v2623_v41 = vsel %vm1289_vm3, %v2621_v26, %v5646_v3 }
  0xc2   : > { %v2066_v38 = vadd.f32 %v1964_v8, %v1789_v27  ;;  %v1306_v33 = vrot.slane %v1203_v48, 2  ;;  %v1863_v23 = vmul.f32 %v5783_v51, %v1822_v54  ;;  %v5803_v52 = vrot.slane %v4156_v58, 1  ;;  %v1163_v48 = vld [vmem:[#allocation2 + $0x58] sm:$0x3] }
  0xc3   : > { %v1688_v61 = vrot.slane %v1586_v6, 1  ;;  %v2245_v34 = vmul.f32 %v3929_v36, %v2204_v24  ;;  %v2522_v62 = vmul.f32 %v3948_v17, %v2481_v32  ;;  %v5804_v27 = vrot.slane %v4166_v5, 2 }
  0xc4   : > { %v1029_v7 = vsel %vm1011_vm2, %v5803_v52, %v1028_v13  ;;  %v2171_v39 = vadd.f32 %v2139_v18, %v2066_v38  ;;  %v1965_v26 = vrot.slane %v1863_v23, 2  ;;  %v2140_v54 = vmul.f32 %v3926_v49, %v5799_v60  ;;  %v1546_v18 = vld [vmem:[#allocation2 + $0x88] sm:$0x1] }
  0xc5   : > { %v1130_v28 = vadd.f32 %v1029_v7, %v852_v11  ;;  %v1307_v8 = vsel %vm1289_vm3, %v5804_v27, %v1306_v33  ;;  %v2347_v58 = vrot.slane %v2245_v34, 1  ;;  %v2624_v3 = vrot.slane %v2522_v62, 2  ;;  %v1823_v11 = vld [vmem:[#allocation2 + $0x88] sm:$0x3] }
  0xc6   : > { %v816_v13 = vmul.f32 %v3951_v53, %v3635_v29  ;;  %v2448_v24 = vadd.f32 %v2346_v25, %v2171_v39  ;;  %v5805_v32 = vrot.slane %v4179_v42, 1  ;;  %v926_v5 = vmul.f32 %v3755_v30, %v885_v35  ;;  %v2205_v42 = vld [vmem:[#allocation2 + $0xb8] sm:$0x1] }
  0xc7   : > { %v1408_v6 = vadd.f32 %v1307_v8, %v1130_v28  ;;  %v5806_v38 = vrot.slane %v4186_v0, 2  ;;  %v5807_v33 = vrot.slane %v4200_v63, 1  ;;  %v1204_v39 = vmul.f32 %v3977_v14, %v1163_v48  ;;  %v2482_v25 = vld [vmem:[#allocation2 + $0xb8] sm:$0x3] }
  0xc8   : > { %v1689_v7 = vsel %vm1011_vm2, %v5805_v32, %v1688_v61  ;;  %v853_v29 = vadd.f32 %v3960_v47, %v816_v13  ;;  %v2725_v61 = vadd.f32 %v2623_v41, %v2448_v24  ;;  %v5808_v34 = vrot.slane %v4205_v9, 2 }
  0xc9   : > { %v1966_v60 = vsel %vm1289_vm3, %v5806_v38, %v1965_v26  ;;  %v2348_v23 = vsel %vm1011_vm2, %v5807_v33, %v2347_v58  ;;  %v1513_v52 = vadd.f32 %v1481_v31, %v1408_v6  ;;  %v1030_v35 = vrot.slane %v926_v5, 1 }
  0xca   : > { %v2625_v62 = vsel %vm1289_vm3, %v5808_v34, %v2624_v3  ;;  %v1308_v0 = vrot.slane %v1204_v39, 2  ;;  %v1482_v28 = vmul.f32 %v3995_v57, %v3664_v44  ;;  %v1587_v63 = vmul.f32 %v3998_v1, %v1546_v18  ;;  %2760 = vst [vmem:[%s4113_s13 + $0x28] sm:$0xff] %v2725_v61  ;;  %v886_v3 = vld [vmem:[#allocation2 + $0x60] sm:$0xfe]  ;;  %v1547_v39 = vld [vmem:[#allocation2 + $0x90] sm:$0xfe] }
  0xcb   : > { %v1864_v27 = vmul.f32 %v4001_v12, %v1823_v11  ;;  %v1790_v8 = vadd.f32 %v1689_v7, %v1513_v52  ;;  %v5809_v26 = vrot.slane %v4217_v22, 1  ;;  %v2246_v31 = vmul.f32 %v4044_v59, %v2205_v42  ;;  %v4335_v7 = vld [vmem:[#allocation2 + $0x70] sm:$0xff]  ;;  %v1164_v18 = vld [vmem:[#allocation2 + $0x60] sm:$0xfc] }
  0xcc   : > { %v2523_v9 = vmul.f32 %v4050_v2, %v2482_v25  ;;  %v5810_v58 = vrot.slane %v4231_v46, 2  ;;  %v1690_v13 = vrot.slane %v1587_v63, 1  ;;  %v817_v22 = vmul.f32 %v5798_v40, %v5795_v45  ;;  %v4354_v34 = vld [vmem:[#allocation2 + $0xa0] sm:$0xff] }
  0xcd   : > { %v1031_v41 = vsel %vm1011_vm2, %v5809_v26, %v1030_v35  ;;  %v1967_v24 = vrot.slane %v1864_v27, 2  ;;  %v2067_v6 = vadd.f32 %v1966_v60, %v1790_v8  ;;  %v2349_v32 = vrot.slane %v2246_v31, 1 }
  0xce   : > { %v1131_v48 = vadd.f32 %v1031_v41, %v853_v29  ;;  %v1309_v44 = vsel %vm1289_vm3, %v5810_v58, %v1308_v0  ;;  %v2626_v5 = vrot.slane %v2523_v9, 2  ;;  %v5811_v38 = vrot.slane %v4239_v37, 1  ;;  %v1824_v0 = vld [vmem:[#allocation2 + $0x90] sm:$0xfc]  ;;  %v2206_v58 = vld [vmem:[#allocation2 + $0xc0] sm:$0xfe] }
  0xcf   : > { %v2141_v46 = vmul.f32 %v4033_v10, %v5801_v4  ;;  %v927_v29 = vmul.f32 %v3736_v20, %v886_v3  ;;  %v2172_v60 = vadd.f32 %v2140_v54, %v2067_v6  ;;  %v5812_v42 = vrot.slane %v4251_v19, 2 }
  0xd0   : > { %v1409_v11 = vadd.f32 %v1309_v44, %v1131_v48  ;;  %v1691_v33 = vsel %vm1011_vm2, %v5811_v38, %v1690_v13  ;;  %v5813_v61 = vrot.slane %v4264_v50, 1  ;;  %v5814_v52 = vrot.slane %v4269_v15, 2  ;;  %v4374_v48 = vld [vmem:[#allocation2 + $0xc0] sm:$0xff] }
  0xd1   : > { %v1968_v25 = vsel %vm1289_vm3, %v5812_v42, %v1967_v24  ;;  %v4358_v4 = vmul.f32 %v3736_v20, %v4335_v7  ;;  %v1032_v54 = vrot.slane %v927_v29, 1  ;;  %v1205_v19 = vmul.f32 %v3850_v21, %v1164_v18  ;;  %5815 = vst [vmem:[#allocation33_spill] sm:$0xff] %v4374_v48 }
  0xd2   : > { %v2350_v40 = vsel %vm1011_vm2, %v5813_v61, %v2349_v32  ;;  %v2627_v37 = vsel %vm1289_vm3, %v5814_v52, %v2626_v5  ;;  %v1514_v35 = vadd.f32 %v1482_v28, %v1409_v11  ;;  %v2449_v63 = vadd.f32 %v2348_v23, %v2172_v60  ;;  %v2483_v32 = vld [vmem:[#allocation2 + $0xc0] sm:$0xfc]  ;;  %v4405_v52 = vld [vmem:[#allocation2 + $0x78] sm:$0xff] }
  0xd3   : > { %v854_v50 = vadd.f32 %v5797_v55, %v817_v22  ;;  %v4364_v27 = vmul.f32 %v3850_v21, %v4335_v7  ;;  %v1588_v15 = vmul.f32 %v3890_v56, %v1547_v39  ;;  %v5655_v28 = vrot.slane %v4358_v4, 1 }
  0xd4   : > { %v1791_v8 = vadd.f32 %v1691_v33, %v1514_v35  ;;  %v1310_v26 = vrot.slane %v1205_v19, 2  ;;  %v4370_v41 = vmul.f32 %v3890_v56, %v4354_v34  ;;  %v2726_v31 = vadd.f32 %v2625_v62, %v2449_v63  ;;  %v4384_v62 = vld [vmem:[#allocation2 + $0xd0] sm:$0xff] }
  0xd5   : > { %v5654_v23 = vrot.slane %v4364_v27, 2  ;;  %v1692_v9 = vrot.slane %v1588_v15, 1  ;;  %v1865_v3 = vmul.f32 %v5783_v51, %v1824_v0  ;;  %v1034_v13 = vsel %vm1011_vm2, %v1032_v54, %v5655_v28  ;;  %v5816_v0 = vld [vmem:[#allocation35_spill] sm:$0xff] }
  0xd6   : > { %v2068_v44 = vadd.f32 %v1968_v25, %v1791_v8  ;;  %v5651_v24 = vrot.slane %v4370_v41, 1  ;;  %v4382_v6 = vmul.f32 %v5783_v51, %v4354_v34  ;;  %2761 = vst [vmem:[%s4113_s13 + $0x30] sm:$0xff] %v2726_v31  ;;  %v1132_v5 = vadd.f32 %v1034_v13, %v854_v50  ;;  %v1165_v50 = vld [vmem:[#allocation2 + $0x68] sm:$0xfc]  ;;  %v1548_v13 = vld [vmem:[#allocation2 + $0x98] sm:$0xfe] }
  0xd7   : > { %v1312_v22 = vsel %vm1289_vm3, %v1310_v26, %v5654_v23  ;;  %v1483_v18 = vmul.f32 %v4182_v16, %v3887_v43  ;;  %v1969_v11 = vrot.slane %v1865_v3, 2  ;;  %v2142_v29 = vmul.f32 %v3926_v49, %v4374_v48 }
  0xd8   : > { %v2173_v38 = vadd.f32 %v2141_v46, %v2068_v44  ;;  %v5650_v33 = vrot.slane %v4382_v6, 2  ;;  %v2247_v39 = vmul.f32 %v3929_v36, %v2206_v58  ;;  %v1410_v60 = vadd.f32 %v1312_v22, %v1132_v5  ;;  %v887_v46 = vld [vmem:[#allocation2 + $0x68] sm:$0xfe] }
  0xd9   : > { %v4398_v42 = vmul.f32 %v3929_v36, %v4384_v62  ;;  %v2524_v25 = vmul.f32 %v3948_v17, %v2483_v32  ;;  %v4403_v61 = vmul.f32 %v3948_v17, %v4384_v62  ;;  %v1694_v54 = vsel %vm1011_vm2, %v1692_v9, %v5651_v24  ;;  %v4422_v44 = vld [vmem:[#allocation2 + $0xa8] sm:$0xff] }
  0xda   : > { %v2450_v35 = vadd.f32 %v2350_v40, %v2173_v38  ;;  %v2351_v19 = vrot.slane %v2247_v39, 1  ;;  %v818_v63 = vmul.f32 %v5816_v0, %v3951_v53  ;;  %v1515_v15 = vadd.f32 %v1483_v18, %v1410_v60  ;;  %v1825_v18 = vld [vmem:[#allocation2 + $0x98] sm:$0xfc] }
  0xdb   : > { %v5649_v8 = vrot.slane %v4398_v42, 1  ;;  %v2628_v26 = vrot.slane %v2524_v25, 2  ;;  %v5648_v31 = vrot.slane %v4403_v61, 2  ;;  %v1971_v40 = vsel %vm1289_vm3, %v1969_v11, %v5650_v33 }
  0xdc   : > { %v2727_v3 = vadd.f32 %v2627_v37, %v2450_v35  ;;  %v928_v58 = vmul.f32 %v3755_v30, %v887_v46  ;;  %v4420_v9 = vmul.f32 %v3755_v30, %v4405_v52  ;;  %v1792_v32 = vadd.f32 %v1694_v54, %v1515_v15  ;;  %v4452_v15 = vld [vmem:[#allocation2 + $0xc8] sm:$0xff] }
  0xdd   : > { %v2353_v5 = vsel %vm1011_vm2, %v2351_v19, %v5649_v8  ;;  %v855_v37 = vadd.f32 %v3960_v47, %v818_v63  ;;  %v1206_v22 = vmul.f32 %v3977_v14, %v1165_v50  ;;  %v2630_v11 = vsel %vm1289_vm3, %v2628_v26, %v5648_v31  ;;  %5817 = vst [vmem:[#allocation27_spill] sm:$0xff] %v4452_v15  ;;  %v2207_v26 = vld [vmem:[#allocation2 + $0xc8] sm:$0xfe] }
  0xde   : > { %2762 = vst [vmem:[%s4113_s13 + $0x38] sm:$0xff] %v2727_v3  ;;  %v1035_v38 = vrot.slane %v928_v58, 1  ;;  %v5647_v39 = vrot.slane %v4420_v9, 1  ;;  %v4436_v60 = vmul.f32 %v3977_v14, %v4405_v52  ;;  %v2069_v25 = vadd.f32 %v1971_v40, %v1792_v32  ;;  %v4455_v32 = vld [vmem:[#allocation2 + $0xd8] sm:$0xff] }
  0xdf   : > { %v1313_v46 = vrot.slane %v1206_v22, 2  ;;  %v1589_v35 = vmul.f32 %v3998_v1, %v1548_v13  ;;  %v4441_v54 = vmul.f32 %v3998_v1, %v4422_v44  ;;  %v1866_v63 = vmul.f32 %v4001_v12, %v1825_v18  ;;  %v2484_v22 = vld [vmem:[#allocation2 + $0xc8] sm:$0xfc]  ;;  %v5818_v18 = vld [vmem:[#allocation31_spill] sm:$0xff] }
  0xe0   : > { %v1037_v19 = vsel %vm1011_vm2, %v1035_v38, %v5647_v39  ;;  %v5652_v0 = vrot.slane %v4436_v60, 2  ;;  %v4450_v50 = vmul.f32 %v4001_v12, %v4422_v44  ;;  %v2174_v3 = vadd.f32 %v2142_v29, %v2069_v25  ;;  %v888_v25 = vld [vmem:[#allocation2 + $0x80] sm:$0x1] }
  0xe1   : > { %v1133_v40 = vadd.f32 %v1037_v19, %v855_v37  ;;  %v1695_v58 = vrot.slane %v1589_v35, 1  ;;  %v5653_v13 = vrot.slane %v4441_v54, 1  ;;  %v1484_v39 = vmul.f32 %v5818_v18, %v3995_v57 }
  0xe2   : > { %v1315_v38 = vsel %vm1289_vm3, %v1313_v46, %v5652_v0  ;;  %v1972_v31 = vrot.slane %v1866_v63, 2  ;;  %v2451_v33 = vadd.f32 %v2353_v5, %v2174_v3  ;;  %v2143_v29 = vmul.f32 %v4033_v10, %v4452_v15  ;;  %v1166_v63 = vld [vmem:[#allocation2 + $0x80] sm:$0x3]  ;;  %v1549_v0 = vld [vmem:[#allocation2 + $0xb0] sm:$0x1] }
  0xe3   : > { %v1411_v24 = vadd.f32 %v1315_v38, %v1133_v40  ;;  %v2248_v37 = vmul.f32 %v4044_v59, %v2207_v26  ;;  %v1697_v35 = vsel %vm1011_vm2, %v1695_v58, %v5653_v13  ;;  %v4471_v46 = vmul.f32 %v4044_v59, %v4455_v32 }
  0xe4   : > { %v2525_v19 = vmul.f32 %v4050_v2, %v2484_v22  ;;  %v4476_v5 = vmul.f32 %v4050_v2, %v4455_v32  ;;  %v2728_v3 = vadd.f32 %v2630_v11, %v2451_v33  ;;  %v819_v38 = vmul.f32 %v5795_v45, %v4335_v7  ;;  %v1826_v22 = vld [vmem:[#allocation2 + $0xb0] sm:$0x3]  ;;  %v2208_v7 = vld [vmem:[#allocation2 + $0xe0] sm:$0x1] }
  0xe5   : > { %v1516_v40 = vadd.f32 %v1484_v39, %v1411_v24  ;;  %v2354_v26 = vrot.slane %v2248_v37, 1  ;;  %v5658_v58 = vrot.slane %v4471_v46, 1  ;;  %v931_v28 = vmul.f32 %v3736_v20, %v888_v25  ;;  %v2485_v39 = vld [vmem:[#allocation2 + $0xe0] sm:$0x3] }
  0xe6   : > { %v2631_v13 = vrot.slane %v2525_v19, 2  ;;  %v5661_v23 = vrot.slane %v4476_v5, 2  ;;  %2763 = vst [vmem:[%s4113_s13 + $0x40] sm:$0xff] %v2728_v3  ;;  %v5819_v15 = vrot.slane %v4450_v50, 2  ;;  %v856_v24 = vadd.f32 %v5797_v55, %v819_v38 }
  0xe7   : > { %v1793_v8 = vadd.f32 %v1697_v35, %v1516_v40  ;;  %v1209_v11 = vmul.f32 %v3850_v21, %v1166_v63  ;;  %v2356_v37 = vsel %vm1011_vm2, %v2354_v26, %v5658_v58  ;;  %v1038_v19 = vrot.slane %v931_v28, 1  ;;  %v889_v58 = vld [vmem:[#allocation2 + $0x88] sm:$0x1] }
  0xe8   : > { %v1974_v33 = vsel %vm1289_vm3, %v1972_v31, %v5819_v15  ;;  %v1485_v25 = vmul.f32 %v3887_v43, %v4354_v34  ;;  %v1592_v35 = vmul.f32 %v3890_v56, %v1549_v0  ;;  %v2633_v31 = vsel %vm1289_vm3, %v2631_v13, %v5661_v23  ;;  %v1167_v13 = vld [vmem:[#allocation2 + $0x88] sm:$0x3] }
  0xe9   : > { %v2070_v3 = vadd.f32 %v1974_v33, %v1793_v8  ;;  %v1316_v15 = vrot.slane %v1209_v11, 2  ;;  %v1869_v63 = vmul.f32 %v5783_v51, %v1826_v22  ;;  %v5820_v40 = vrot.slane %v4358_v4, 1 }
  0xea   : > { %v1698_v18 = vrot.slane %v1592_v35, 1  ;;  %v2251_v28 = vmul.f32 %v3929_v36, %v2208_v7  ;;  %v2528_v26 = vmul.f32 %v3948_v17, %v2485_v39  ;;  %v2144_v33 = vmul.f32 %v3926_v49, %v4384_v62 }
  0xeb   : > { %v1039_v38 = vsel %vm1011_vm2, %v5820_v40, %v1038_v19  ;;  %v2175_v48 = vadd.f32 %v2143_v29, %v2070_v3  ;;  %v1975_v8 = vrot.slane %v1869_v63, 2  ;;  %v5821_v11 = vrot.slane %v4364_v27, 2  ;;  %v1550_v3 = vld [vmem:[#allocation2 + $0xb8] sm:$0x1] }
  0xec   : > { %v1134_v0 = vadd.f32 %v1039_v38, %v856_v24  ;;  %v2357_v4 = vrot.slane %v2251_v28, 1  ;;  %v2634_v23 = vrot.slane %v2528_v26, 2  ;;  %v820_v19 = vmul.f32 %v3951_v53, %v4405_v52  ;;  %v1827_v63 = vld [vmem:[#allocation2 + $0xb8] sm:$0x3] }
  0xed   : > { %v1317_v22 = vsel %vm1289_vm3, %v5821_v11, %v1316_v15  ;;  %v2452_v7 = vadd.f32 %v2356_v37, %v2175_v48  ;;  %v5822_v39 = vrot.slane %v4370_v41, 1  ;;  %v932_v24 = vmul.f32 %v3755_v30, %v889_v58  ;;  %v2209_v41 = vld [vmem:[#allocation2 + $0xe8] sm:$0x1] }
  0xee   : > { %v1412_v35 = vadd.f32 %v1317_v22, %v1134_v0  ;;  %v5823_v27 = vrot.slane %v4382_v6, 2  ;;  %v5824_v40 = vrot.slane %v4398_v42, 1  ;;  %v857_v48 = vadd.f32 %v3960_v47, %v820_v19  ;;  %v2486_v37 = vld [vmem:[#allocation2 + $0xe8] sm:$0x3] }
  0xef   : > { %v1699_v29 = vsel %vm1011_vm2, %v5822_v39, %v1698_v18  ;;  %v1210_v52 = vmul.f32 %v3977_v14, %v1167_v13  ;;  %v2729_v18 = vadd.f32 %v2633_v31, %v2452_v7  ;;  %v5825_v58 = vrot.slane %v4403_v61, 2 }
  0xf0   : > { %v1976_v15 = vsel %vm1289_vm3, %v5823_v27, %v1975_v8  ;;  %v2358_v38 = vsel %vm1011_vm2, %v5824_v40, %v2357_v4  ;;  %v1517_v28 = vadd.f32 %v1485_v25, %v1412_v35  ;;  %v1040_v0 = vrot.slane %v932_v24, 1 }
  0xf1   : > { %v2635_v26 = vsel %vm1289_vm3, %v5825_v58, %v2634_v23  ;;  %v1318_v6 = vrot.slane %v1210_v52, 2  ;;  %v1486_v8 = vmul.f32 %v3995_v57, %v4422_v44  ;;  %v1593_v42 = vmul.f32 %v3998_v1, %v1550_v3  ;;  %2764 = vst [vmem:[%s4113_s13 + $0x48] sm:$0xff] %v2729_v18  ;;  %v890_v23 = vld [vmem:[#allocation2 + $0x90] sm:$0xfe] }
  0xf2   : > { %v1870_v11 = vmul.f32 %v4001_v12, %v1827_v63  ;;  %v1794_v22 = vadd.f32 %v1699_v29, %v1517_v28  ;;  %v5826_v13 = vrot.slane %v4420_v9, 1  ;;  %v2252_v25 = vmul.f32 %v4044_v59, %v2209_v41  ;;  %v1168_v29 = vld [vmem:[#allocation2 + $0x90] sm:$0xfc]  ;;  %v1551_v41 = vld [vmem:[#allocation2 + $0xc0] sm:$0xfe] }
  0xf3   : > { %v2529_v61 = vmul.f32 %v4050_v2, %v2486_v37  ;;  %v5827_v19 = vrot.slane %v4436_v60, 2  ;;  %v1700_v35 = vrot.slane %v1593_v42, 1  ;;  %v821_v9 = vmul.f32 %v4182_v16, %v5795_v45 }
  0xf4   : > { %v1041_v31 = vsel %vm1011_vm2, %v5826_v13, %v1040_v0  ;;  %v1977_v39 = vrot.slane %v1870_v11, 2  ;;  %v2071_v24 = vadd.f32 %v1976_v15, %v1794_v22  ;;  %v2359_v3 = vrot.slane %v2252_v25, 1  ;;  %v1828_v11 = vld [vmem:[#allocation2 + $0xc0] sm:$0xfc] }
  0xf5   : > { %v1135_v4 = vadd.f32 %v1041_v31, %v857_v48  ;;  %v1319_v7 = vsel %vm1289_vm3, %v5827_v19, %v1318_v6  ;;  %v2636_v63 = vrot.slane %v2529_v61, 2  ;;  %v5828_v40 = vrot.slane %v4441_v54, 1  ;;  %v4574_v19 = vld [vmem:[#allocation2 + $0xf0] sm:$0xff] }
  0xf6   : > { %v2145_v48 = vmul.f32 %v4033_v10, %v4455_v32  ;;  %v933_v60 = vmul.f32 %v3736_v20, %v890_v23  ;;  %v2176_v37 = vadd.f32 %v2144_v33, %v2071_v24  ;;  %v5829_v15 = vrot.slane %v4450_v50, 2  ;;  %5832 = vst [vmem:[#allocation32_spill] sm:$0xff] %v4574_v19 }
  0xf7   : > { %v1413_v27 = vadd.f32 %v1319_v7, %v1135_v4  ;;  %v1701_v52 = vsel %vm1011_vm2, %v5828_v40, %v1700_v35  ;;  %v5830_v28 = vrot.slane %v4471_v46, 1  ;;  %v5831_v58 = vrot.slane %v4476_v5, 2  ;;  %v2210_v7 = vld [vmem:[#allocation2 + $0xf0] sm:$0xfe] }
  0xf8   : > { %v1978_v18 = vsel %vm1289_vm3, %v5829_v15, %v1977_v39  ;;  %v4558_v6 = vmul.f32 %v4354_v34, %v3736_v20  ;;  %v1042_v42 = vrot.slane %v933_v60, 1  ;;  %v1211_v33 = vmul.f32 %v3850_v21, %v1168_v29 }
  0xf9   : > { %v2360_v16 = vsel %vm1011_vm2, %v5830_v28, %v2359_v3  ;;  %v2637_v54 = vsel %vm1289_vm3, %v5831_v58, %v2636_v63  ;;  %v1518_v0 = vadd.f32 %v1486_v8, %v1413_v27  ;;  %v2453_v50 = vadd.f32 %v2358_v38, %v2176_v37  ;;  %v2487_v63 = vld [vmem:[#allocation2 + $0xf0] sm:$0xfc]  ;;  %v5833_v27 = vld [vmem:[#allocation33_spill] sm:$0xff] }
  0xfa   : > { %v858_v22 = vadd.f32 %v5797_v55, %v821_v9  ;;  %v4564_v46 = vmul.f32 %v4354_v34, %v3850_v21  ;;  %v1594_v5 = vmul.f32 %v3890_v56, %v1551_v41  ;;  %v5670_v8 = vrot.slane %v4558_v6, 1 }
  0xfb   : > { %v1795_v13 = vadd.f32 %v1701_v52, %v1518_v0  ;;  %v1320_v31 = vrot.slane %v1211_v33, 2  ;;  %v4570_v25 = vmul.f32 %v4384_v62, %v3890_v56  ;;  %v2730_v61 = vadd.f32 %v2635_v26, %v2453_v50  ;;  %v4584_v26 = vld [vmem:[#allocation2 + $0x100] sm:$0xff]  ;;  %v5834_v50 = vld [vmem:[#allocation31_spill] sm:$0xff] }
  0xfc   : > { %v5669_v38 = vrot.slane %v4564_v46, 2  ;;  %v1702_v23 = vrot.slane %v1594_v5, 1  ;;  %v1871_v4 = vmul.f32 %v5783_v51, %v1828_v11  ;;  %v1044_v39 = vsel %vm1011_vm2, %v1042_v42, %v5670_v8  ;;  %v891_v42 = vld [vmem:[#allocation2 + $0x98] sm:$0xfe] }
  0xfd   : > { %v2072_v35 = vadd.f32 %v1978_v18, %v1795_v13  ;;  %v5666_v24 = vrot.slane %v4570_v25, 1  ;;  %v4582_v3 = vmul.f32 %v4384_v62, %v5783_v51  ;;  %2765 = vst [vmem:[%s4113_s13 + $0x50] sm:$0xff] %v2730_v61  ;;  %v1136_v9 = vadd.f32 %v1044_v39, %v858_v22  ;;  %v1169_v5 = vld [vmem:[#allocation2 + $0x98] sm:$0xfc]  ;;  %v1552_v39 = vld [vmem:[#allocation2 + $0xc8] sm:$0xfe] }
  0xfe   : > { %v1322_v29 = vsel %vm1289_vm3, %v1320_v31, %v5669_v38  ;;  %v1487_v40 = vmul.f32 %v5833_v27, %v3887_v43  ;;  %v1979_v52 = vrot.slane %v1871_v4, 2  ;;  %v2146_v37 = vmul.f32 %v3926_v49, %v4574_v19 }
  0xff   : > { %v2177_v60 = vadd.f32 %v2145_v48, %v2072_v35  ;;  %v5665_v41 = vrot.slane %v4582_v3, 2  ;;  %v2253_v15 = vmul.f32 %v3929_v36, %v2210_v7  ;;  %v1414_v18 = vadd.f32 %v1322_v29, %v1136_v9 }
 0x100   : > { %v4598_v28 = vmul.f32 %v3929_v36, %v4584_v26  ;;  %v2530_v58 = vmul.f32 %v3948_v17, %v2487_v63  ;;  %v4603_v0 = vmul.f32 %v3948_v17, %v4584_v26  ;;  %v1704_v33 = vsel %vm1011_vm2, %v1702_v23, %v5666_v24 }
 0x101   : > { %v2454_v48 = vadd.f32 %v2360_v16, %v2177_v60  ;;  %v2361_v11 = vrot.slane %v2253_v15, 1  ;;  %v822_v22 = vmul.f32 %v5834_v50, %v3951_v53  ;;  %v1519_v13 = vadd.f32 %v1487_v40, %v1414_v18  ;;  %v1829_v40 = vld [vmem:[#allocation2 + $0xc8] sm:$0xfc] }
 0x102   : > { %v5664_v31 = vrot.slane %v4598_v28, 1  ;;  %v2638_v61 = vrot.slane %v2530_v58, 2  ;;  %v5663_v4 = vrot.slane %v4603_v0, 2  ;;  %v1981_v16 = vsel %vm1289_vm3, %v1979_v52, %v5665_v41 }
 0x103   : > { %v2731_v7 = vadd.f32 %v2637_v54, %v2454_v48  ;;  %v934_v35 = vmul.f32 %v3755_v30, %v891_v42  ;;  %v4618_v23 = vmul.f32 %v4422_v44, %v3755_v30  ;;  %v1796_v63 = vadd.f32 %v1704_v33, %v1519_v13  ;;  %v4648_v13 = vld [vmem:[#allocation2 + $0xf8] sm:$0xff] }
 0x104   : > { %v2363_v9 = vsel %vm1011_vm2, %v2361_v11, %v5664_v31  ;;  %v859_v29 = vadd.f32 %v3960_v47, %v822_v22  ;;  %v1212_v54 = vmul.f32 %v3977_v14, %v1169_v5  ;;  %v2640_v52 = vsel %vm1289_vm3, %v2638_v61, %v5663_v4  ;;  %5835 = vst [vmem:[#allocation28_spill] sm:$0xff] %v4648_v13  ;;  %v2211_v61 = vld [vmem:[#allocation2 + $0xf8] sm:$0xfe] }
 0x105   : > { %2766 = vst [vmem:[%s4113_s13 + $0x58] sm:$0xff] %v2731_v7  ;;  %v1045_v60 = vrot.slane %v934_v35, 1  ;;  %v5662_v15 = vrot.slane %v4618_v23, 1  ;;  %v4632_v18 = vmul.f32 %v4422_v44, %v3977_v14  ;;  %v2073_v58 = vadd.f32 %v1981_v16, %v1796_v63  ;;  %v4651_v63 = vld [vmem:[#allocation2 + $0x108] sm:$0xff] }
 0x106   : > { %v1323_v42 = vrot.slane %v1212_v54, 2  ;;  %v1595_v48 = vmul.f32 %v3998_v1, %v1552_v39  ;;  %v4637_v33 = vmul.f32 %v4455_v32, %v3998_v1  ;;  %v1872_v22 = vmul.f32 %v4001_v12, %v1829_v40  ;;  %v2488_v54 = vld [vmem:[#allocation2 + $0xf8] sm:$0xfc]  ;;  %v5836_v40 = vld [vmem:[#allocation27_spill] sm:$0xff] }
 0x107   : > { %v1047_v11 = vsel %vm1011_vm2, %v1045_v60, %v5662_v15  ;;  %v5667_v50 = vrot.slane %v4632_v18, 2  ;;  %v4646_v5 = vmul.f32 %v4455_v32, %v4001_v12  ;;  %v2178_v7 = vadd.f32 %v2146_v37, %v2073_v58  ;;  %v892_v58 = vld [vmem:[#allocation2 + $0xb0] sm:$0x1] }
 0x108   : > { %v1137_v16 = vadd.f32 %v1047_v11, %v859_v29  ;;  %v1705_v35 = vrot.slane %v1595_v48, 1  ;;  %v5668_v39 = vrot.slane %v4637_v33, 1  ;;  %v1488_v15 = vmul.f32 %v5836_v40, %v3995_v57 }
 0x109   : > { %v1325_v60 = vsel %vm1289_vm3, %v1323_v42, %v5667_v50  ;;  %v1982_v4 = vrot.slane %v1872_v22, 2  ;;  %v2455_v41 = vadd.f32 %v2363_v9, %v2178_v7  ;;  %v2147_v37 = vmul.f32 %v4033_v10, %v4648_v13  ;;  %v1170_v22 = vld [vmem:[#allocation2 + $0xb0] sm:$0x3]  ;;  %v1553_v50 = vld [vmem:[#allocation2 + $0xe0] sm:$0x1] }
 0x10a   : > { %v1415_v24 = vadd.f32 %v1325_v60, %v1137_v16  ;;  %v2254_v29 = vmul.f32 %v4044_v59, %v2211_v61  ;;  %v1707_v48 = vsel %vm1011_vm2, %v1705_v35, %v5668_v39  ;;  %v4667_v42 = vmul.f32 %v4044_v59, %v4651_v63 }
 0x10b   : > { %v2531_v11 = vmul.f32 %v4050_v2, %v2488_v54  ;;  %v4672_v9 = vmul.f32 %v4050_v2, %v4651_v63  ;;  %v2732_v7 = vadd.f32 %v2640_v52, %v2455_v41  ;;  %v823_v60 = vmul.f32 %v4354_v34, %v5795_v45  ;;  %v1830_v54 = vld [vmem:[#allocation2 + $0xe0] sm:$0x3]  ;;  %v2212_v34 = vld [vmem:[#allocation2 + $0x110] sm:$0x1] }
 0x10c   : > { %v1520_v16 = vadd.f32 %v1488_v15, %v1415_v24  ;;  %v2364_v61 = vrot.slane %v2254_v29, 1  ;;  %v5673_v35 = vrot.slane %v4667_v42, 1  ;;  %v937_v8 = vmul.f32 %v3736_v20, %v892_v58  ;;  %v2489_v15 = vld [vmem:[#allocation2 + $0x110] sm:$0x3] }
 0x10d   : > { %v2641_v39 = vrot.slane %v2531_v11, 2  ;;  %v5676_v38 = vrot.slane %v4672_v9, 2  ;;  %2767 = vst [vmem:[%s4113_s13 + $0x60] sm:$0xff] %v2732_v7  ;;  %v5837_v13 = vrot.slane %v4646_v5, 2  ;;  %v860_v24 = vadd.f32 %v5797_v55, %v823_v60 }
 0x10e   : > { %v1797_v31 = vadd.f32 %v1707_v48, %v1520_v16  ;;  %v1215_v52 = vmul.f32 %v3850_v21, %v1170_v22  ;;  %v2366_v29 = vsel %vm1011_vm2, %v2364_v61, %v5673_v35  ;;  %v1048_v11 = vrot.slane %v937_v8, 1  ;;  %v893_v35 = vld [vmem:[#allocation2 + $0xb8] sm:$0x1] }
 0x10f   : > { %v1984_v41 = vsel %vm1289_vm3, %v1982_v4, %v5837_v13  ;;  %v1489_v58 = vmul.f32 %v4384_v62, %v3887_v43  ;;  %v1598_v48 = vmul.f32 %v3890_v56, %v1553_v50  ;;  %v2643_v4 = vsel %vm1289_vm3, %v2641_v39, %v5676_v38  ;;  %v1171_v39 = vld [vmem:[#allocation2 + $0xb8] sm:$0x3] }
 0x110   : > { %v2074_v7 = vadd.f32 %v1984_v41, %v1797_v31  ;;  %v1326_v13 = vrot.slane %v1215_v52, 2  ;;  %v1875_v22 = vmul.f32 %v5783_v51, %v1830_v54  ;;  %v5838_v16 = vrot.slane %v4558_v6, 1 }
 0x111   : > { %v1708_v40 = vrot.slane %v1598_v48, 1  ;;  %v2257_v8 = vmul.f32 %v3929_v36, %v2212_v34  ;;  %v2534_v61 = vmul.f32 %v3948_v17, %v2489_v15  ;;  %v2148_v41 = vmul.f32 %v3926_v49, %v4584_v26 }
 0x112   : > { %v1049_v60 = vsel %vm1011_vm2, %v5838_v16, %v1048_v11  ;;  %v2179_v19 = vadd.f32 %v2147_v37, %v2074_v7  ;;  %v1985_v31 = vrot.slane %v1875_v22, 2  ;;  %v5839_v52 = vrot.slane %v4564_v46, 2  ;;  %v1554_v7 = vld [vmem:[#allocation2 + $0xe8] sm:$0x1] }
 0x113   : > { %v1138_v50 = vadd.f32 %v1049_v60, %v860_v24  ;;  %v2367_v6 = vrot.slane %v2257_v8, 1  ;;  %v2644_v38 = vrot.slane %v2534_v61, 2  ;;  %v824_v11 = vmul.f32 %v4422_v44, %v3951_v53  ;;  %v1831_v22 = vld [vmem:[#allocation2 + $0xe8] sm:$0x3] }
 0x114   : > { %v1327_v54 = vsel %vm1289_vm3, %v5839_v52, %v1326_v13  ;;  %v2456_v34 = vadd.f32 %v2366_v29, %v2179_v19  ;;  %v5840_v15 = vrot.slane %v4570_v25, 1  ;;  %v938_v24 = vmul.f32 %v3755_v30, %v893_v35  ;;  %v2213_v25 = vld [vmem:[#allocation2 + $0x118] sm:$0x1] }
 0x115   : > { %v1416_v48 = vadd.f32 %v1327_v54, %v1138_v50  ;;  %v5841_v46 = vrot.slane %v4582_v3, 2  ;;  %v5842_v16 = vrot.slane %v4598_v28, 1  ;;  %v861_v44 = vadd.f32 %v3960_v47, %v824_v11  ;;  %v2490_v29 = vld [vmem:[#allocation2 + $0x118] sm:$0x3] }
 0x116   : > { %v1709_v37 = vsel %vm1011_vm2, %v5840_v15, %v1708_v40  ;;  %v1216_v19 = vmul.f32 %v3977_v14, %v1171_v39  ;;  %v2733_v40 = vadd.f32 %v2643_v4, %v2456_v34  ;;  %v5843_v35 = vrot.slane %v4603_v0, 2 }
 0x117   : > { %v1986_v13 = vsel %vm1289_vm3, %v5841_v46, %v1985_v31  ;;  %v2368_v60 = vsel %vm1011_vm2, %v5842_v16, %v2367_v6  ;;  %v1521_v8 = vadd.f32 %v1489_v58, %v1416_v48  ;;  %v1050_v50 = vrot.slane %v938_v24, 1 }
 0x118   : > { %v2645_v61 = vsel %vm1289_vm3, %v5843_v35, %v2644_v38  ;;  %v1328_v3 = vrot.slane %v1216_v19, 2  ;;  %v1490_v31 = vmul.f32 %v4455_v32, %v3995_v57  ;;  %v1599_v28 = vmul.f32 %v3998_v1, %v1554_v7  ;;  %2768 = vst [vmem:[%s4113_s13 + $0x68] sm:$0xff] %v2733_v40  ;;  %v894_v38 = vld [vmem:[#allocation2 + $0xc0] sm:$0xfe] }
 0x119   : > { %v1876_v52 = vmul.f32 %v4001_v12, %v1831_v22  ;;  %v1798_v54 = vadd.f32 %v1709_v37, %v1521_v8  ;;  %v5844_v39 = vrot.slane %v4618_v23, 1  ;;  %v2258_v58 = vmul.f32 %v4044_v59, %v2213_v25  ;;  %v1172_v37 = vld [vmem:[#allocation2 + $0xc0] sm:$0xfc]  ;;  %v1555_v25 = vld [vmem:[#allocation2 + $0xf0] sm:$0xfe] }
 0x11a   : > { %v2535_v0 = vmul.f32 %v4050_v2, %v2490_v29  ;;  %v5845_v11 = vrot.slane %v4632_v18, 2  ;;  %v1710_v48 = vrot.slane %v1599_v28, 1  ;;  %v825_v23 = vmul.f32 %v5833_v27, %v5795_v45 }
 0x11b   : > { %v1051_v4 = vsel %vm1011_vm2, %v5844_v39, %v1050_v50  ;;  %v1987_v15 = vrot.slane %v1876_v52, 2  ;;  %v2075_v24 = vadd.f32 %v1986_v13, %v1798_v54  ;;  %v2369_v7 = vrot.slane %v2258_v58, 1  ;;  %v1832_v52 = vld [vmem:[#allocation2 + $0xf0] sm:$0xfc] }
 0x11c   : > { %v1139_v6 = vadd.f32 %v1051_v4, %v861_v44  ;;  %v1329_v34 = vsel %vm1289_vm3, %v5845_v11, %v1328_v3  ;;  %v2646_v22 = vrot.slane %v2535_v0, 2  ;;  %v5846_v16 = vrot.slane %v4637_v33, 1  ;;  %v4770_v11 = vld [vmem:[#allocation2 + $0x120] sm:$0xff] }
 0x11d   : > { %v2149_v44 = vmul.f32 %v4033_v10, %v4651_v63  ;;  %v939_v18 = vmul.f32 %v3736_v20, %v894_v38  ;;  %v2180_v29 = vadd.f32 %v2148_v41, %v2075_v24  ;;  %v5847_v13 = vrot.slane %v4646_v5, 2  ;;  %5850 = vst [vmem:[#allocation29_spill] sm:$0xff] %v4770_v11 }
 0x11e   : > { %v1417_v46 = vadd.f32 %v1329_v34, %v1139_v6  ;;  %v1711_v19 = vsel %vm1011_vm2, %v5846_v16, %v1710_v48  ;;  %v5848_v8 = vrot.slane %v4667_v42, 1  ;;  %v5849_v35 = vrot.slane %v4672_v9, 2  ;;  %v2214_v34 = vld [vmem:[#allocation2 + $0x120] sm:$0xfe] }
 0x11f   : > { %v1988_v40 = vsel %vm1289_vm3, %v5847_v13, %v1987_v15  ;;  %v4754_v3 = vmul.f32 %v4384_v62, %v3736_v20  ;;  %v1052_v28 = vrot.slane %v939_v18, 1  ;;  %v1217_v41 = vmul.f32 %v3850_v21, %v1172_v37 }
 0x120   : > { %v2370_v27 = vsel %vm1011_vm2, %v5848_v8, %v2369_v7  ;;  %v2647_v33 = vsel %vm1289_vm3, %v5849_v35, %v2646_v22  ;;  %v1522_v50 = vadd.f32 %v1490_v31, %v1417_v46  ;;  %v2457_v5 = vadd.f32 %v2368_v60, %v2180_v29  ;;  %v2491_v22 = vld [vmem:[#allocation2 + $0x120] sm:$0xfc]  ;;  %v5851_v46 = vld [vmem:[#allocation32_spill] sm:$0xff] }
 0x121   : > { %v862_v54 = vadd.f32 %v5797_v55, %v825_v23  ;;  %v4760_v42 = vmul.f32 %v4384_v62, %v3850_v21  ;;  %v1600_v9 = vmul.f32 %v3890_v56, %v1555_v25  ;;  %v5685_v31 = vrot.slane %v4754_v3, 1 }
 0x122   : > { %v1799_v39 = vadd.f32 %v1711_v19, %v1522_v50  ;;  %v1330_v4 = vrot.slane %v1217_v41, 2  ;;  %v4766_v58 = vmul.f32 %v4584_v26, %v3890_v56  ;;  %v2734_v0 = vadd.f32 %v2645_v61, %v2457_v5  ;;  %v4780_v61 = vld [vmem:[#allocation2 + $0x130] sm:$0xff] }
 0x123   : > { %v5684_v60 = vrot.slane %v4760_v42, 2  ;;  %v1712_v38 = vrot.slane %v1600_v9, 1  ;;  %v1877_v6 = vmul.f32 %v5783_v51, %v1832_v52  ;;  %v1054_v15 = vsel %vm1011_vm2, %v1052_v28, %v5685_v31  ;;  %v895_v28 = vld [vmem:[#allocation2 + $0xc8] sm:$0xfe]  ;;  %v5852_v5 = vld [vmem:[#allocation27_spill] sm:$0xff] }
 0x124   : > { %v2076_v48 = vadd.f32 %v1988_v40, %v1799_v39  ;;  %v5681_v24 = vrot.slane %v4766_v58, 1  ;;  %v4778_v7 = vmul.f32 %v4584_v26, %v5783_v51  ;;  %2769 = vst [vmem:[%s4113_s13 + $0x70] sm:$0xff] %v2734_v0  ;;  %v1140_v23 = vadd.f32 %v1054_v15, %v862_v54  ;;  %v1173_v9 = vld [vmem:[#allocation2 + $0xc8] sm:$0xfc]  ;;  %v1556_v15 = vld [vmem:[#allocation2 + $0xf8] sm:$0xfe] }
 0x125   : > { %v1332_v37 = vsel %vm1289_vm3, %v1330_v4, %v5684_v60  ;;  %v1491_v16 = vmul.f32 %v5851_v46, %v3887_v43  ;;  %v1989_v19 = vrot.slane %v1877_v6, 2  ;;  %v2150_v29 = vmul.f32 %v3926_v49, %v4770_v11 }
 0x126   : > { %v2181_v18 = vadd.f32 %v2149_v44, %v2076_v48  ;;  %v5680_v25 = vrot.slane %v4778_v7, 2  ;;  %v2259_v13 = vmul.f32 %v3929_v36, %v2214_v34  ;;  %v1418_v40 = vadd.f32 %v1332_v37, %v1140_v23 }
 0x127   : > { %v4794_v8 = vmul.f32 %v3929_v36, %v4780_v61  ;;  %v2536_v35 = vmul.f32 %v3948_v17, %v2491_v22  ;;  %v4799_v50 = vmul.f32 %v3948_v17, %v4780_v61  ;;  %v1714_v41 = vsel %vm1011_vm2, %v1712_v38, %v5681_v24 }
 0x128   : > { %v2458_v44 = vadd.f32 %v2370_v27, %v2181_v18  ;;  %v2371_v52 = vrot.slane %v2259_v13, 1  ;;  %v826_v54 = vmul.f32 %v5852_v5, %v3951_v53  ;;  %v1523_v39 = vadd.f32 %v1491_v16, %v1418_v40  ;;  %v1833_v16 = vld [vmem:[#allocation2 + $0xf8] sm:$0xfc] }
 0x129   : > { %v5679_v4 = vrot.slane %v4794_v8, 1  ;;  %v2648_v0 = vrot.slane %v2536_v35, 2  ;;  %v5678_v6 = vrot.slane %v4799_v50, 2  ;;  %v1991_v27 = vsel %vm1289_vm3, %v1989_v19, %v5680_v25 }
 0x12a   : > { %v2735_v34 = vadd.f32 %v2647_v33, %v2458_v44  ;;  %v940_v48 = vmul.f32 %v3755_v30, %v895_v28  ;;  %v4814_v38 = vmul.f32 %v4455_v32, %v3755_v30  ;;  %v1800_v22 = vadd.f32 %v1714_v41, %v1523_v39  ;;  %v4844_v39 = vld [vmem:[#allocation2 + $0x128] sm:$0xff] }
 0x12b   : > { %v2373_v23 = vsel %vm1011_vm2, %v2371_v52, %v5679_v4  ;;  %v863_v37 = vadd.f32 %v3960_v47, %v826_v54  ;;  %v1218_v33 = vmul.f32 %v3977_v14, %v1173_v9  ;;  %v2650_v19 = vsel %vm1289_vm3, %v2648_v0, %v5678_v6  ;;  %5853 = vst [vmem:[#allocation30_spill] sm:$0xff] %v4844_v39  ;;  %v2215_v0 = vld [vmem:[#allocation2 + $0x128] sm:$0xfe] }
 0x12c   : > { %2770 = vst [vmem:[%s4113_s13 + $0x78] sm:$0xff] %v2735_v34  ;;  %v1055_v18 = vrot.slane %v940_v48, 1  ;;  %v5677_v13 = vrot.slane %v4814_v38, 1  ;;  %v4828_v40 = vmul.f32 %v4455_v32, %v3977_v14  ;;  %v2077_v35 = vadd.f32 %v1991_v27, %v1800_v22  ;;  %v4847_v22 = vld [vmem:[#allocation2 + $0x138] sm:$0xff] }
 0x12d   : > { %v1333_v28 = vrot.slane %v1218_v33, 2  ;;  %v1601_v44 = vmul.f32 %v3998_v1, %v1556_v15  ;;  %v4833_v41 = vmul.f32 %v4651_v63, %v3998_v1  ;;  %v1878_v54 = vmul.f32 %v4001_v12, %v1833_v16  ;;  %v2492_v33 = vld [vmem:[#allocation2 + $0x128] sm:$0xfc]  ;;  %v5854_v16 = vld [vmem:[#allocation28_spill] sm:$0xff] }
 0x12e   : > { %v1057_v52 = vsel %vm1011_vm2, %v1055_v18, %v5677_v13  ;;  %v5682_v5 = vrot.slane %v4828_v40, 2  ;;  %v4842_v9 = vmul.f32 %v4651_v63, %v4001_v12  ;;  %v2182_v34 = vadd.f32 %v2150_v29, %v2077_v35  ;;  %v896_v35 = vld [vmem:[#allocation2 + $0xe0] sm:$0x1] }
 0x12f   : > { %v1141_v27 = vadd.f32 %v1057_v52, %v863_v37  ;;  %v1715_v48 = vrot.slane %v1601_v44, 1  ;;  %v5683_v15 = vrot.slane %v4833_v41, 1  ;;  %v1492_v13 = vmul.f32 %v5854_v16, %v3995_v57 }
 0x130   : > { %v1335_v18 = vsel %vm1289_vm3, %v1333_v28, %v5682_v5  ;;  %v1992_v6 = vrot.slane %v1878_v54, 2  ;;  %v2459_v25 = vadd.f32 %v2373_v23, %v2182_v34  ;;  %v2151_v29 = vmul.f32 %v4033_v10, %v4844_v39  ;;  %v1174_v54 = vld [vmem:[#allocation2 + $0xe0] sm:$0x3]  ;;  %v1557_v5 = vld [vmem:[#allocation2 + $0x110] sm:$0x1] }
 0x131   : > { %v1419_v24 = vadd.f32 %v1335_v18, %v1141_v27  ;;  %v2260_v37 = vmul.f32 %v4044_v59, %v2215_v0  ;;  %v1717_v44 = vsel %vm1011_vm2, %v1715_v48, %v5683_v15  ;;  %v4863_v28 = vmul.f32 %v4044_v59, %v4847_v22 }
 0x132   : > { %v2537_v52 = vmul.f32 %v4050_v2, %v2492_v33  ;;  %v4868_v23 = vmul.f32 %v4050_v2, %v4847_v22  ;;  %v2736_v34 = vadd.f32 %v2650_v19, %v2459_v25  ;;  %v827_v18 = vmul.f32 %v4384_v62, %v5795_v45  ;;  %v1834_v33 = vld [vmem:[#allocation2 + $0x110] sm:$0x3]  ;;  %v2216_v62 = vld [vmem:[#allocation2 + $0x140] sm:$0x1] }
 0x133   : > { %v1524_v27 = vadd.f32 %v1492_v13, %v1419_v24  ;;  %v2374_v0 = vrot.slane %v2260_v37, 1  ;;  %v5688_v48 = vrot.slane %v4863_v28, 1  ;;  %v943_v31 = vmul.f32 %v3736_v20, %v896_v35  ;;  %v2493_v13 = vld [vmem:[#allocation2 + $0x140] sm:$0x3] }
 0x134   : > { %v2651_v15 = vrot.slane %v2537_v52, 2  ;;  %v5691_v60 = vrot.slane %v4868_v23, 2  ;;  %2771 = vst [vmem:[%s4113_s13 + $0x80] sm:$0xff] %v2736_v34  ;;  %v5855_v39 = vrot.slane %v4842_v9, 2  ;;  %v864_v24 = vadd.f32 %v5797_v55, %v827_v18 }
 0x135   : > { %v1801_v4 = vadd.f32 %v1717_v44, %v1524_v27  ;;  %v1221_v19 = vmul.f32 %v3850_v21, %v1174_v54  ;;  %v2376_v37 = vsel %vm1011_vm2, %v2374_v0, %v5688_v48  ;;  %v1058_v52 = vrot.slane %v943_v31, 1  ;;  %v897_v48 = vld [vmem:[#allocation2 + $0xe8] sm:$0x1] }
 0x136   : > { %v1994_v25 = vsel %vm1289_vm3, %v1992_v6, %v5855_v39  ;;  %v1493_v35 = vmul.f32 %v4584_v26, %v3887_v43  ;;  %v1604_v44 = vmul.f32 %v3890_v56, %v1557_v5  ;;  %v2653_v6 = vsel %vm1289_vm3, %v2651_v15, %v5691_v60  ;;  %v1175_v15 = vld [vmem:[#allocation2 + $0xe8] sm:$0x3] }
 0x137   : > { %v2078_v34 = vadd.f32 %v1994_v25, %v1801_v4  ;;  %v1336_v39 = vrot.slane %v1221_v19, 2  ;;  %v1881_v54 = vmul.f32 %v5783_v51, %v1834_v33  ;;  %v5856_v27 = vrot.slane %v4754_v3, 1 }
 0x138   : > { %v1718_v16 = vrot.slane %v1604_v44, 1  ;;  %v2263_v31 = vmul.f32 %v3929_v36, %v2216_v62  ;;  %v2540_v0 = vmul.f32 %v3948_v17, %v2493_v13  ;;  %v2152_v25 = vmul.f32 %v3926_v49, %v4780_v61 }
 0x139   : > { %v1059_v18 = vsel %vm1011_vm2, %v5856_v27, %v1058_v52  ;;  %v2183_v11 = vadd.f32 %v2151_v29, %v2078_v34  ;;  %v1995_v4 = vrot.slane %v1881_v54, 2  ;;  %v5857_v19 = vrot.slane %v4760_v42, 2  ;;  %v1558_v34 = vld [vmem:[#allocation2 + $0x118] sm:$0x1] }
 0x13a   : > { %v1142_v5 = vadd.f32 %v1059_v18, %v864_v24  ;;  %v2377_v3 = vrot.slane %v2263_v31, 1  ;;  %v2654_v60 = vrot.slane %v2540_v0, 2  ;;  %v828_v52 = vmul.f32 %v4455_v32, %v3951_v53  ;;  %v1835_v54 = vld [vmem:[#allocation2 + $0x118] sm:$0x3] }
 0x13b   : > { %v1337_v33 = vsel %vm1289_vm3, %v5857_v19, %v1336_v39  ;;  %v2460_v62 = vadd.f32 %v2376_v37, %v2183_v11  ;;  %v5858_v13 = vrot.slane %v4766_v58, 1  ;;  %v944_v24 = vmul.f32 %v3755_v30, %v897_v48  ;;  %v2217_v58 = vld [vmem:[#allocation2 + $0x148] sm:$0x1] }
 0x13c   : > { %v1420_v44 = vadd.f32 %v1337_v33, %v1142_v5  ;;  %v5859_v42 = vrot.slane %v4778_v7, 2  ;;  %v5860_v27 = vrot.slane %v4794_v8, 1  ;;  %v865_v32 = vadd.f32 %v3960_v47, %v828_v52  ;;  %v2494_v37 = vld [vmem:[#allocation2 + $0x148] sm:$0x3] }
 0x13d   : > { %v1719_v29 = vsel %vm1011_vm2, %v5858_v13, %v1718_v16  ;;  %v1222_v11 = vmul.f32 %v3977_v14, %v1175_v15  ;;  %v2737_v16 = vadd.f32 %v2653_v6, %v2460_v62  ;;  %v5861_v48 = vrot.slane %v4799_v50, 2 }
 0x13e   : > { %v1996_v39 = vsel %vm1289_vm3, %v5859_v42, %v1995_v4  ;;  %v2378_v18 = vsel %vm1011_vm2, %v5860_v27, %v2377_v3  ;;  %v1525_v31 = vadd.f32 %v1493_v35, %v1420_v44  ;;  %v1060_v5 = vrot.slane %v944_v24, 1 }
 0x13f   : > { %v2655_v0 = vsel %vm1289_vm3, %v5861_v48, %v2654_v60  ;;  %v1338_v7 = vrot.slane %v1222_v11, 2  ;;  %v1494_v4 = vmul.f32 %v4651_v63, %v3995_v57  ;;  %v1605_v8 = vmul.f32 %v3998_v1, %v1558_v34  ;;  %2772 = vst [vmem:[%s4113_s13 + $0x88] sm:$0xff] %v2737_v16  ;;  %v898_v60 = vld [vmem:[#allocation2 + $0xf0] sm:$0xfe] }
 0x140   : > { %v1882_v19 = vmul.f32 %v4001_v12, %v1835_v54  ;;  %v1802_v33 = vadd.f32 %v1719_v29, %v1525_v31  ;;  %v5862_v15 = vrot.slane %v4814_v38, 1  ;;  %v2264_v35 = vmul.f32 %v4044_v59, %v2217_v58  ;;  %v1176_v29 = vld [vmem:[#allocation2 + $0xf0] sm:$0xfc]  ;;  %v1559_v58 = vld [vmem:[#allocation2 + $0x120] sm:$0xfe] }
 0x141   : > { %v2541_v50 = vmul.f32 %v4050_v2, %v2494_v37  ;;  %v5863_v52 = vrot.slane %v4828_v40, 2  ;;  %v1720_v44 = vrot.slane %v1605_v8, 1  ;;  %v829_v38 = vmul.f32 %v5851_v46, %v5795_v45 }
 0x142   : > { %v1061_v6 = vsel %vm1011_vm2, %v5862_v15, %v1060_v5  ;;  %v1997_v13 = vrot.slane %v1882_v19, 2  ;;  %v2079_v24 = vadd.f32 %v1996_v39, %v1802_v33  ;;  %v2379_v34 = vrot.slane %v2264_v35, 1  ;;  %v1836_v19 = vld [vmem:[#allocation2 + $0x120] sm:$0xfc] }
 0x143   : > { %v1143_v3 = vadd.f32 %v1061_v6, %v865_v32  ;;  %v1339_v62 = vsel %vm1289_vm3, %v5863_v52, %v1338_v7  ;;  %v2656_v54 = vrot.slane %v2541_v50, 2  ;;  %v5864_v27 = vrot.slane %v4833_v41, 1  ;;  %v4966_v52 = vld [vmem:[#allocation2 + $0x150] sm:$0xff] }
 0x144   : > { %v2153_v32 = vmul.f32 %v4033_v10, %v4847_v22  ;;  %v945_v40 = vmul.f32 %v3736_v20, %v898_v60  ;;  %v2184_v37 = vadd.f32 %v2152_v25, %v2079_v24  ;;  %v5865_v39 = vrot.slane %v4842_v9, 2  ;;  %5868 = vst [vmem:[#allocation34_spill] sm:$0xff] %v4966_v52 }
 0x145   : > { %v1421_v42 = vadd.f32 %v1339_v62, %v1143_v3  ;;  %v1721_v11 = vsel %vm1011_vm2, %v5864_v27, %v1720_v44  ;;  %v5866_v31 = vrot.slane %v4863_v28, 1  ;;  %v5867_v48 = vrot.slane %v4868_v23, 2  ;;  %v2218_v62 = vld [vmem:[#allocation2 + $0x150] sm:$0xfe] }
 0x146   : > { %v1998_v16 = vsel %vm1289_vm3, %v5865_v39, %v1997_v13  ;;  %v4950_v7 = vmul.f32 %v4584_v26, %v3736_v20  ;;  %v1062_v8 = vrot.slane %v945_v40, 1  ;;  %v1223_v25 = vmul.f32 %v3850_v21, %v1176_v29 }
 0x147   : > { %v2380_v46 = vsel %vm1011_vm2, %v5866_v31, %v2379_v34  ;;  %v2657_v41 = vsel %vm1289_vm3, %v5867_v48, %v2656_v54  ;;  %v1526_v5 = vadd.f32 %v1494_v4, %v1421_v42  ;;  %v2461_v9 = vadd.f32 %v2378_v18, %v2184_v37  ;;  %v2495_v54 = vld [vmem:[#allocation2 + $0x150] sm:$0xfc]  ;;  %v5869_v42 = vld [vmem:[#allocation29_spill] sm:$0xff] }
 0x148   : > { %v866_v33 = vadd.f32 %v5797_v55, %v829_v38  ;;  %v4956_v28 = vmul.f32 %v4584_v26, %v3850_v21  ;;  %v1606_v23 = vmul.f32 %v3890_v56, %v1559_v58  ;;  %v5700_v4 = vrot.slane %v4950_v7, 1 }
 0x149   : > { %v1803_v15 = vadd.f32 %v1721_v11, %v1526_v5  ;;  %v1340_v6 = vrot.slane %v1223_v25, 2  ;;  %v4962_v35 = vmul.f32 %v4780_v61, %v3890_v56  ;;  %v2738_v50 = vadd.f32 %v2655_v0, %v2461_v9  ;;  %v4976_v0 = vld [vmem:[#allocation2 + $0x160] sm:$0xff]  ;;  %v5870_v9 = vld [vmem:[#allocation28_spill] sm:$0xff] }
 0x14a   : > { %v5699_v18 = vrot.slane %v4956_v28, 2  ;;  %v1722_v60 = vrot.slane %v1606_v23, 1  ;;  %v1883_v3 = vmul.f32 %v5783_v51, %v1836_v19  ;;  %v1064_v13 = vsel %vm1011_vm2, %v1062_v8, %v5700_v4  ;;  %v899_v8 = vld [vmem:[#allocation2 + $0xf8] sm:$0xfe] }
 0x14b   : > { %v2080_v44 = vadd.f32 %v1998_v16, %v1803_v15  ;;  %v5696_v24 = vrot.slane %v4962_v35, 1  ;;  %v4974_v34 = vmul.f32 %v4780_v61, %v5783_v51  ;;  %2773 = vst [vmem:[%s4113_s13 + $0x90] sm:$0xff] %v2738_v50  ;;  %v1144_v38 = vadd.f32 %v1064_v13, %v866_v33  ;;  %v1177_v23 = vld [vmem:[#allocation2 + $0xf8] sm:$0xfc]  ;;  %v1560_v13 = vld [vmem:[#allocation2 + $0x128] sm:$0xfe] }
 0x14c   : > { %v1342_v29 = vsel %vm1289_vm3, %v1340_v6, %v5699_v18  ;;  %v1495_v27 = vmul.f32 %v5869_v42, %v3887_v43  ;;  %v1999_v11 = vrot.slane %v1883_v3, 2  ;;  %v2154_v37 = vmul.f32 %v3926_v49, %v4966_v52 }
 0x14d   : > { %v2185_v40 = vadd.f32 %v2153_v32, %v2080_v44  ;;  %v5695_v58 = vrot.slane %v4974_v34, 2  ;;  %v2265_v39 = vmul.f32 %v3929_v36, %v2218_v62  ;;  %v1422_v16 = vadd.f32 %v1342_v29, %v1144_v38 }
 0x14e   : > { %v4990_v31 = vmul.f32 %v3929_v36, %v4976_v0  ;;  %v2542_v48 = vmul.f32 %v3948_v17, %v2495_v54  ;;  %v4995_v5 = vmul.f32 %v3948_v17, %v4976_v0  ;;  %v1724_v25 = vsel %vm1011_vm2, %v1722_v60, %v5696_v24 }
 0x14f   : > { %v2462_v32 = vadd.f32 %v2380_v46, %v2185_v40  ;;  %v2381_v19 = vrot.slane %v2265_v39, 1  ;;  %v830_v33 = vmul.f32 %v5870_v9, %v3951_v53  ;;  %v1527_v15 = vadd.f32 %v1495_v27, %v1422_v16  ;;  %v1837_v27 = vld [vmem:[#allocation2 + $0x128] sm:$0xfc] }
 0x150   : > { %v5694_v6 = vrot.slane %v4990_v31, 1  ;;  %v2658_v50 = vrot.slane %v2542_v48, 2  ;;  %v5693_v3 = vrot.slane %v4995_v5, 2  ;;  %v2001_v46 = vsel %vm1289_vm3, %v1999_v11, %v5695_v58 }
 0x151   : > { %v2739_v62 = vadd.f32 %v2657_v41, %v2462_v32  ;;  %v946_v44 = vmul.f32 %v3755_v30, %v899_v8  ;;  %v5010_v60 = vmul.f32 %v4651_v63, %v3755_v30  ;;  %v1804_v54 = vadd.f32 %v1724_v25, %v1527_v15  ;;  %v5040_v15 = vld [vmem:[#allocation2 + $0x158] sm:$0xff] }
 0x152   : > { %v2383_v38 = vsel %vm1011_vm2, %v2381_v19, %v5694_v6  ;;  %v867_v29 = vadd.f32 %v3960_v47, %v830_v33  ;;  %v1224_v41 = vmul.f32 %v3977_v14, %v1177_v23  ;;  %v2660_v11 = vsel %vm1289_vm3, %v2658_v50, %v5693_v3  ;;  %5871 = vst [vmem:[#allocation25_spill] sm:$0xff] %v5040_v15  ;;  %v2219_v50 = vld [vmem:[#allocation2 + $0x158] sm:$0xfe] }
 0x153   : > { %2774 = vst [vmem:[%s4113_s13 + $0x98] sm:$0xff] %v2739_v62  ;;  %v1065_v40 = vrot.slane %v946_v44, 1  ;;  %v5692_v39 = vrot.slane %v5010_v60, 1  ;;  %v5024_v16 = vmul.f32 %v4651_v63, %v3977_v14  ;;  %v2081_v48 = vadd.f32 %v2001_v46, %v1804_v54  ;;  %v5043_v54 = vld [vmem:[#allocation2 + $0x168] sm:$0xff] }
 0x154   : > { %v1343_v8 = vrot.slane %v1224_v41, 2  ;;  %v1607_v32 = vmul.f32 %v3998_v1, %v1560_v13  ;;  %v5029_v25 = vmul.f32 %v4847_v22, %v3998_v1  ;;  %v1884_v33 = vmul.f32 %v4001_v12, %v1837_v27  ;;  %v2496_v41 = vld [vmem:[#allocation2 + $0x158] sm:$0xfc]  ;;  %v5872_v27 = vld [vmem:[#allocation30_spill] sm:$0xff] }
 0x155   : > { %v1067_v19 = vsel %vm1011_vm2, %v1065_v40, %v5692_v39  ;;  %v5697_v9 = vrot.slane %v5024_v16, 2  ;;  %v5038_v23 = vmul.f32 %v4847_v22, %v4001_v12  ;;  %v2186_v62 = vadd.f32 %v2154_v37, %v2081_v48  ;;  %v900_v48 = vld [vmem:[#allocation2 + $0x110] sm:$0x1] }
 0x156   : > { %v1145_v46 = vadd.f32 %v1067_v19, %v867_v29  ;;  %v1725_v44 = vrot.slane %v1607_v32, 1  ;;  %v5698_v13 = vrot.slane %v5029_v25, 1  ;;  %v1496_v39 = vmul.f32 %v5872_v27, %v3995_v57 }
 0x157   : > { %v1345_v40 = vsel %vm1289_vm3, %v1343_v8, %v5697_v9  ;;  %v2002_v3 = vrot.slane %v1884_v33, 2  ;;  %v2463_v58 = vadd.f32 %v2383_v38, %v2186_v62  ;;  %v2155_v37 = vmul.f32 %v4033_v10, %v5040_v15  ;;  %v1178_v33 = vld [vmem:[#allocation2 + $0x110] sm:$0x3]  ;;  %v1561_v9 = vld [vmem:[#allocation2 + $0x140] sm:$0x1] }
 0x158   : > { %v1423_v24 = vadd.f32 %v1345_v40, %v1145_v46  ;;  %v2266_v29 = vmul.f32 %v4044_v59, %v2219_v50  ;;  %v1727_v32 = vsel %vm1011_vm2, %v1725_v44, %v5698_v13  ;;  %v5059_v8 = vmul.f32 %v4044_v59, %v5043_v54 }
 0x159   : > { %v2543_v19 = vmul.f32 %v4050_v2, %v2496_v41  ;;  %v5064_v38 = vmul.f32 %v4050_v2, %v5043_v54  ;;  %v2740_v62 = vadd.f32 %v2660_v11, %v2463_v58  ;;  %v831_v40 = vmul.f32 %v4584_v26, %v5795_v45  ;;  %v1838_v41 = vld [vmem:[#allocation2 + $0x140] sm:$0x3]  ;;  %v2220_v26 = vld [vmem:[#allocation2 + $0x170] sm:$0x1] }
 0x15a   : > { %v1528_v46 = vadd.f32 %v1496_v39, %v1423_v24  ;;  %v2384_v50 = vrot.slane %v2266_v29, 1  ;;  %v5703_v44 = vrot.slane %v5059_v8, 1  ;;  %v949_v4 = vmul.f32 %v3736_v20, %v900_v48  ;;  %v2497_v39 = vld [vmem:[#allocation2 + $0x170] sm:$0x3] }
 0x15b   : > { %v2661_v13 = vrot.slane %v2543_v19, 2  ;;  %v5706_v18 = vrot.slane %v5064_v38, 2  ;;  %2775 = vst [vmem:[%s4113_s13 + $0xa0] sm:$0xff] %v2740_v62  ;;  %v5873_v15 = vrot.slane %v5038_v23, 2  ;;  %v868_v24 = vadd.f32 %v5797_v55, %v831_v40 }
 0x15c   : > { %v1805_v6 = vadd.f32 %v1727_v32, %v1528_v46  ;;  %v1227_v11 = vmul.f32 %v3850_v21, %v1178_v33  ;;  %v2386_v29 = vsel %vm1011_vm2, %v2384_v50, %v5703_v44  ;;  %v1068_v19 = vrot.slane %v949_v4, 1  ;;  %v901_v44 = vld [vmem:[#allocation2 + $0x118] sm:$0x1] }
 0x15d   : > { %v2004_v58 = vsel %vm1289_vm3, %v2002_v3, %v5873_v15  ;;  %v1497_v48 = vmul.f32 %v4780_v61, %v3887_v43  ;;  %v1610_v32 = vmul.f32 %v3890_v56, %v1561_v9  ;;  %v2663_v3 = vsel %vm1289_vm3, %v2661_v13, %v5706_v18  ;;  %v1179_v13 = vld [vmem:[#allocation2 + $0x118] sm:$0x3] }
 0x15e   : > { %v2082_v62 = vadd.f32 %v2004_v58, %v1805_v6  ;;  %v1346_v15 = vrot.slane %v1227_v11, 2  ;;  %v1887_v33 = vmul.f32 %v5783_v51, %v1838_v41  ;;  %v5874_v46 = vrot.slane %v4950_v7, 1 }
 0x15f   : > { %v1728_v27 = vrot.slane %v1610_v32, 1  ;;  %v2269_v4 = vmul.f32 %v3929_v36, %v2220_v26  ;;  %v2546_v50 = vmul.f32 %v3948_v17, %v2497_v39  ;;  %v2156_v58 = vmul.f32 %v3926_v49, %v4976_v0 }
 0x160   : > { %v1069_v40 = vsel %vm1011_vm2, %v5874_v46, %v1068_v19  ;;  %v2187_v52 = vadd.f32 %v2155_v37, %v2082_v62  ;;  %v2005_v6 = vrot.slane %v1887_v33, 2  ;;  %v5875_v11 = vrot.slane %v4956_v28, 2  ;;  %v1562_v62 = vld [vmem:[#allocation2 + $0x148] sm:$0x1] }
 0x161   : > { %v1146_v9 = vadd.f32 %v1069_v40, %v868_v24  ;;  %v2387_v7 = vrot.slane %v2269_v4, 1  ;;  %v2664_v18 = vrot.slane %v2546_v50, 2  ;;  %v832_v19 = vmul.f32 %v4651_v63, %v3951_v53  ;;  %v1839_v33 = vld [vmem:[#allocation2 + $0x148] sm:$0x3] }
 0x162   : > { %v1347_v41 = vsel %vm1289_vm3, %v5875_v11, %v1346_v15  ;;  %v2464_v26 = vadd.f32 %v2386_v29, %v2187_v52  ;;  %v5876_v39 = vrot.slane %v4962_v35, 1  ;;  %v950_v24 = vmul.f32 %v3755_v30, %v901_v44  ;;  %v2221_v35 = vld [vmem:[#allocation2 + $0x178] sm:$0x1] }
 0x163   : > { %v1424_v32 = vadd.f32 %v1347_v41, %v1146_v9  ;;  %v5877_v28 = vrot.slane %v4974_v34, 2  ;;  %v5878_v46 = vrot.slane %v4990_v31, 1  ;;  %v869_v63 = vadd.f32 %v3960_v47, %v832_v19  ;;  %v2498_v29 = vld [vmem:[#allocation2 + $0x178] sm:$0x3] }
 0x164   : > { %v1729_v37 = vsel %vm1011_vm2, %v5876_v39, %v1728_v27  ;;  %v1228_v52 = vmul.f32 %v3977_v14, %v1179_v13  ;;  %v2741_v27 = vadd.f32 %v2663_v3, %v2464_v26  ;;  %v5879_v44 = vrot.slane %v4995_v5, 2 }
 0x165   : > { %v2006_v15 = vsel %vm1289_vm3, %v5877_v28, %v2005_v6  ;;  %v2388_v40 = vsel %vm1011_vm2, %v5878_v46, %v2387_v7  ;;  %v1529_v4 = vadd.f32 %v1497_v48, %v1424_v32  ;;  %v1070_v9 = vrot.slane %v950_v24, 1 }
 0x166   : > { %v2665_v50 = vsel %vm1289_vm3, %v5879_v44, %v2664_v18  ;;  %v1348_v34 = vrot.slane %v1228_v52, 2  ;;  %v1498_v6 = vmul.f32 %v4847_v22, %v3995_v57  ;;  %v1611_v31 = vmul.f32 %v3998_v1, %v1562_v62  ;;  %2776 = vst [vmem:[%s4113_s13 + $0xa8] sm:$0xff] %v2741_v27  ;;  %v902_v18 = vld [vmem:[#allocation2 + $0x120] sm:$0xfe] }
 0x167   : > { %v1888_v11 = vmul.f32 %v4001_v12, %v1839_v33  ;;  %v1806_v41 = vadd.f32 %v1729_v37, %v1529_v4  ;;  %v5880_v13 = vrot.slane %v5010_v60, 1  ;;  %v2270_v48 = vmul.f32 %v4044_v59, %v2221_v35  ;;  %v1180_v37 = vld [vmem:[#allocation2 + $0x120] sm:$0xfc]  ;;  %v1563_v35 = vld [vmem:[#allocation2 + $0x150] sm:$0xfe] }
 0x168   : > { %v2547_v5 = vmul.f32 %v4050_v2, %v2498_v29  ;;  %v5881_v19 = vrot.slane %v5024_v16, 2  ;;  %v1730_v32 = vrot.slane %v1611_v31, 1  ;;  %v833_v60 = vmul.f32 %v5869_v42, %v5795_v45 }
 0x169   : > { %v1071_v3 = vsel %vm1011_vm2, %v5880_v13, %v1070_v9  ;;  %v2007_v39 = vrot.slane %v1888_v11, 2  ;;  %v2083_v24 = vadd.f32 %v2006_v15, %v1806_v41  ;;  %v2389_v62 = vrot.slane %v2270_v48, 1  ;;  %v1840_v11 = vld [vmem:[#allocation2 + $0x150] sm:$0xfc] }
 0x16a   : > { %v1147_v7 = vadd.f32 %v1071_v3, %v869_v63  ;;  %v1349_v26 = vsel %vm1289_vm3, %v5881_v19, %v1348_v34  ;;  %v2666_v33 = vrot.slane %v2547_v5, 2  ;;  %v5882_v46 = vrot.slane %v5029_v25, 1  ;;  %v5162_v19 = vld [vmem:[#allocation2 + $0x180] sm:$0xff] }
 0x16b   : > { %v2157_v63 = vmul.f32 %v4033_v10, %v5043_v54  ;;  %v951_v16 = vmul.f32 %v3736_v20, %v902_v18  ;;  %v2188_v29 = vadd.f32 %v2156_v58, %v2083_v24  ;;  %v5883_v15 = vrot.slane %v5038_v23, 2  ;;  %5886 = vst [vmem:[#allocation26_spill] sm:$0xff] %v5162_v19 }
 0x16c   : > { %v1425_v28 = vadd.f32 %v1349_v26, %v1147_v7  ;;  %v1731_v52 = vsel %vm1011_vm2, %v5882_v46, %v1730_v32  ;;  %v5884_v4 = vrot.slane %v5059_v8, 1  ;;  %v5885_v44 = vrot.slane %v5064_v38, 2  ;;  %v2222_v26 = vld [vmem:[#allocation2 + $0x180] sm:$0xfe] }
 0x16d   : > { %v2008_v27 = vsel %vm1289_vm3, %v5883_v15, %v2007_v39  ;;  %v5146_v34 = vmul.f32 %v4780_v61, %v3736_v20  ;;  %v1072_v31 = vrot.slane %v951_v16, 1  ;;  %v1229_v58 = vmul.f32 %v3850_v21, %v1180_v37 }
 0x16e   : > { %v2390_v42 = vsel %vm1011_vm2, %v5884_v4, %v2389_v62  ;;  %v2667_v25 = vsel %vm1289_vm3, %v5885_v44, %v2666_v33  ;;  %v1530_v9 = vadd.f32 %v1498_v6, %v1425_v28  ;;  %v2465_v23 = vadd.f32 %v2388_v40, %v2188_v29  ;;  %v2499_v33 = vld [vmem:[#allocation2 + $0x180] sm:$0xfc]  ;;  %v5887_v28 = vld [vmem:[#allocation34_spill] sm:$0xff] }
 0x16f   : > { %v870_v41 = vadd.f32 %v5797_v55, %v833_v60  ;;  %v5152_v8 = vmul.f32 %v4780_v61, %v3850_v21  ;;  %v1612_v38 = vmul.f32 %v3890_v56, %v1563_v35  ;;  %v5715_v6 = vrot.slane %v5146_v34, 1 }
 0x170   : > { %v1807_v13 = vadd.f32 %v1731_v52, %v1530_v9  ;;  %v1350_v3 = vrot.slane %v1229_v58, 2  ;;  %v5158_v48 = vmul.f32 %v4976_v0, %v3890_v56  ;;  %v2742_v5 = vadd.f32 %v2665_v50, %v2465_v23  ;;  %v5172_v50 = vld [vmem:[#allocation2 + $0x190] sm:$0xff]  ;;  %v5888_v23 = vld [vmem:[#allocation30_spill] sm:$0xff] }
 0x171   : > { %v5714_v40 = vrot.slane %v5152_v8, 2  ;;  %v1732_v18 = vrot.slane %v1612_v38, 1  ;;  %v1889_v7 = vmul.f32 %v5783_v51, %v1840_v11  ;;  %v1074_v39 = vsel %vm1011_vm2, %v1072_v31, %v5715_v6  ;;  %v903_v31 = vld [vmem:[#allocation2 + $0x128] sm:$0xfe] }
 0x172   : > { %v2084_v32 = vadd.f32 %v2008_v27, %v1807_v13  ;;  %v5711_v24 = vrot.slane %v5158_v48, 1  ;;  %v5170_v62 = vmul.f32 %v4976_v0, %v5783_v51  ;;  %2777 = vst [vmem:[%s4113_s13 + $0xb0] sm:$0xff] %v2742_v5  ;;  %v1148_v60 = vadd.f32 %v1074_v39, %v870_v41  ;;  %v1181_v38 = vld [vmem:[#allocation2 + $0x128] sm:$0xfc]  ;;  %v1564_v39 = vld [vmem:[#allocation2 + $0x158] sm:$0xfe] }
 0x173   : > { %v1352_v37 = vsel %vm1289_vm3, %v1350_v3, %v5714_v40  ;;  %v1499_v46 = vmul.f32 %v5887_v28, %v3887_v43  ;;  %v2009_v52 = vrot.slane %v1889_v7, 2  ;;  %v2158_v29 = vmul.f32 %v3926_v49, %v5162_v19 }
 0x174   : > { %v2189_v16 = vadd.f32 %v2157_v63, %v2084_v32  ;;  %v5710_v35 = vrot.slane %v5170_v62, 2  ;;  %v2271_v15 = vmul.f32 %v3929_v36, %v2222_v26  ;;  %v1426_v27 = vadd.f32 %v1352_v37, %v1148_v60 }
 0x175   : > { %v5186_v4 = vmul.f32 %v3929_v36, %v5172_v50  ;;  %v2548_v44 = vmul.f32 %v3948_v17, %v2499_v33  ;;  %v5191_v9 = vmul.f32 %v3948_v17, %v5172_v50  ;;  %v1734_v58 = vsel %vm1011_vm2, %v1732_v18, %v5711_v24 }
 0x176   : > { %v2466_v63 = vadd.f32 %v2390_v42, %v2189_v16  ;;  %v2391_v11 = vrot.slane %v2271_v15, 1  ;;  %v834_v41 = vmul.f32 %v5888_v23, %v3951_v53  ;;  %v1531_v13 = vadd.f32 %v1499_v46, %v1426_v27  ;;  %v1841_v46 = vld [vmem:[#allocation2 + $0x158] sm:$0xfc] }
 0x177   : > { %v5709_v3 = vrot.slane %v5186_v4, 1  ;;  %v2668_v5 = vrot.slane %v2548_v44, 2  ;;  %v5708_v7 = vrot.slane %v5191_v9, 2  ;;  %v2011_v42 = vsel %vm1289_vm3, %v2009_v52, %v5710_v35 }
 0x178   : > { %v2743_v26 = vadd.f32 %v2667_v25, %v2466_v63  ;;  %v952_v32 = vmul.f32 %v3755_v30, %v903_v31  ;;  %v5206_v18 = vmul.f32 %v4847_v22, %v3755_v30  ;;  %v1808_v33 = vadd.f32 %v1734_v58, %v1531_v13  ;;  %v5236_v13 = vld [vmem:[#allocation2 + $0x188] sm:$0xff] }
 0x179   : > { %v2393_v60 = vsel %vm1011_vm2, %v2391_v11, %v5709_v3  ;;  %v871_v37 = vadd.f32 %v3960_v47, %v834_v41  ;;  %v1230_v25 = vmul.f32 %v3977_v14, %v1181_v38  ;;  %v2670_v52 = vsel %vm1289_vm3, %v2668_v5, %v5708_v7  ;;  %5889 = vst [vmem:[#allocation35_spill] sm:$0xff] %v5236_v13  ;;  %v2223_v5 = vld [vmem:[#allocation2 + $0x188] sm:$0xfe] }
 0x17a   : > { %2778 = vst [vmem:[%s4113_s13 + $0xb8] sm:$0xff] %v2743_v26  ;;  %v1075_v16 = vrot.slane %v952_v32, 1  ;;  %v5707_v15 = vrot.slane %v5206_v18, 1  ;;  %v5220_v27 = vmul.f32 %v4847_v22, %v3977_v14  ;;  %v2085_v44 = vadd.f32 %v2011_v42, %v1808_v33  ;;  %v5239_v33 = vld [vmem:[#allocation2 + $0x198] sm:$0xff] }
 0x17b   : > { %v1353_v31 = vrot.slane %v1230_v25, 2  ;;  %v1613_v63 = vmul.f32 %v3998_v1, %v1564_v39  ;;  %v5225_v58 = vmul.f32 %v5043_v54, %v3998_v1  ;;  %v1890_v41 = vmul.f32 %v4001_v12, %v1841_v46  ;;  %v2500_v25 = vld [vmem:[#allocation2 + $0x188] sm:$0xfc]  ;;  %v5890_v46 = vld [vmem:[#allocation25_spill] sm:$0xff] }
 0x17c   : > { %v1077_v11 = vsel %vm1011_vm2, %v1075_v16, %v5707_v15  ;;  %v5712_v23 = vrot.slane %v5220_v27, 2  ;;  %v5234_v38 = vmul.f32 %v5043_v54, %v4001_v12  ;;  %v2190_v26 = vadd.f32 %v2158_v29, %v2085_v44  ;;  %v904_v44 = vld [vmem:[#allocation2 + $0x140] sm:$0x1] }
 0x17d   : > { %v1149_v42 = vadd.f32 %v1077_v11, %v871_v37  ;;  %v1735_v32 = vrot.slane %v1613_v63, 1  ;;  %v5713_v39 = vrot.slane %v5225_v58, 1  ;;  %v1500_v15 = vmul.f32 %v5890_v46, %v3995_v57 }
 0x17e   : > { %v1355_v16 = vsel %vm1289_vm3, %v1353_v31, %v5712_v23  ;;  %v2012_v7 = vrot.slane %v1890_v41, 2  ;;  %v2467_v35 = vadd.f32 %v2393_v60, %v2190_v26  ;;  %v2159_v29 = vmul.f32 %v4033_v10, %v5236_v13  ;;  %v1182_v41 = vld [vmem:[#allocation2 + $0x140] sm:$0x3]  ;;  %v1565_v23 = vld [vmem:[#allocation2 + $0x170] sm:$0x1] }
 0x17f   : > { %v1427_v24 = vadd.f32 %v1355_v16, %v1149_v42  ;;  %v2272_v37 = vmul.f32 %v4044_v59, %v2223_v5  ;;  %v1737_v63 = vsel %vm1011_vm2, %v1735_v32, %v5713_v39  ;;  %v5255_v31 = vmul.f32 %v4044_v59, %v5239_v33 }
 0x180   : > { %v2549_v11 = vmul.f32 %v4050_v2, %v2500_v25  ;;  %v5260_v60 = vmul.f32 %v4050_v2, %v5239_v33  ;;  %v2744_v26 = vadd.f32 %v2670_v52, %v2467_v35  ;;  %v835_v16 = vmul.f32 %v4780_v61, %v5795_v45  ;;  %v1842_v25 = vld [vmem:[#allocation2 + $0x170] sm:$0x3]  ;;  %v2224_v61 = vld [vmem:[#allocation2 + $0x1a0] sm:$0x1] }
 0x181   : > { %v1532_v42 = vadd.f32 %v1500_v15, %v1427_v24  ;;  %v2394_v5 = vrot.slane %v2272_v37, 1  ;;  %v5717_v32 = vrot.slane %v5255_v31, 1  ;;  %v955_v6 = vmul.f32 %v3736_v20, %v904_v44  ;;  %v2501_v15 = vld [vmem:[#allocation2 + $0x1a0] sm:$0x3] }
 0x182   : > { %v2671_v39 = vrot.slane %v2549_v11, 2  ;;  %v5719_v40 = vrot.slane %v5260_v60, 2  ;;  %2779 = vst [vmem:[%s4113_s13 + $0xc0] sm:$0xff] %v2744_v26  ;;  %v5891_v13 = vrot.slane %v5234_v38, 2  ;;  %v872_v24 = vadd.f32 %v5797_v55, %v835_v16 }
 0x183   : > { %v1809_v3 = vadd.f32 %v1737_v63, %v1532_v42  ;;  %v1233_v52 = vmul.f32 %v3850_v21, %v1182_v41  ;;  %v2396_v37 = vsel %vm1011_vm2, %v2394_v5, %v5717_v32  ;;  %v1078_v11 = vrot.slane %v955_v6, 1  ;;  %v905_v32 = vld [vmem:[#allocation2 + $0x148] sm:$0x1] }
 0x184   : > { %v2014_v35 = vsel %vm1289_vm3, %v2012_v7, %v5891_v13  ;;  %v1501_v44 = vmul.f32 %v4976_v0, %v3887_v43  ;;  %v1616_v63 = vmul.f32 %v3890_v56, %v1565_v23  ;;  %v2673_v7 = vsel %vm1289_vm3, %v2671_v39, %v5719_v40  ;;  %v1183_v39 = vld [vmem:[#allocation2 + $0x148] sm:$0x3] }
 0x185   : > { %v2086_v26 = vadd.f32 %v2014_v35, %v1809_v3  ;;  %v1356_v13 = vrot.slane %v1233_v52, 2  ;;  %v1893_v41 = vmul.f32 %v5783_v51, %v1842_v25  ;;  %v5892_v42 = vrot.slane %v5146_v34, 1 }
 0x186   : > { %v1738_v46 = vrot.slane %v1616_v63, 1  ;;  %v2275_v6 = vmul.f32 %v3929_v36, %v2224_v61  ;;  %v2552_v5 = vmul.f32 %v3948_v17, %v2501_v15  ;;  %v2160_v35 = vmul.f32 %v3926_v49, %v5172_v50 }
 0x187   : > { %v1079_v16 = vsel %vm1011_vm2, %v5892_v42, %v1078_v11  ;;  %v2191_v19 = vadd.f32 %v2159_v29, %v2086_v26  ;;  %v2015_v3 = vrot.slane %v1893_v41, 2  ;;  %v5893_v52 = vrot.slane %v5152_v8, 2  ;;  %v1566_v26 = vld [vmem:[#allocation2 + $0x178] sm:$0x1] }
 0x188   : > { %v1150_v23 = vadd.f32 %v1079_v16, %v872_v24  ;;  %v2397_v34 = vrot.slane %v2275_v6, 1  ;;  %v2674_v40 = vrot.slane %v2552_v5, 2  ;;  %v836_v11 = vmul.f32 %v4847_v22, %v3951_v53  ;;  %v1843_v41 = vld [vmem:[#allocation2 + $0x178] sm:$0x3] }
 0x189   : > { %v1357_v25 = vsel %vm1289_vm3, %v5893_v52, %v1356_v13  ;;  %v2468_v61 = vadd.f32 %v2396_v37, %v2191_v19  ;;  %v5894_v15 = vrot.slane %v5158_v48, 1  ;;  %v956_v24 = vmul.f32 %v3755_v30, %v905_v32  ;;  %v2225_v48 = vld [vmem:[#allocation2 + $0x1a8] sm:$0x1] }
 0x18a   : > { %v1428_v63 = vadd.f32 %v1357_v25, %v1150_v23  ;;  %v5895_v8 = vrot.slane %v5170_v62, 2  ;;  %v5896_v42 = vrot.slane %v5186_v4, 1  ;;  %v873_v22 = vadd.f32 %v3960_v47, %v836_v11  ;;  %v2502_v37 = vld [vmem:[#allocation2 + $0x1a8] sm:$0x3] }
 0x18b   : > { %v1739_v29 = vsel %vm1011_vm2, %v5894_v15, %v1738_v46  ;;  %v1234_v19 = vmul.f32 %v3977_v14, %v1183_v39  ;;  %v2745_v46 = vadd.f32 %v2673_v7, %v2468_v61  ;;  %v5897_v32 = vrot.slane %v5191_v9, 2 }
 0x18c   : > { %v2016_v13 = vsel %vm1289_vm3, %v5895_v8, %v2015_v3  ;;  %v2398_v16 = vsel %vm1011_vm2, %v5896_v42, %v2397_v34  ;;  %v1533_v6 = vadd.f32 %v1501_v44, %v1428_v63  ;;  %v1080_v23 = vrot.slane %v956_v24, 1 }
 0x18d   : > { %v2675_v5 = vsel %vm1289_vm3, %v5897_v32, %v2674_v40  ;;  %v1358_v62 = vrot.slane %v1234_v19, 2  ;;  %v1502_v3 = vmul.f32 %v5043_v54, %v3995_v57  ;;  %v1617_v4 = vmul.f32 %v3998_v1, %v1566_v26  ;;  %2780 = vst [vmem:[%s4113_s13 + $0xc8] sm:$0xff] %v2745_v46  ;;  %v906_v40 = vld [vmem:[#allocation2 + $0x150] sm:$0xfe] }
 0x18e   : > { %v1894_v52 = vmul.f32 %v4001_v12, %v1843_v41  ;;  %v1810_v25 = vadd.f32 %v1739_v29, %v1533_v6  ;;  %v5898_v39 = vrot.slane %v5206_v18, 1  ;;  %v2276_v44 = vmul.f32 %v4044_v59, %v2225_v48  ;;  %v1184_v29 = vld [vmem:[#allocation2 + $0x150] sm:$0xfc]  ;;  %v1567_v48 = vld [vmem:[#allocation2 + $0x180] sm:$0xfe] }
 0x18f   : > { %v2553_v9 = vmul.f32 %v4050_v2, %v2502_v37  ;;  %v5899_v11 = vrot.slane %v5220_v27, 2  ;;  %v1740_v63 = vrot.slane %v1617_v4, 1  ;;  %v837_v18 = vmul.f32 %v5887_v28, %v5795_v45 }
 0x190   : > { %v1081_v7 = vsel %vm1011_vm2, %v5898_v39, %v1080_v23  ;;  %v2017_v15 = vrot.slane %v1894_v52, 2  ;;  %v2087_v24 = vadd.f32 %v2016_v13, %v1810_v25  ;;  %v2399_v26 = vrot.slane %v2276_v44, 1  ;;  %v1844_v52 = vld [vmem:[#allocation2 + $0x180] sm:$0xfc] }
 0x191   : > { %v1151_v34 = vadd.f32 %v1081_v7, %v873_v22  ;;  %v1359_v61 = vsel %vm1289_vm3, %v5899_v11, %v1358_v62  ;;  %v2676_v41 = vrot.slane %v2553_v9, 2  ;;  %v5900_v42 = vrot.slane %v5225_v58, 1  ;;  %v2125_v11 = vld [vmem:[#allocation2 + $0x1b0] sm:$0xff] }
 0x192   : > { %v2161_v22 = vmul.f32 %v4033_v10, %v5239_v33  ;;  %v957_v27 = vmul.f32 %v3736_v20, %v906_v40  ;;  %v2192_v37 = vadd.f32 %v2160_v35, %v2087_v24  ;;  %v5901_v13 = vrot.slane %v5234_v38, 2 }
 0x193   : > { %v1429_v8 = vadd.f32 %v1359_v61, %v1151_v34  ;;  %v1741_v19 = vsel %vm1011_vm2, %v5900_v42, %v1740_v63  ;;  %v5902_v6 = vrot.slane %v5255_v31, 1  ;;  %v5903_v32 = vrot.slane %v5260_v60, 2  ;;  %v2226_v61 = vld [vmem:[#allocation2 + $0x1b0] sm:$0xfe] }
 0x194   : > { %v2018_v46 = vsel %vm1289_vm3, %v5901_v13, %v2017_v15  ;;  %v5342_v62 = vmul.f32 %v4976_v0, %v3736_v20  ;;  %v1082_v4 = vrot.slane %v957_v27, 1  ;;  %v1235_v35 = vmul.f32 %v3850_v21, %v1184_v29 }
 0x195   : > { %v2400_v28 = vsel %vm1011_vm2, %v5902_v6, %v2399_v26  ;;  %v2677_v58 = vsel %vm1289_vm3, %v5903_v32, %v2676_v41  ;;  %v1534_v23 = vadd.f32 %v1502_v3, %v1429_v8  ;;  %v2469_v38 = vadd.f32 %v2398_v16, %v2192_v37  ;;  %v5366_v41 = vld [vmem:[#allocation2 + $0x1c0] sm:$0xff]  ;;  %v5904_v8 = vld [vmem:[#allocation26_spill] sm:$0xff] }
 0x196   : > { %v874_v25 = vadd.f32 %v5797_v55, %v837_v18  ;;  %v5348_v31 = vmul.f32 %v4976_v0, %v3850_v21  ;;  %v1618_v60 = vmul.f32 %v3890_v56, %v1567_v48  ;;  %v1083_v3 = vrot.slane %v5342_v62, 1 }
 0x197   : > { %v1811_v39 = vadd.f32 %v1741_v19, %v1534_v23  ;;  %v1360_v7 = vrot.slane %v1235_v35, 2  ;;  %v5354_v44 = vmul.f32 %v5172_v50, %v3890_v56  ;;  %v2746_v9 = vadd.f32 %v2675_v5, %v2469_v38  ;;  %v2503_v5 = vld [vmem:[#allocation2 + $0x1b0] sm:$0xfc]  ;;  %v5905_v38 = vld [vmem:[#allocation25_spill] sm:$0xff] }
 0x198   : > { %v1361_v16 = vrot.slane %v5348_v31, 2  ;;  %v1742_v40 = vrot.slane %v1618_v60, 1  ;;  %v1895_v34 = vmul.f32 %v5783_v51, %v1844_v52  ;;  %v1084_v15 = vsel %vm1011_vm2, %v1082_v4, %v1083_v3  ;;  %v907_v4 = vld [vmem:[#allocation2 + $0x158] sm:$0xfe] }
 0x199   : > { %v2088_v63 = vadd.f32 %v2018_v46, %v1811_v39  ;;  %v1743_v24 = vrot.slane %v5354_v44, 1  ;;  %v5364_v26 = vmul.f32 %v5172_v50, %v5783_v51  ;;  %2781 = vst [vmem:[%s4113_s13 + $0xd0] sm:$0xff] %v2746_v9  ;;  %v1152_v18 = vadd.f32 %v1084_v15, %v874_v25  ;;  %v1185_v60 = vld [vmem:[#allocation2 + $0x158] sm:$0xfc] }
 0x19a   : > { %v1362_v29 = vsel %vm1289_vm3, %v1360_v7, %v1361_v16  ;;  %v1503_v42 = vmul.f32 %v5904_v8, %v3887_v43  ;;  %v2019_v19 = vrot.slane %v1895_v34, 2  ;;  %v2162_v37 = vmul.f32 %v3926_v49, %v2125_v11  ;;  %v1845_v8 = vld [vmem:[#allocation2 + $0x188] sm:$0xfc] }
 0x19b   : > { %v2193_v27 = vadd.f32 %v2161_v22, %v2088_v63  ;;  %v5724_v48 = vrot.slane %v5364_v26, 2  ;;  %v2277_v13 = vmul.f32 %v3929_v36, %v2226_v61  ;;  %v1430_v46 = vadd.f32 %v1362_v29, %v1152_v18  ;;  %v1568_v63 = vld [vmem:[#allocation2 + $0x188] sm:$0xfe] }
 0x19c   : > { %v5379_v6 = vmul.f32 %v3929_v36, %v5366_v41  ;;  %v2554_v32 = vmul.f32 %v3948_v17, %v2503_v5  ;;  %v5384_v23 = vmul.f32 %v3948_v17, %v5366_v41  ;;  %v1744_v22 = vsel %vm1011_vm2, %v1742_v40, %v1743_v24 }
 0x19d   : > { %v2470_v35 = vadd.f32 %v2400_v28, %v2193_v27  ;;  %v2401_v52 = vrot.slane %v2277_v13, 1  ;;  %v838_v25 = vmul.f32 %v5905_v38, %v3951_v53  ;;  %v1535_v39 = vadd.f32 %v1503_v42, %v1430_v46  ;;  %v5906_v27 = vld [vmem:[#allocation35_spill] sm:$0xff] }
 0x19e   : > { %v2021_v7 = vsel %vm1289_vm3, %v2019_v19, %v5724_v48  ;;  %v5720_v9 = vrot.slane %v5379_v6, 1  ;;  %v2678_v34 = vrot.slane %v2554_v32, 2  ;;  %v5721_v28 = vrot.slane %v5384_v23, 2 }
 0x19f   : > { %v2747_v11 = vadd.f32 %v2677_v58, %v2470_v35  ;;  %v958_v61 = vmul.f32 %v3755_v30, %v907_v4  ;;  %v5399_v40 = vmul.f32 %v5043_v54, %v3755_v30  ;;  %v1812_v15 = vadd.f32 %v1744_v22, %v1535_v39 }
 0x1a0   : > { %v2403_v5 = vsel %vm1011_vm2, %v2401_v52, %v5720_v9  ;;  %v875_v18 = vadd.f32 %v3960_v47, %v838_v25  ;;  %v1236_v29 = vmul.f32 %v3977_v14, %v1185_v60  ;;  %v5410_v19 = vmul.f32 %v5043_v54, %v3977_v14  ;;  %v2227_v60 = vld [vmem:[#allocation2 + $0x1b8] sm:$0xfe] }
 0x1a1   : > { %2782 = vst [vmem:[%s4113_s13 + $0xd8] sm:$0xff] %v2747_v11  ;;  %v1085_v58 = vrot.slane %v958_v61, 1  ;;  %v1086_v42 = vrot.slane %v5399_v40, 1  ;;  %v1504_v13 = vmul.f32 %v5906_v27, %v3995_v57  ;;  %v2089_v46 = vadd.f32 %v2021_v7, %v1812_v15  ;;  %v2504_v15 = vld [vmem:[#allocation2 + $0x1b8] sm:$0xfc] }
 0x1a2   : > { %v1363_v32 = vrot.slane %v1236_v29, 2  ;;  %v1619_v4 = vmul.f32 %v3998_v1, %v1568_v63  ;;  %v5417_v35 = vmul.f32 %v5239_v33, %v3998_v1  ;;  %v5723_v52 = vrot.slane %v5410_v19, 2  ;;  %v5429_v63 = vld [vmem:[#allocation2 + $0x1c8] sm:$0xff] }
 0x1a3   : > { %v1087_v22 = vsel %vm1011_vm2, %v1085_v58, %v1086_v42  ;;  %v1896_v38 = vmul.f32 %v4001_v12, %v1845_v8  ;;  %v5426_v25 = vmul.f32 %v5239_v33, %v4001_v12  ;;  %v2194_v39 = vadd.f32 %v2162_v37, %v2089_v46 }
 0x1a4   : > { %v1153_v7 = vadd.f32 %v1087_v22, %v875_v18  ;;  %v1745_v11 = vrot.slane %v1619_v4, 1  ;;  %v5722_v61 = vrot.slane %v5417_v35, 1  ;;  %v2680_v29 = vsel %vm1289_vm3, %v2678_v34, %v5721_v28  ;;  %v908_v18 = vld [vmem:[#allocation2 + $0x170] sm:$0x1]  ;;  %v2126_v22 = vld [vmem:[#allocation2 + $0x1b8] sm:$0xff] }
 0x1a5   : > { %v1365_v8 = vsel %vm1289_vm3, %v1363_v32, %v5723_v52  ;;  %v2471_v58 = vadd.f32 %v2403_v5, %v2194_v39  ;;  %v2022_v9 = vrot.slane %v1896_v38, 2  ;;  %v2278_v37 = vmul.f32 %v4044_v59, %v2227_v60  ;;  %v1186_v5 = vld [vmem:[#allocation2 + $0x170] sm:$0x3] }
 0x1a6   : > { %v1431_v27 = vadd.f32 %v1365_v8, %v1153_v7  ;;  %v1747_v46 = vsel %vm1011_vm2, %v1745_v11, %v5722_v61  ;;  %v2023_v4 = vrot.slane %v5426_v25, 2  ;;  %v5444_v34 = vmul.f32 %v4044_v59, %v5429_v63  ;;  %v1569_v11 = vld [vmem:[#allocation2 + $0x1a0] sm:$0x1] }
 0x1a7   : > { %v2555_v32 = vmul.f32 %v4050_v2, %v2504_v15  ;;  %v2748_v39 = vadd.f32 %v2680_v29, %v2471_v58  ;;  %v5449_v60 = vmul.f32 %v4050_v2, %v5429_v63  ;;  %v839_v7 = vmul.f32 %v4976_v0, %v5795_v45  ;;  %v1846_v58 = vld [vmem:[#allocation2 + $0x1a0] sm:$0x3] }
 0x1a8   : > { %v1536_v38 = vadd.f32 %v1504_v13, %v1431_v27  ;;  %v2404_v8 = vrot.slane %v2278_v37, 1  ;;  %v2405_v28 = vrot.slane %v5444_v34, 1  ;;  %v961_v61 = vmul.f32 %v3736_v20, %v908_v18 }
 0x1a9   : > { %2783 = vst [vmem:[%s4113_s13 + $0xe0] sm:$0xff] %v2748_v39  ;;  %v2163_v15 = vmul.f32 %v4033_v10, %v2126_v22  ;;  %v876_v29 = vadd.f32 %v5797_v55, %v839_v7  ;;  %v1239_v13 = vmul.f32 %v3850_v21, %v1186_v5  ;;  %v2024_v27 = vsel %vm1289_vm3, %v2022_v9, %v2023_v4 }
 0x1aa   : > { %v1813_v52 = vadd.f32 %v1747_v46, %v1536_v38  ;;  %v1088_v45 = vrot.slane %v961_v61, 1  ;;  %v1622_v0 = vmul.f32 %v3890_v56, %v1569_v11  ;;  %v2681_v48 = vrot.slane %v2555_v32, 2  ;;  %v2228_v46 = vld [vmem:[#allocation2 + $0x1d0] sm:$0x1]  ;;  %v909_v61 = vld [vmem:[#allocation2 + $0x178] sm:$0x1] }
 0x1ab   : > { %v2682_v20 = vrot.slane %v5449_v60, 2  ;;  %v1366_v18 = vrot.slane %v1239_v13, 2  ;;  %v2406_v55 = vsel %vm1011_vm2, %v2404_v8, %v2405_v28  ;;  %v1899_v9 = vmul.f32 %v5783_v51, %v1846_v58  ;;  %v1187_v32 = vld [vmem:[#allocation2 + $0x178] sm:$0x3]  ;;  %v2505_v11 = vld [vmem:[#allocation2 + $0x1d0] sm:$0x3] }
 0x1ac   : > { %v2090_v37 = vadd.f32 %v2024_v27, %v1813_v52  ;;  %v1089_v21 = vsel %vm1011_vm2, %v1083_v3, %v1088_v45  ;;  %v1748_v22 = vrot.slane %v1622_v0, 1  ;;  %v1505_v52 = vmul.f32 %v5172_v50, %v3887_v43  ;;  %v1570_v50 = vld [vmem:[#allocation2 + $0x1a8] sm:$0x1]  ;;  %v2229_v27 = vld [vmem:[#allocation2 + $0x1d8] sm:$0x1] }
 0x1ad   : > { %v1154_v56 = vadd.f32 %v1089_v21, %v876_v29  ;;  %v1367_v39 = vsel %vm1289_vm3, %v1361_v16, %v1366_v18  ;;  %v2281_v38 = vmul.f32 %v3929_v36, %v2228_v46  ;;  %v840_v62 = vmul.f32 %v5043_v54, %v3951_v53  ;;  %v1847_v16 = vld [vmem:[#allocation2 + $0x1a8] sm:$0x3] }
 0x1ae   : > { %v2195_v5 = vadd.f32 %v2163_v15, %v2090_v37  ;;  %v2683_v51 = vsel %vm1289_vm3, %v2681_v48, %v2682_v20  ;;  %v962_v43 = vmul.f32 %v3755_v30, %v909_v61  ;;  %v1749_v36 = vsel %vm1011_vm2, %v1743_v24, %v1748_v22 }
 0x1af   : > { %v1432_v7 = vadd.f32 %v1367_v39, %v1154_v56  ;;  %v2025_v31 = vrot.slane %v1899_v9, 2  ;;  %v877_v53 = vadd.f32 %v3960_v47, %v840_v62  ;;  %v1240_v54 = vmul.f32 %v3977_v14, %v1187_v32 }
 0x1b0   : > { %v2472_v3 = vadd.f32 %v2406_v55, %v2195_v5  ;;  %v1090_v15 = vrot.slane %v962_v43, 1  ;;  %v2407_v29 = vrot.slane %v2281_v38, 1  ;;  %v2558_v13 = vmul.f32 %v3948_v17, %v2505_v11  ;;  %v2506_v55 = vld [vmem:[#allocation2 + $0x1d8] sm:$0x3] }
 0x1b1   : > { %v1537_v48 = vadd.f32 %v1505_v52, %v1432_v7  ;;  %v1368_v30 = vrot.slane %v1240_v54, 2  ;;  %v1623_v58 = vmul.f32 %v3998_v1, %v1570_v50  ;;  %v2164_v47 = vmul.f32 %v3926_v49, %v5366_v41 }
 0x1b2   : > { %v2749_v8 = vadd.f32 %v2683_v51, %v2472_v3  ;;  %v1091_v14 = vsel %vm1011_vm2, %v1086_v42, %v1090_v15  ;;  %v1900_v24 = vmul.f32 %v4001_v12, %v1847_v16  ;;  %v5907_v45 = vrot.slane %v5364_v26, 2 }
 0x1b3   : > { %v1814_v44 = vadd.f32 %v1749_v36, %v1537_v48  ;;  %v1155_v0 = vadd.f32 %v1091_v14, %v877_v53  ;;  %v1506_v1 = vmul.f32 %v5239_v33, %v3995_v57  ;;  %v1750_v37 = vrot.slane %v1623_v58, 1 }
 0x1b4   : > { %2784 = vst [vmem:[%s4113_s13 + $0xe8] sm:$0xff] %v2749_v8  ;;  %v2026_v17 = vsel %vm1289_vm3, %v5907_v45, %v2025_v31  ;;  %v5908_v46 = vrot.slane %v5410_v19, 2  ;;  %v2282_v41 = vmul.f32 %v4044_v59, %v2229_v27  ;;  %v5909_v40 = vrot.slane %v5379_v6, 1 }
 0x1b5   : > { %v2091_v18 = vadd.f32 %v2026_v17, %v1814_v44  ;;  %v2684_v26 = vrot.slane %v2558_v13, 2  ;;  %v5910_v57 = vrot.slane %v5417_v35, 1  ;;  %v2027_v22 = vrot.slane %v1900_v24, 2 }
 0x1b6   : > { %v1369_v49 = vsel %vm1289_vm3, %v5908_v46, %v1368_v30  ;;  %v2408_v12 = vsel %vm1011_vm2, %v5909_v40, %v2407_v29  ;;  %v2409_v59 = vrot.slane %v2282_v41, 1  ;;  %v2559_v61 = vmul.f32 %v4050_v2, %v2506_v55 }
 0x1b7   : > { %v1433_v42 = vadd.f32 %v1369_v49, %v1155_v0  ;;  %v2196_v21 = vadd.f32 %v2164_v47, %v2091_v18  ;;  %v1751_v33 = vsel %vm1011_vm2, %v5910_v57, %v1750_v37  ;;  %v5911_v6 = vrot.slane %v5384_v23, 2 }
 0x1b8   : > { %v2165_v52 = vmul.f32 %v4033_v10, %v5429_v63  ;;  %v2028_v32 = vsel %vm1289_vm3, %v2023_v4, %v2027_v22  ;;  %v2410_v23 = vsel %vm1011_vm2, %v2405_v28, %v2409_v59  ;;  %v2686_v39 = vrot.slane %v2559_v61, 2 }
 0x1b9   : > { %v1538_v19 = vadd.f32 %v1506_v1, %v1433_v42  ;;  %v2473_v9 = vadd.f32 %v2408_v12, %v2196_v21  ;;  %v2685_v5 = vsel %vm1289_vm3, %v5911_v6, %v2684_v26 }
 0x1ba   : > { %v2687_v25 = vsel %vm1289_vm3, %v2682_v20, %v2686_v39 }
 0x1bb   : > { %v1815_v56 = vadd.f32 %v1751_v33, %v1538_v19  ;;  %v2750_v35 = vadd.f32 %v2685_v5, %v2473_v9 }
 0x1bd   : > { %v2092_v2 = vadd.f32 %v2028_v32, %v1815_v56  ;;  %2785 = vst [vmem:[%s4113_s13 + $0xf0] sm:$0xff] %v2750_v35 }
 0x1bf   : > { %v2197_v10 = vadd.f32 %v2165_v52, %v2092_v2 }
 0x1c1   : > { %v2474_v63 = vadd.f32 %v2410_v23, %v2197_v10 }
 0x1c3   : > { %v2751_v4 = vadd.f32 %v2687_v25, %v2474_v63 }
 0x1c5   : > { %2786 = vst [vmem:[%s4113_s13 + $0xf8] sm:$0xff] %v2751_v4 }
 0x1c6   : > { %3269 = shalt.err (!%p3266_p12)
}
 0x1c7   : > { %s3354_s1 = smov 256   ;;  %s3355_s20 = smov 16  }
 0x1c8   : > { %3028 = dma.vmem_to_hbm [thread:$0]  (%p3495_p0), %s2806_s26, 4096, %s2808_s16, %s2788_s17, %s3354_s1, %s3354_s1, %s3355_s20  }
 0x1c9 PF: > { %s5913_s23 = sld [smem:[#allocation19_spill]] }
 0x1ca   : > { %s5914_s6 = sld [smem:[#allocation16_spill]] }
 0x1cf   : > { %p3051_p13 = scmp.ge.s32.totalorder %s5913_s23, 2 }
 0x1d0   : > { %s2822_s10 = sand.u32 1, %s5914_s6  }
 0x1d1   : > { %p3045_p3 = pnand %p3051_p13, %p3499_p2  ;;  %s2823_s14 = scalar_lea.sflag [#allocation5], %s2822_s10 }
 0x1d3   : > { %p3046_p4 = pneg %p3045_p3 }
 0x1d5   : > { %3315 = dma.done.wait (%p3046_p4), %s2823_s14, 4096  }
 0x1d6   : > { %3317 = vsyncadd (%p3046_p4), %s2823_s14, 4294963200  ;;  %s25_s25 = sadd.s32 1, %s5913_s23   ;;  %s5916_s13 = sld [smem:[#allocation17_spill]] }
 0x1d7   : > { %p22_p1 = scmp.ge.s32.totalorder %s25_s25, 6   ;;  %s5917_s20 = sld [smem:[#allocation22_spill]] }
 0x1d8   : > { %s5918_s21 = sld [smem:[#allocation18_spill]]  ;;  %s5921_s18 = smov %s3324_s19 }
 0x1d9   : > { %s5919_s23 = sld [smem:[#allocation20_spill]]  ;;  %s5923_s22 = smov %s3344_s24 }
 0x1da   : > { %s5920_s27 = sld [smem:[#allocation21_spill]] }
 0x1dc   : > { %s5922_s19 = smov %s5916_s13  ;;  %24 = sbr.rel (!%p22_p1) target bundleno = 14 (0xe), region = 150 }
 0x1e0   : > { %s5924_s24 = smov %s5920_s27 }
 0x1e1   :  { %2829 = vsyncpa [#allocation4], 1 }
 0x1e2   :  { %2831 = vsyncpa [#allocation4 + $0x1], 1 }
 0x1e3   :  { %2832 = vsyncpa [#allocation7], 1 }
 0x1e4   :  { %2834 = vsyncpa [#allocation7 + $0x1], 1 }
 0x1e5   :  { %2835 = vsyncpa [#allocation10], 1 }
 0x1e6   :  { %2836 = vsyncpa [#allocation5], 1 }
 0x1e7   :  { %2838 = vsyncpa [#allocation5 + $0x1], 1 }

</bundles_post_ra>
